<compile_context>
chip_gen: v7x
topology: tpu7x:2x2x1
jax: 0.10.0
libtpu: 0.0.40
codegen_flags: <defaults>
</compile_context>

<pallas_src>
import functools

import jax
import jax.numpy as jnp
from jax import lax
from jax.experimental import pallas as pl
from jax.experimental.pallas import tpu as pltpu


def _gate_pad(H):
    """Per-gate lane block: 64 lanes for H <= 64, else round up to 128s."""
    return 64 if H <= 64 else ((H + 127) // 128) * 128


def _unroll_factor(T, max_unroll=8):
    """Largest divisor of T that is <= max_unroll (keeps fori_loop tidy)."""
    for u in range(min(max_unroll, T), 0, -1):
        if T % u == 0:
            return u
    return 1


# ----------------------------------------------------------------------------
# Fused kernel: entire autoencoder in one invocation, everything VMEM-resident.
# ----------------------------------------------------------------------------
def _apply_gates(gates, c, H, gp):
    """gates: (1, 4*gp) packed as (i, f, o, g). One sigmoid, two tanh."""
    sig = jax.nn.sigmoid(gates[:, :3 * gp])
    i = sig[:, 0 * gp:0 * gp + H]
    f = sig[:, 1 * gp:1 * gp + H]
    o = sig[:, 2 * gp:2 * gp + H]
    g = jnp.tanh(gates[:, 3 * gp:3 * gp + H])
    c_new = f * c + i * g
    h_new = o * jnp.tanh(c_new)
    return h_new, c_new


def _fused_kernel(T, F, E, gps,
                  x_ref,
                  w1i_ref, w1h_ref, b1_ref,
                  w2i_ref, w2h_ref, b2_ref,
                  w3i_ref, w3h_ref, b3_ref,
                  w4i_ref, w4h_ref, b4_ref,
                  wo_ref, bo_ref,
                  out_ref,
                  gx_ref, y_ref):
    gp1, gp2, gp3, gp4 = gps
    H1, H2 = 2 * E, E
    unroll = _unroll_factor(T)

    # ---- Encoder layer 1 input-side gates for ALL steps, hoisted out of the
    # recurrence. F == 1 makes this an outer product -> pure VPU broadcast.
    if F == 1:
        gx_ref[...] = x_ref[...] * w1i_ref[...] + b1_ref[...]
    else:
        gx_ref[...] = (jnp.dot(x_ref[...], w1i_ref[...],
                               preferred_element_type=jnp.float32)
                       + b1_ref[...])

    # ----- Encoder: both LSTM layers chained per time step -----
    def enc_body(t, carry):
        h1, c1, h2, c2 = carry
        g1 = gx_ref[pl.ds(t, 1), :] + jnp.dot(
            h1, w1h_ref[...], preferred_element_type=jnp.float32)
        h1, c1 = _apply_gates(g1, c1, H1, gp1)
        g2 = (jnp.dot(h1, w2i_ref[...], preferred_element_type=jnp.float32)
              + jnp.dot(h2, w2h_ref[...], preferred_element_type=jnp.float32)
              + b2_ref[...])
        h2, c2 = _apply_gates(g2, c2, H2, gp2)
        return h1, c1, h2, c2

    enc_init = (jnp.zeros((1, H1), jnp.float32), jnp.zeros((1, H1), jnp.float32),
                jnp.zeros((1, H2), jnp.float32), jnp.zeros((1, H2), jnp.float32))
    _, _, z, _ = lax.fori_loop(0, T, enc_body, enc_init, unroll=unroll)
    # z: (1, E) latent

    # ----- Decoder: latent is constant -> its input-side gates computed once.
    gz = (jnp.dot(z, w3i_ref[...], preferred_element_type=jnp.float32)
          + b3_ref[...])                                         # (1, 4*gp3)

    def dec_body(t, carry):
        h3, c3, h4, c4 = carry
        g3 = gz + jnp.dot(h3, w3h_ref[...], preferred_element_type=jnp.float32)
        h3, c3 = _apply_gates(g3, c3, E, gp3)
        g4 = (jnp.dot(h3, w4i_ref[...], preferred_element_type=jnp.float32)
              + jnp.dot(h4, w4h_ref[...], preferred_element_type=jnp.float32)
              + b4_ref[...])
        h4, c4 = _apply_gates(g4, c4, H1, gp4)
        y_ref[pl.ds(t, 1), :] = h4
        return h3, c3, h4, c4

    dec_init = (jnp.zeros((1, E), jnp.float32), jnp.zeros((1, E), jnp.float32),
                jnp.zeros((1, H1), jnp.float32), jnp.zeros((1, H1), jnp.float32))
    lax.fori_loop(0, T, dec_body, dec_init, unroll=unroll)

    # ----- Final Linear, lane-dense (1, T) output:
    #       out[0, t] = sum_k wo[0, k] * y[t, k] + bo
    y = y_ref[...]                                               # (T, 2E)
    out_ref[...] = (
        lax.dot_general(wo_ref[...], y,
                        dimension_numbers=(((1,), (1,)), ((), ())),
                        preferred_element_type=jnp.float32)
        + bo_ref[...])


def recurrent_autoencoder(x, packed, seq_len, n_features, embedding_dim):
    """x: (seq_len, n_features) with n_features == 1. packed: pack_params(...)."""
    assert n_features == 1, "torch tutorial model requires n_features == 1"
    T, E = seq_len, embedding_dim
    gps = (_gate_pad(2 * E), _gate_pad(E), _gate_pad(E), _gate_pad(2 * E))
    kernel = functools.partial(_fused_kernel, T, n_features, E, gps)
    out_row = pl.pallas_call(
        kernel,
        out_shape=jax.ShapeDtypeStruct((1, T), jnp.float32),
        scratch_shapes=[
            pltpu.VMEM((T, 4 * gps[0]), jnp.float32),   # hoisted enc-L1 gates
            pltpu.VMEM((T, 2 * E), jnp.float32),        # decoder outputs y
        ],
    )(x.reshape(T, n_features).astype(jnp.float32),
      packed["w1i"], packed["w1h"], packed["b1"],
      packed["w2i"], packed["w2h"], packed["b2"],
      packed["w3i"], packed["w3h"], packed["b3"],
      packed["w4i"], packed["w4h"], packed["b4"],
      packed["wo"], packed["bo"])
    return out_row.reshape(seq_len, n_features)


# ----------------------------------------------------------------------------
# Parameter init (PyTorch layout) + one-time packing into kernel-ready layouts.
# ----------------------------------------------------------------------------
def _lstm_params(key, n_in, H):
    k = 1.0 / jnp.sqrt(jnp.float32(H))
    ks = jax.random.split(key, 4)
    return dict(
        w_ih=jax.random.uniform(ks[0], (4 * H, n_in), jnp.float32, -k, k),
        w_hh=jax.random.uniform(ks[1], (4 * H, H), jnp.float32, -k, k),
        b_ih=jax.random.uniform(ks[2], (4 * H,), jnp.float32, -k, k),
        b_hh=jax.random.uniform(ks[3], (4 * H,), jnp.float32, -k, k),
    )


def init_params(key, seq_len, n_features, embedding_dim):
    E = embedding_dim
    H2 = 2 * E
    ks = jax.random.split(key, 6)
    k_lin = 1.0 / jnp.sqrt(jnp.float32(H2))
    return dict(
        enc_rnn1=_lstm_params(ks[0], n_features, H2),
        enc_rnn2=_lstm_params(ks[1], H2, E),
        dec_rnn1=_lstm_params(ks[2], E, E),
        dec_rnn2=_lstm_params(ks[3], E, H2),
        out_w=jax.random.uniform(ks[4], (n_features, H2), jnp.float32,
                                 -k_lin, k_lin),
        out_b=jax.random.uniform(ks[5], (n_features,), jnp.float32,
                                 -k_lin, k_lin),
    )


def _pack_lstm(p):
    """PyTorch LSTM params -> kernel layout.

    Returns (w_i, w_h, b):
      w_i (n_in, 4*gp) = W_ih^T, gates reordered (i, f, g, o) -> (i, f, o, g),
                         each gate's H columns padded to a gp-lane block;
      w_h (H,    4*gp) = W_hh^T, same gate layout;
      b   (1,    4*gp) = b_ih + b_hh, same gate layout.
    """
    w_ih, w_hh = p["w_ih"], p["w_hh"]          # (4H, n_in), (4H, H)
    H = w_hh.shape[1]
    n_in = w_ih.shape[1]
    gp = _gate_pad(H)
    perm = jnp.array([0, 1, 3, 2])             # torch (i,f,g,o) -> (i,f,o,g)

    def reorder_pad_T(w, rows):
        w = w.reshape(4, H, rows)[perm]                   # reorder gates
        w = jnp.pad(w, ((0, 0), (0, gp - H), (0, 0)))     # pad gate units
        return w.reshape(4 * gp, rows).T                  # (rows, 4*gp)

    w_i = reorder_pad_T(w_ih, n_in)
    w_h = reorder_pad_T(w_hh, H)
    b = (p["b_ih"] + p["b_hh"]).reshape(4, H)[perm]
    b = jnp.pad(b, ((0, 0), (0, gp - H))).reshape(1, 4 * gp)
    return w_i, w_h, b


def pack_params(params):
    w1i, w1h, b1 = _pack_lstm(params["enc_rnn1"])
    w2i, w2h, b2 = _pack_lstm(params["enc_rnn2"])
    w3i, w3h, b3 = _pack_lstm(params["dec_rnn1"])
    w4i, w4h, b4 = _pack_lstm(params["dec_rnn2"])
    return dict(w1i=w1i, w1h=w1h, b1=b1,
                w2i=w2i, w2h=w2h, b2=b2,
                w3i=w3i, w3h=w3h, b3=b3,
                w4i=w4i, w4h=w4h, b4=b4,
                wo=params["out_w"],                   # (1, 2E), lane-dense
                bo=params["out_b"].reshape(1, 1))     # (1, 1)


# ----------------------------------------------------------------------------
# Pure-JAX reference (correctness check against PyTorch semantics)
# ----------------------------------------------------------------------------
def _lstm_ref(x, w_ih, w_hh, b_ih, b_hh):
    T, B, _ = x.shape
    H = w_hh.shape[1]

    def step(carry, x_t):
        h, c = carry
        gates = x_t @ w_ih.T + h @ w_hh.T + b_ih + b_hh
        i, f, g, o = jnp.split(gates, 4, axis=-1)
        c = jax.nn.sigmoid(f) * c + jax.nn.sigmoid(i) * jnp.tanh(g)
        h = jax.nn.sigmoid(o) * jnp.tanh(c)
        return (h, c), h

    init = (jnp.zeros((B, H), jnp.float32), jnp.zeros((B, H), jnp.float32))
    _, hs = jax.lax.scan(step, init, x)
    return hs


def _ref_forward(x, params, seq_len, n_features, embedding_dim):
    E = embedding_dim
    xt = jnp.transpose(x.reshape(1, seq_len, n_features), (1, 0, 2))
    h1 = _lstm_ref(xt, **params["enc_rnn1"])
    h2 = _lstm_ref(h1, **params["enc_rnn2"])
    z = h2[-1].reshape(n_features, E)
    zr = jnp.tile(z, (seq_len, n_features)).reshape(n_features, seq_len, E)
    d1 = _lstm_ref(jnp.transpose(zr, (1, 0, 2)), **params["dec_rnn1"])
    d2 = _lstm_ref(d1, **params["dec_rnn2"])
    y = jnp.transpose(d2, (1, 0, 2)).reshape(seq_len, 2 * E)
    return y @ params["out_w"].T + params["out_b"]


if __name__ == "__main__":
    seq_len, n_features, embedding_dim = 8, 1, 32   # n_features must be 1

    key = jax.random.PRNGKey(0)
    k_param, k_x = jax.random.split(key)
    params = init_params(k_param, seq_len, n_features, embedding_dim)
    packed = pack_params(params)                    # one-time, kernel-ready layouts
    x = jax.random.normal(k_x, (seq_len, n_features), jnp.float32)

    fwd = jax.jit(functools.partial(recurrent_autoencoder,
                                    seq_len=seq_len, n_features=n_features,
                                    embedding_dim=embedding_dim))
    out = jax.block_until_ready(fwd(x, packed))

    ref = _ref_forward(x, params, seq_len, n_features, embedding_dim)
    assert out.shape == (seq_len, n_features), out.shape
    assert jnp.allclose(out, ref, rtol=2e-4, atol=1e-4), (out, ref)

    print("KERNEL_OK")
</pallas_src>

<mosaic_0001>
module attributes {stable_mosaic.version = 11 : i64} {
  func.func @_fused_kernel(%arg0: memref<8x1xf32, #tpu.memory_space<vmem>>, %arg1: memref<1x256xf32, #tpu.memory_space<vmem>>, %arg2: memref<64x256xf32, #tpu.memory_space<vmem>>, %arg3: memref<1x256xf32, #tpu.memory_space<vmem>>, %arg4: memref<64x256xf32, #tpu.memory_space<vmem>>, %arg5: memref<32x256xf32, #tpu.memory_space<vmem>>, %arg6: memref<1x256xf32, #tpu.memory_space<vmem>>, %arg7: memref<32x256xf32, #tpu.memory_space<vmem>>, %arg8: memref<32x256xf32, #tpu.memory_space<vmem>>, %arg9: memref<1x256xf32, #tpu.memory_space<vmem>>, %arg10: memref<32x256xf32, #tpu.memory_space<vmem>>, %arg11: memref<64x256xf32, #tpu.memory_space<vmem>>, %arg12: memref<1x256xf32, #tpu.memory_space<vmem>>, %arg13: memref<1x64xf32, #tpu.memory_space<vmem>>, %arg14: memref<1x1xf32, #tpu.memory_space<vmem>>, %arg15: memref<1x8xf32, #tpu.memory_space<vmem>>, %arg16: memref<8x256xf32, #tpu.memory_space<vmem>>, %arg17: memref<8x64xf32, #tpu.memory_space<vmem>>) attributes {dimension_semantics = [], scalar_prefetch = 0 : i64, scratch_operands = 2 : i64, tpu.core_type = #tpu.core_type<tc>} {
    %c0 = arith.constant 0 : index
    %c0_0 = arith.constant 0 : index
    %0 = vector.load %arg0[%c0, %c0_0] : memref<8x1xf32, #tpu.memory_space<vmem>>, vector<8x1xf32>
    %c0_1 = arith.constant 0 : index
    %c0_2 = arith.constant 0 : index
    %1 = vector.load %arg1[%c0_1, %c0_2] : memref<1x256xf32, #tpu.memory_space<vmem>>, vector<1x256xf32>
    %2 = vector.broadcast %0 : vector<8x1xf32> to vector<8x256xf32>
    %3 = vector.broadcast %1 : vector<1x256xf32> to vector<8x256xf32>
    %4 = arith.mulf %2, %3 : vector<8x256xf32>
    %c0_3 = arith.constant 0 : index
    %c0_4 = arith.constant 0 : index
    %5 = vector.load %arg3[%c0_3, %c0_4] : memref<1x256xf32, #tpu.memory_space<vmem>>, vector<1x256xf32>
    %6 = vector.broadcast %5 : vector<1x256xf32> to vector<8x256xf32>
    %7 = arith.addf %4, %6 : vector<8x256xf32>
    %c0_5 = arith.constant 0 : index
    %c0_6 = arith.constant 0 : index
    %8 = vector.load %arg16[%c0_5, %c0_6] : memref<8x256xf32, #tpu.memory_space<vmem>>, vector<8x256xf32>
    tpu.vector_store %arg16[%c0_5, %c0_6], %7 {strides = array<i32>} : memref<8x256xf32, #tpu.memory_space<vmem>>, vector<8x256xf32>,
    %cst = arith.constant 0.000000e+00 : f32
    %9 = vector.broadcast %cst : f32 to vector<1x64xf32>
    %cst_7 = arith.constant 0.000000e+00 : f32
    %10 = vector.broadcast %cst_7 : f32 to vector<1x64xf32>
    %cst_8 = arith.constant 0.000000e+00 : f32
    %11 = vector.broadcast %cst_8 : f32 to vector<1x32xf32>
    %cst_9 = arith.constant 0.000000e+00 : f32
    %12 = vector.broadcast %cst_9 : f32 to vector<1x32xf32>
    %c0_i32 = arith.constant 0 : i32
    %13 = arith.index_cast %c0_i32 : i32 to index
    %c0_10 = arith.constant 0 : index
    %14 = vector.load %arg16[%13, %c0_10] : memref<8x256xf32, #tpu.memory_space<vmem>>, vector<1x256xf32>
    %c0_11 = arith.constant 0 : index
    %c0_12 = arith.constant 0 : index
    %15 = vector.load %arg2[%c0_11, %c0_12] : memref<64x256xf32, #tpu.memory_space<vmem>>, vector<64x256xf32>
    %cst_13 = arith.constant dense<0.000000e+00> : vector<1x256xf32>
    %16 = tpu.matmul %9, %15, %cst_13 {dimension_numbers = #tpu.dot_dimension_numbers<[1], [0], [0], [1], [0, 0, 1, 1], [], []>} : vector<1x64xf32>, vector<64x256xf32>, vector<1x256xf32> -> vector<1x256xf32>
    %17 = arith.addf %14, %16 : vector<1x256xf32>
    %18 = vector.extract_strided_slice %17 {offsets = [0, 0], sizes = [1, 192], strides = [1, 1]} : vector<1x256xf32> to vector<1x192xf32>
    %19 = arith.negf %18 : vector<1x192xf32>
    %20 = math.exp %19 : vector<1x192xf32>
    %cst_14 = arith.constant 1.000000e+00 : f32
    %21 = vector.broadcast %cst_14 : f32 to vector<1x192xf32>
    %22 = arith.addf %21, %20 : vector<1x192xf32>
    %23 = arith.divf %21, %22 : vector<1x192xf32>
    %24 = vector.extract_strided_slice %23 {offsets = [0, 0], sizes = [1, 64], strides = [1, 1]} : vector<1x192xf32> to vector<1x64xf32>
    %25 = vector.extract_strided_slice %23 {offsets = [0, 64], sizes = [1, 64], strides = [1, 1]} : vector<1x192xf32> to vector<1x64xf32>
    %26 = vector.extract_strided_slice %23 {offsets = [0, 128], sizes = [1, 64], strides = [1, 1]} : vector<1x192xf32> to vector<1x64xf32>
    %27 = vector.extract_strided_slice %17 {offsets = [0, 192], sizes = [1, 64], strides = [1, 1]} : vector<1x256xf32> to vector<1x64xf32>
    %28 = math.tanh %27 : vector<1x64xf32>
    %29 = arith.mulf %25, %10 : vector<1x64xf32>
    %30 = arith.mulf %24, %28 : vector<1x64xf32>
    %31 = arith.addf %29, %30 : vector<1x64xf32>
    %32 = math.tanh %31 : vector<1x64xf32>
    %33 = arith.mulf %26, %32 : vector<1x64xf32>
    %c0_15 = arith.constant 0 : index
    %c0_16 = arith.constant 0 : index
    %34 = vector.load %arg4[%c0_15, %c0_16] : memref<64x256xf32, #tpu.memory_space<vmem>>, vector<64x256xf32>
    %cst_17 = arith.constant dense<0.000000e+00> : vector<1x256xf32>
    %35 = tpu.matmul %33, %34, %cst_17 {dimension_numbers = #tpu.dot_dimension_numbers<[1], [0], [0], [1], [0, 0, 1, 1], [], []>} : vector<1x64xf32>, vector<64x256xf32>, vector<1x256xf32> -> vector<1x256xf32>
    %c0_18 = arith.constant 0 : index
    %c0_19 = arith.constant 0 : index
    %36 = vector.load %arg5[%c0_18, %c0_19] : memref<32x256xf32, #tpu.memory_space<vmem>>, vector<32x256xf32>
    %cst_20 = arith.constant dense<0.000000e+00> : vector<1x256xf32>
    %37 = tpu.matmul %11, %36, %cst_20 {dimension_numbers = #tpu.dot_dimension_numbers<[1], [0], [0], [1], [0, 0, 1, 1], [], []>} : vector<1x32xf32>, vector<32x256xf32>, vector<1x256xf32> -> vector<1x256xf32>
    %38 = arith.addf %35, %37 : vector<1x256xf32>
    %c0_21 = arith.constant 0 : index
    %c0_22 = arith.constant 0 : index
    %39 = vector.load %arg6[%c0_21, %c0_22] : memref<1x256xf32, #tpu.memory_space<vmem>>, vector<1x256xf32>
    %40 = arith.addf %38, %39 : vector<1x256xf32>
    %41 = vector.extract_strided_slice %40 {offsets = [0, 0], sizes = [1, 192], strides = [1, 1]} : vector<1x256xf32> to vector<1x192xf32>
    %42 = arith.negf %41 : vector<1x192xf32>
    %43 = math.exp %42 : vector<1x192xf32>
    %cst_23 = arith.constant 1.000000e+00 : f32
    %44 = vector.broadcast %cst_23 : f32 to vector<1x192xf32>
    %45 = arith.addf %44, %43 : vector<1x192xf32>
    %46 = arith.divf %44, %45 : vector<1x192xf32>
    %47 = vector.extract_strided_slice %46 {offsets = [0, 0], sizes = [1, 32], strides = [1, 1]} : vector<1x192xf32> to vector<1x32xf32>
    %48 = vector.extract_strided_slice %46 {offsets = [0, 64], sizes = [1, 32], strides = [1, 1]} : vector<1x192xf32> to vector<1x32xf32>
    %49 = vector.extract_strided_slice %46 {offsets = [0, 128], sizes = [1, 32], strides = [1, 1]} : vector<1x192xf32> to vector<1x32xf32>
    %50 = vector.extract_strided_slice %40 {offsets = [0, 192], sizes = [1, 32], strides = [1, 1]} : vector<1x256xf32> to vector<1x32xf32>
    %51 = math.tanh %50 : vector<1x32xf32>
    %52 = arith.mulf %48, %12 : vector<1x32xf32>
    %53 = arith.mulf %47, %51 : vector<1x32xf32>
    %54 = arith.addf %52, %53 : vector<1x32xf32>
    %55 = math.tanh %54 : vector<1x32xf32>
    %56 = arith.mulf %49, %55 : vector<1x32xf32>
    %c1_i32 = arith.constant 1 : i32
    %57 = arith.index_cast %c1_i32 : i32 to index
    %c0_24 = arith.constant 0 : index
    %58 = vector.load %arg16[%57, %c0_24] : memref<8x256xf32, #tpu.memory_space<vmem>>, vector<1x256xf32>
    %c0_25 = arith.constant 0 : index
    %c0_26 = arith.constant 0 : index
    %59 = vector.load %arg2[%c0_25, %c0_26] : memref<64x256xf32, #tpu.memory_space<vmem>>, vector<64x256xf32>
    %cst_27 = arith.constant dense<0.000000e+00> : vector<1x256xf32>
    %60 = tpu.matmul %33, %59, %cst_27 {dimension_numbers = #tpu.dot_dimension_numbers<[1], [0], [0], [1], [0, 0, 1, 1], [], []>} : vector<1x64xf32>, vector<64x256xf32>, vector<1x256xf32> -> vector<1x256xf32>
    %61 = arith.addf %58, %60 : vector<1x256xf32>
    %62 = vector.extract_strided_slice %61 {offsets = [0, 0], sizes = [1, 192], strides = [1, 1]} : vector<1x256xf32> to vector<1x192xf32>
    %63 = arith.negf %62 : vector<1x192xf32>
    %64 = math.exp %63 : vector<1x192xf32>
    %cst_28 = arith.constant 1.000000e+00 : f32
    %65 = vector.broadcast %cst_28 : f32 to vector<1x192xf32>
    %66 = arith.addf %65, %64 : vector<1x192xf32>
    %67 = arith.divf %65, %66 : vector<1x192xf32>
    %68 = vector.extract_strided_slice %67 {offsets = [0, 0], sizes = [1, 64], strides = [1, 1]} : vector<1x192xf32> to vector<1x64xf32>
    %69 = vector.extract_strided_slice %67 {offsets = [0, 64], sizes = [1, 64], strides = [1, 1]} : vector<1x192xf32> to vector<1x64xf32>
    %70 = vector.extract_strided_slice %67 {offsets = [0, 128], sizes = [1, 64], strides = [1, 1]} : vector<1x192xf32> to vector<1x64xf32>
    %71 = vector.extract_strided_slice %61 {offsets = [0, 192], sizes = [1, 64], strides = [1, 1]} : vector<1x256xf32> to vector<1x64xf32>
    %72 = math.tanh %71 : vector<1x64xf32>
    %73 = arith.mulf %69, %31 : vector<1x64xf32>
    %74 = arith.mulf %68, %72 : vector<1x64xf32>
    %75 = arith.addf %73, %74 : vector<1x64xf32>
    %76 = math.tanh %75 : vector<1x64xf32>
    %77 = arith.mulf %70, %76 : vector<1x64xf32>
    %c0_29 = arith.constant 0 : index
    %c0_30 = arith.constant 0 : index
    %78 = vector.load %arg4[%c0_29, %c0_30] : memref<64x256xf32, #tpu.memory_space<vmem>>, vector<64x256xf32>
    %cst_31 = arith.constant dense<0.000000e+00> : vector<1x256xf32>
    %79 = tpu.matmul %77, %78, %cst_31 {dimension_numbers = #tpu.dot_dimension_numbers<[1], [0], [0], [1], [0, 0, 1, 1], [], []>} : vector<1x64xf32>, vector<64x256xf32>, vector<1x256xf32> -> vector<1x256xf32>
    %c0_32 = arith.constant 0 : index
    %c0_33 = arith.constant 0 : index
    %80 = vector.load %arg5[%c0_32, %c0_33] : memref<32x256xf32, #tpu.memory_space<vmem>>, vector<32x256xf32>
    %cst_34 = arith.constant dense<0.000000e+00> : vector<1x256xf32>
    %81 = tpu.matmul %56, %80, %cst_34 {dimension_numbers = #tpu.dot_dimension_numbers<[1], [0], [0], [1], [0, 0, 1, 1], [], []>} : vector<1x32xf32>, vector<32x256xf32>, vector<1x256xf32> -> vector<1x256xf32>
    %82 = arith.addf %79, %81 : vector<1x256xf32>
    %c0_35 = arith.constant 0 : index
    %c0_36 = arith.constant 0 : index
    %83 = vector.load %arg6[%c0_35, %c0_36] : memref<1x256xf32, #tpu.memory_space<vmem>>, vector<1x256xf32>
    %84 = arith.addf %82, %83 : vector<1x256xf32>
    %85 = vector.extract_strided_slice %84 {offsets = [0, 0], sizes = [1, 192], strides = [1, 1]} : vector<1x256xf32> to vector<1x192xf32>
    %86 = arith.negf %85 : vector<1x192xf32>
    %87 = math.exp %86 : vector<1x192xf32>
    %cst_37 = arith.constant 1.000000e+00 : f32
    %88 = vector.broadcast %cst_37 : f32 to vector<1x192xf32>
    %89 = arith.addf %88, %87 : vector<1x192xf32>
    %90 = arith.divf %88, %89 : vector<1x192xf32>
    %91 = vector.extract_strided_slice %90 {offsets = [0, 0], sizes = [1, 32], strides = [1, 1]} : vector<1x192xf32> to vector<1x32xf32>
    %92 = vector.extract_strided_slice %90 {offsets = [0, 64], sizes = [1, 32], strides = [1, 1]} : vector<1x192xf32> to vector<1x32xf32>
    %93 = vector.extract_strided_slice %90 {offsets = [0, 128], sizes = [1, 32], strides = [1, 1]} : vector<1x192xf32> to vector<1x32xf32>
    %94 = vector.extract_strided_slice %84 {offsets = [0, 192], sizes = [1, 32], strides = [1, 1]} : vector<1x256xf32> to vector<1x32xf32>
    %95 = math.tanh %94 : vector<1x32xf32>
    %96 = arith.mulf %92, %54 : vector<1x32xf32>
    %97 = arith.mulf %91, %95 : vector<1x32xf32>
    %98 = arith.addf %96, %97 : vector<1x32xf32>
    %99 = math.tanh %98 : vector<1x32xf32>
    %100 = arith.mulf %93, %99 : vector<1x32xf32>
    %c2_i32 = arith.constant 2 : i32
    %101 = arith.index_cast %c2_i32 : i32 to index
    %c0_38 = arith.constant 0 : index
    %102 = vector.load %arg16[%101, %c0_38] : memref<8x256xf32, #tpu.memory_space<vmem>>, vector<1x256xf32>
    %c0_39 = arith.constant 0 : index
    %c0_40 = arith.constant 0 : index
    %103 = vector.load %arg2[%c0_39, %c0_40] : memref<64x256xf32, #tpu.memory_space<vmem>>, vector<64x256xf32>
    %cst_41 = arith.constant dense<0.000000e+00> : vector<1x256xf32>
    %104 = tpu.matmul %77, %103, %cst_41 {dimension_numbers = #tpu.dot_dimension_numbers<[1], [0], [0], [1], [0, 0, 1, 1], [], []>} : vector<1x64xf32>, vector<64x256xf32>, vector<1x256xf32> -> vector<1x256xf32>
    %105 = arith.addf %102, %104 : vector<1x256xf32>
    %106 = vector.extract_strided_slice %105 {offsets = [0, 0], sizes = [1, 192], strides = [1, 1]} : vector<1x256xf32> to vector<1x192xf32>
    %107 = arith.negf %106 : vector<1x192xf32>
    %108 = math.exp %107 : vector<1x192xf32>
    %cst_42 = arith.constant 1.000000e+00 : f32
    %109 = vector.broadcast %cst_42 : f32 to vector<1x192xf32>
    %110 = arith.addf %109, %108 : vector<1x192xf32>
    %111 = arith.divf %109, %110 : vector<1x192xf32>
    %112 = vector.extract_strided_slice %111 {offsets = [0, 0], sizes = [1, 64], strides = [1, 1]} : vector<1x192xf32> to vector<1x64xf32>
    %113 = vector.extract_strided_slice %111 {offsets = [0, 64], sizes = [1, 64], strides = [1, 1]} : vector<1x192xf32> to vector<1x64xf32>
    %114 = vector.extract_strided_slice %111 {offsets = [0, 128], sizes = [1, 64], strides = [1, 1]} : vector<1x192xf32> to vector<1x64xf32>
    %115 = vector.extract_strided_slice %105 {offsets = [0, 192], sizes = [1, 64], strides = [1, 1]} : vector<1x256xf32> to vector<1x64xf32>
    %116 = math.tanh %115 : vector<1x64xf32>
    %117 = arith.mulf %113, %75 : vector<1x64xf32>
    %118 = arith.mulf %112, %116 : vector<1x64xf32>
    %119 = arith.addf %117, %118 : vector<1x64xf32>
    %120 = math.tanh %119 : vector<1x64xf32>
    %121 = arith.mulf %114, %120 : vector<1x64xf32>
    %c0_43 = arith.constant 0 : index
    %c0_44 = arith.constant 0 : index
    %122 = vector.load %arg4[%c0_43, %c0_44] : memref<64x256xf32, #tpu.memory_space<vmem>>, vector<64x256xf32>
    %cst_45 = arith.constant dense<0.000000e+00> : vector<1x256xf32>
    %123 = tpu.matmul %121, %122, %cst_45 {dimension_numbers = #tpu.dot_dimension_numbers<[1], [0], [0], [1], [0, 0, 1, 1], [], []>} : vector<1x64xf32>, vector<64x256xf32>, vector<1x256xf32> -> vector<1x256xf32>
    %c0_46 = arith.constant 0 : index
    %c0_47 = arith.constant 0 : index
    %124 = vector.load %arg5[%c0_46, %c0_47] : memref<32x256xf32, #tpu.memory_space<vmem>>, vector<32x256xf32>
    %cst_48 = arith.constant dense<0.000000e+00> : vector<1x256xf32>
    %125 = tpu.matmul %100, %124, %cst_48 {dimension_numbers = #tpu.dot_dimension_numbers<[1], [0], [0], [1], [0, 0, 1, 1], [], []>} : vector<1x32xf32>, vector<32x256xf32>, vector<1x256xf32> -> vector<1x256xf32>
    %126 = arith.addf %123, %125 : vector<1x256xf32>
    %c0_49 = arith.constant 0 : index
    %c0_50 = arith.constant 0 : index
    %127 = vector.load %arg6[%c0_49, %c0_50] : memref<1x256xf32, #tpu.memory_space<vmem>>, vector<1x256xf32>
    %128 = arith.addf %126, %127 : vector<1x256xf32>
    %129 = vector.extract_strided_slice %128 {offsets = [0, 0], sizes = [1, 192], strides = [1, 1]} : vector<1x256xf32> to vector<1x192xf32>
    %130 = arith.negf %129 : vector<1x192xf32>
    %131 = math.exp %130 : vector<1x192xf32>
    %cst_51 = arith.constant 1.000000e+00 : f32
    %132 = vector.broadcast %cst_51 : f32 to vector<1x192xf32>
    %133 = arith.addf %132, %131 : vector<1x192xf32>
    %134 = arith.divf %132, %133 : vector<1x192xf32>
    %135 = vector.extract_strided_slice %134 {offsets = [0, 0], sizes = [1, 32], strides = [1, 1]} : vector<1x192xf32> to vector<1x32xf32>
    %136 = vector.extract_strided_slice %134 {offsets = [0, 64], sizes = [1, 32], strides = [1, 1]} : vector<1x192xf32> to vector<1x32xf32>
    %137 = vector.extract_strided_slice %134 {offsets = [0, 128], sizes = [1, 32], strides = [1, 1]} : vector<1x192xf32> to vector<1x32xf32>
    %138 = vector.extract_strided_slice %128 {offsets = [0, 192], sizes = [1, 32], strides = [1, 1]} : vector<1x256xf32> to vector<1x32xf32>
    %139 = math.tanh %138 : vector<1x32xf32>
    %140 = arith.mulf %136, %98 : vector<1x32xf32>
    %141 = arith.mulf %135, %139 : vector<1x32xf32>
    %142 = arith.addf %140, %141 : vector<1x32xf32>
    %143 = math.tanh %142 : vector<1x32xf32>
    %144 = arith.mulf %137, %143 : vector<1x32xf32>
    %c3_i32 = arith.constant 3 : i32
    %145 = arith.index_cast %c3_i32 : i32 to index
    %c0_52 = arith.constant 0 : index
    %146 = vector.load %arg16[%145, %c0_52] : memref<8x256xf32, #tpu.memory_space<vmem>>, vector<1x256xf32>
    %c0_53 = arith.constant 0 : index
    %c0_54 = arith.constant 0 : index
    %147 = vector.load %arg2[%c0_53, %c0_54] : memref<64x256xf32, #tpu.memory_space<vmem>>, vector<64x256xf32>
    %cst_55 = arith.constant dense<0.000000e+00> : vector<1x256xf32>
    %148 = tpu.matmul %121, %147, %cst_55 {dimension_numbers = #tpu.dot_dimension_numbers<[1], [0], [0], [1], [0, 0, 1, 1], [], []>} : vector<1x64xf32>, vector<64x256xf32>, vector<1x256xf32> -> vector<1x256xf32>
    %149 = arith.addf %146, %148 : vector<1x256xf32>
    %150 = vector.extract_strided_slice %149 {offsets = [0, 0], sizes = [1, 192], strides = [1, 1]} : vector<1x256xf32> to vector<1x192xf32>
    %151 = arith.negf %150 : vector<1x192xf32>
    %152 = math.exp %151 : vector<1x192xf32>
    %cst_56 = arith.constant 1.000000e+00 : f32
    %153 = vector.broadcast %cst_56 : f32 to vector<1x192xf32>
    %154 = arith.addf %153, %152 : vector<1x192xf32>
    %155 = arith.divf %153, %154 : vector<1x192xf32>
    %156 = vector.extract_strided_slice %155 {offsets = [0, 0], sizes = [1, 64], strides = [1, 1]} : vector<1x192xf32> to vector<1x64xf32>
    %157 = vector.extract_strided_slice %155 {offsets = [0, 64], sizes = [1, 64], strides = [1, 1]} : vector<1x192xf32> to vector<1x64xf32>
    %158 = vector.extract_strided_slice %155 {offsets = [0, 128], sizes = [1, 64], strides = [1, 1]} : vector<1x192xf32> to vector<1x64xf32>
    %159 = vector.extract_strided_slice %149 {offsets = [0, 192], sizes = [1, 64], strides = [1, 1]} : vector<1x256xf32> to vector<1x64xf32>
    %160 = math.tanh %159 : vector<1x64xf32>
    %161 = arith.mulf %157, %119 : vector<1x64xf32>
    %162 = arith.mulf %156, %160 : vector<1x64xf32>
    %163 = arith.addf %161, %162 : vector<1x64xf32>
    %164 = math.tanh %163 : vector<1x64xf32>
    %165 = arith.mulf %158, %164 : vector<1x64xf32>
    %c0_57 = arith.constant 0 : index
    %c0_58 = arith.constant 0 : index
    %166 = vector.load %arg4[%c0_57, %c0_58] : memref<64x256xf32, #tpu.memory_space<vmem>>, vector<64x256xf32>
    %cst_59 = arith.constant dense<0.000000e+00> : vector<1x256xf32>
    %167 = tpu.matmul %165, %166, %cst_59 {dimension_numbers = #tpu.dot_dimension_numbers<[1], [0], [0], [1], [0, 0, 1, 1], [], []>} : vector<1x64xf32>, vector<64x256xf32>, vector<1x256xf32> -> vector<1x256xf32>
    %c0_60 = arith.constant 0 : index
    %c0_61 = arith.constant 0 : index
    %168 = vector.load %arg5[%c0_60, %c0_61] : memref<32x256xf32, #tpu.memory_space<vmem>>, vector<32x256xf32>
    %cst_62 = arith.constant dense<0.000000e+00> : vector<1x256xf32>
    %169 = tpu.matmul %144, %168, %cst_62 {dimension_numbers = #tpu.dot_dimension_numbers<[1], [0], [0], [1], [0, 0, 1, 1], [], []>} : vector<1x32xf32>, vector<32x256xf32>, vector<1x256xf32> -> vector<1x256xf32>
    %170 = arith.addf %167, %169 : vector<1x256xf32>
    %c0_63 = arith.constant 0 : index
    %c0_64 = arith.constant 0 : index
    %171 = vector.load %arg6[%c0_63, %c0_64] : memref<1x256xf32, #tpu.memory_space<vmem>>, vector<1x256xf32>
    %172 = arith.addf %170, %171 : vector<1x256xf32>
    %173 = vector.extract_strided_slice %172 {offsets = [0, 0], sizes = [1, 192], strides = [1, 1]} : vector<1x256xf32> to vector<1x192xf32>
    %174 = arith.negf %173 : vector<1x192xf32>
    %175 = math.exp %174 : vector<1x192xf32>
    %cst_65 = arith.constant 1.000000e+00 : f32
    %176 = vector.broadcast %cst_65 : f32 to vector<1x192xf32>
    %177 = arith.addf %176, %175 : vector<1x192xf32>
    %178 = arith.divf %176, %177 : vector<1x192xf32>
    %179 = vector.extract_strided_slice %178 {offsets = [0, 0], sizes = [1, 32], strides = [1, 1]} : vector<1x192xf32> to vector<1x32xf32>
    %180 = vector.extract_strided_slice %178 {offsets = [0, 64], sizes = [1, 32], strides = [1, 1]} : vector<1x192xf32> to vector<1x32xf32>
    %181 = vector.extract_strided_slice %178 {offsets = [0, 128], sizes = [1, 32], strides = [1, 1]} : vector<1x192xf32> to vector<1x32xf32>
    %182 = vector.extract_strided_slice %172 {offsets = [0, 192], sizes = [1, 32], strides = [1, 1]} : vector<1x256xf32> to vector<1x32xf32>
    %183 = math.tanh %182 : vector<1x32xf32>
    %184 = arith.mulf %180, %142 : vector<1x32xf32>
    %185 = arith.mulf %179, %183 : vector<1x32xf32>
    %186 = arith.addf %184, %185 : vector<1x32xf32>
    %187 = math.tanh %186 : vector<1x32xf32>
    %188 = arith.mulf %181, %187 : vector<1x32xf32>
    %c4_i32 = arith.constant 4 : i32
    %189 = arith.index_cast %c4_i32 : i32 to index
    %c0_66 = arith.constant 0 : index
    %190 = vector.load %arg16[%189, %c0_66] : memref<8x256xf32, #tpu.memory_space<vmem>>, vector<1x256xf32>
    %c0_67 = arith.constant 0 : index
    %c0_68 = arith.constant 0 : index
    %191 = vector.load %arg2[%c0_67, %c0_68] : memref<64x256xf32, #tpu.memory_space<vmem>>, vector<64x256xf32>
    %cst_69 = arith.constant dense<0.000000e+00> : vector<1x256xf32>
    %192 = tpu.matmul %165, %191, %cst_69 {dimension_numbers = #tpu.dot_dimension_numbers<[1], [0], [0], [1], [0, 0, 1, 1], [], []>} : vector<1x64xf32>, vector<64x256xf32>, vector<1x256xf32> -> vector<1x256xf32>
    %193 = arith.addf %190, %192 : vector<1x256xf32>
    %194 = vector.extract_strided_slice %193 {offsets = [0, 0], sizes = [1, 192], strides = [1, 1]} : vector<1x256xf32> to vector<1x192xf32>
    %195 = arith.negf %194 : vector<1x192xf32>
    %196 = math.exp %195 : vector<1x192xf32>
    %cst_70 = arith.constant 1.000000e+00 : f32
    %197 = vector.broadcast %cst_70 : f32 to vector<1x192xf32>
    %198 = arith.addf %197, %196 : vector<1x192xf32>
    %199 = arith.divf %197, %198 : vector<1x192xf32>
    %200 = vector.extract_strided_slice %199 {offsets = [0, 0], sizes = [1, 64], strides = [1, 1]} : vector<1x192xf32> to vector<1x64xf32>
    %201 = vector.extract_strided_slice %199 {offsets = [0, 64], sizes = [1, 64], strides = [1, 1]} : vector<1x192xf32> to vector<1x64xf32>
    %202 = vector.extract_strided_slice %199 {offsets = [0, 128], sizes = [1, 64], strides = [1, 1]} : vector<1x192xf32> to vector<1x64xf32>
    %203 = vector.extract_strided_slice %193 {offsets = [0, 192], sizes = [1, 64], strides = [1, 1]} : vector<1x256xf32> to vector<1x64xf32>
    %204 = math.tanh %203 : vector<1x64xf32>
    %205 = arith.mulf %201, %163 : vector<1x64xf32>
    %206 = arith.mulf %200, %204 : vector<1x64xf32>
    %207 = arith.addf %205, %206 : vector<1x64xf32>
    %208 = math.tanh %207 : vector<1x64xf32>
    %209 = arith.mulf %202, %208 : vector<1x64xf32>
    %c0_71 = arith.constant 0 : index
    %c0_72 = arith.constant 0 : index
    %210 = vector.load %arg4[%c0_71, %c0_72] : memref<64x256xf32, #tpu.memory_space<vmem>>, vector<64x256xf32>
    %cst_73 = arith.constant dense<0.000000e+00> : vector<1x256xf32>
    %211 = tpu.matmul %209, %210, %cst_73 {dimension_numbers = #tpu.dot_dimension_numbers<[1], [0], [0], [1], [0, 0, 1, 1], [], []>} : vector<1x64xf32>, vector<64x256xf32>, vector<1x256xf32> -> vector<1x256xf32>
    %c0_74 = arith.constant 0 : index
    %c0_75 = arith.constant 0 : index
    %212 = vector.load %arg5[%c0_74, %c0_75] : memref<32x256xf32, #tpu.memory_space<vmem>>, vector<32x256xf32>
    %cst_76 = arith.constant dense<0.000000e+00> : vector<1x256xf32>
    %213 = tpu.matmul %188, %212, %cst_76 {dimension_numbers = #tpu.dot_dimension_numbers<[1], [0], [0], [1], [0, 0, 1, 1], [], []>} : vector<1x32xf32>, vector<32x256xf32>, vector<1x256xf32> -> vector<1x256xf32>
    %214 = arith.addf %211, %213 : vector<1x256xf32>
    %c0_77 = arith.constant 0 : index
    %c0_78 = arith.constant 0 : index
    %215 = vector.load %arg6[%c0_77, %c0_78] : memref<1x256xf32, #tpu.memory_space<vmem>>, vector<1x256xf32>
    %216 = arith.addf %214, %215 : vector<1x256xf32>
    %217 = vector.extract_strided_slice %216 {offsets = [0, 0], sizes = [1, 192], strides = [1, 1]} : vector<1x256xf32> to vector<1x192xf32>
    %218 = arith.negf %217 : vector<1x192xf32>
    %219 = math.exp %218 : vector<1x192xf32>
    %cst_79 = arith.constant 1.000000e+00 : f32
    %220 = vector.broadcast %cst_79 : f32 to vector<1x192xf32>
    %221 = arith.addf %220, %219 : vector<1x192xf32>
    %222 = arith.divf %220, %221 : vector<1x192xf32>
    %223 = vector.extract_strided_slice %222 {offsets = [0, 0], sizes = [1, 32], strides = [1, 1]} : vector<1x192xf32> to vector<1x32xf32>
    %224 = vector.extract_strided_slice %222 {offsets = [0, 64], sizes = [1, 32], strides = [1, 1]} : vector<1x192xf32> to vector<1x32xf32>
    %225 = vector.extract_strided_slice %222 {offsets = [0, 128], sizes = [1, 32], strides = [1, 1]} : vector<1x192xf32> to vector<1x32xf32>
    %226 = vector.extract_strided_slice %216 {offsets = [0, 192], sizes = [1, 32], strides = [1, 1]} : vector<1x256xf32> to vector<1x32xf32>
    %227 = math.tanh %226 : vector<1x32xf32>
    %228 = arith.mulf %224, %186 : vector<1x32xf32>
    %229 = arith.mulf %223, %227 : vector<1x32xf32>
    %230 = arith.addf %228, %229 : vector<1x32xf32>
    %231 = math.tanh %230 : vector<1x32xf32>
    %232 = arith.mulf %225, %231 : vector<1x32xf32>
    %c5_i32 = arith.constant 5 : i32
    %233 = arith.index_cast %c5_i32 : i32 to index
    %c0_80 = arith.constant 0 : index
    %234 = vector.load %arg16[%233, %c0_80] : memref<8x256xf32, #tpu.memory_space<vmem>>, vector<1x256xf32>
    %c0_81 = arith.constant 0 : index
    %c0_82 = arith.constant 0 : index
    %235 = vector.load %arg2[%c0_81, %c0_82] : memref<64x256xf32, #tpu.memory_space<vmem>>, vector<64x256xf32>
    %cst_83 = arith.constant dense<0.000000e+00> : vector<1x256xf32>
    %236 = tpu.matmul %209, %235, %cst_83 {dimension_numbers = #tpu.dot_dimension_numbers<[1], [0], [0], [1], [0, 0, 1, 1], [], []>} : vector<1x64xf32>, vector<64x256xf32>, vector<1x256xf32> -> vector<1x256xf32>
    %237 = arith.addf %234, %236 : vector<1x256xf32>
    %238 = vector.extract_strided_slice %237 {offsets = [0, 0], sizes = [1, 192], strides = [1, 1]} : vector<1x256xf32> to vector<1x192xf32>
    %239 = arith.negf %238 : vector<1x192xf32>
    %240 = math.exp %239 : vector<1x192xf32>
    %cst_84 = arith.constant 1.000000e+00 : f32
    %241 = vector.broadcast %cst_84 : f32 to vector<1x192xf32>
    %242 = arith.addf %241, %240 : vector<1x192xf32>
    %243 = arith.divf %241, %242 : vector<1x192xf32>
    %244 = vector.extract_strided_slice %243 {offsets = [0, 0], sizes = [1, 64], strides = [1, 1]} : vector<1x192xf32> to vector<1x64xf32>
    %245 = vector.extract_strided_slice %243 {offsets = [0, 64], sizes = [1, 64], strides = [1, 1]} : vector<1x192xf32> to vector<1x64xf32>
    %246 = vector.extract_strided_slice %243 {offsets = [0, 128], sizes = [1, 64], strides = [1, 1]} : vector<1x192xf32> to vector<1x64xf32>
    %247 = vector.extract_strided_slice %237 {offsets = [0, 192], sizes = [1, 64], strides = [1, 1]} : vector<1x256xf32> to vector<1x64xf32>
    %248 = math.tanh %247 : vector<1x64xf32>
    %249 = arith.mulf %245, %207 : vector<1x64xf32>
    %250 = arith.mulf %244, %248 : vector<1x64xf32>
    %251 = arith.addf %249, %250 : vector<1x64xf32>
    %252 = math.tanh %251 : vector<1x64xf32>
    %253 = arith.mulf %246, %252 : vector<1x64xf32>
    %c0_85 = arith.constant 0 : index
    %c0_86 = arith.constant 0 : index
    %254 = vector.load %arg4[%c0_85, %c0_86] : memref<64x256xf32, #tpu.memory_space<vmem>>, vector<64x256xf32>
    %cst_87 = arith.constant dense<0.000000e+00> : vector<1x256xf32>
    %255 = tpu.matmul %253, %254, %cst_87 {dimension_numbers = #tpu.dot_dimension_numbers<[1], [0], [0], [1], [0, 0, 1, 1], [], []>} : vector<1x64xf32>, vector<64x256xf32>, vector<1x256xf32> -> vector<1x256xf32>
    %c0_88 = arith.constant 0 : index
    %c0_89 = arith.constant 0 : index
    %256 = vector.load %arg5[%c0_88, %c0_89] : memref<32x256xf32, #tpu.memory_space<vmem>>, vector<32x256xf32>
    %cst_90 = arith.constant dense<0.000000e+00> : vector<1x256xf32>
    %257 = tpu.matmul %232, %256, %cst_90 {dimension_numbers = #tpu.dot_dimension_numbers<[1], [0], [0], [1], [0, 0, 1, 1], [], []>} : vector<1x32xf32>, vector<32x256xf32>, vector<1x256xf32> -> vector<1x256xf32>
    %258 = arith.addf %255, %257 : vector<1x256xf32>
    %c0_91 = arith.constant 0 : index
    %c0_92 = arith.constant 0 : index
    %259 = vector.load %arg6[%c0_91, %c0_92] : memref<1x256xf32, #tpu.memory_space<vmem>>, vector<1x256xf32>
    %260 = arith.addf %258, %259 : vector<1x256xf32>
    %261 = vector.extract_strided_slice %260 {offsets = [0, 0], sizes = [1, 192], strides = [1, 1]} : vector<1x256xf32> to vector<1x192xf32>
    %262 = arith.negf %261 : vector<1x192xf32>
    %263 = math.exp %262 : vector<1x192xf32>
    %cst_93 = arith.constant 1.000000e+00 : f32
    %264 = vector.broadcast %cst_93 : f32 to vector<1x192xf32>
    %265 = arith.addf %264, %263 : vector<1x192xf32>
    %266 = arith.divf %264, %265 : vector<1x192xf32>
    %267 = vector.extract_strided_slice %266 {offsets = [0, 0], sizes = [1, 32], strides = [1, 1]} : vector<1x192xf32> to vector<1x32xf32>
    %268 = vector.extract_strided_slice %266 {offsets = [0, 64], sizes = [1, 32], strides = [1, 1]} : vector<1x192xf32> to vector<1x32xf32>
    %269 = vector.extract_strided_slice %266 {offsets = [0, 128], sizes = [1, 32], strides = [1, 1]} : vector<1x192xf32> to vector<1x32xf32>
    %270 = vector.extract_strided_slice %260 {offsets = [0, 192], sizes = [1, 32], strides = [1, 1]} : vector<1x256xf32> to vector<1x32xf32>
    %271 = math.tanh %270 : vector<1x32xf32>
    %272 = arith.mulf %268, %230 : vector<1x32xf32>
    %273 = arith.mulf %267, %271 : vector<1x32xf32>
    %274 = arith.addf %272, %273 : vector<1x32xf32>
    %275 = math.tanh %274 : vector<1x32xf32>
    %276 = arith.mulf %269, %275 : vector<1x32xf32>
    %c6_i32 = arith.constant 6 : i32
    %277 = arith.index_cast %c6_i32 : i32 to index
    %c0_94 = arith.constant 0 : index
    %278 = vector.load %arg16[%277, %c0_94] : memref<8x256xf32, #tpu.memory_space<vmem>>, vector<1x256xf32>
    %c0_95 = arith.constant 0 : index
    %c0_96 = arith.constant 0 : index
    %279 = vector.load %arg2[%c0_95, %c0_96] : memref<64x256xf32, #tpu.memory_space<vmem>>, vector<64x256xf32>
    %cst_97 = arith.constant dense<0.000000e+00> : vector<1x256xf32>
    %280 = tpu.matmul %253, %279, %cst_97 {dimension_numbers = #tpu.dot_dimension_numbers<[1], [0], [0], [1], [0, 0, 1, 1], [], []>} : vector<1x64xf32>, vector<64x256xf32>, vector<1x256xf32> -> vector<1x256xf32>
    %281 = arith.addf %278, %280 : vector<1x256xf32>
    %282 = vector.extract_strided_slice %281 {offsets = [0, 0], sizes = [1, 192], strides = [1, 1]} : vector<1x256xf32> to vector<1x192xf32>
    %283 = arith.negf %282 : vector<1x192xf32>
    %284 = math.exp %283 : vector<1x192xf32>
    %cst_98 = arith.constant 1.000000e+00 : f32
    %285 = vector.broadcast %cst_98 : f32 to vector<1x192xf32>
    %286 = arith.addf %285, %284 : vector<1x192xf32>
    %287 = arith.divf %285, %286 : vector<1x192xf32>
    %288 = vector.extract_strided_slice %287 {offsets = [0, 0], sizes = [1, 64], strides = [1, 1]} : vector<1x192xf32> to vector<1x64xf32>
    %289 = vector.extract_strided_slice %287 {offsets = [0, 64], sizes = [1, 64], strides = [1, 1]} : vector<1x192xf32> to vector<1x64xf32>
    %290 = vector.extract_strided_slice %287 {offsets = [0, 128], sizes = [1, 64], strides = [1, 1]} : vector<1x192xf32> to vector<1x64xf32>
    %291 = vector.extract_strided_slice %281 {offsets = [0, 192], sizes = [1, 64], strides = [1, 1]} : vector<1x256xf32> to vector<1x64xf32>
    %292 = math.tanh %291 : vector<1x64xf32>
    %293 = arith.mulf %289, %251 : vector<1x64xf32>
    %294 = arith.mulf %288, %292 : vector<1x64xf32>
    %295 = arith.addf %293, %294 : vector<1x64xf32>
    %296 = math.tanh %295 : vector<1x64xf32>
    %297 = arith.mulf %290, %296 : vector<1x64xf32>
    %c0_99 = arith.constant 0 : index
    %c0_100 = arith.constant 0 : index
    %298 = vector.load %arg4[%c0_99, %c0_100] : memref<64x256xf32, #tpu.memory_space<vmem>>, vector<64x256xf32>
    %cst_101 = arith.constant dense<0.000000e+00> : vector<1x256xf32>
    %299 = tpu.matmul %297, %298, %cst_101 {dimension_numbers = #tpu.dot_dimension_numbers<[1], [0], [0], [1], [0, 0, 1, 1], [], []>} : vector<1x64xf32>, vector<64x256xf32>, vector<1x256xf32> -> vector<1x256xf32>
    %c0_102 = arith.constant 0 : index
    %c0_103 = arith.constant 0 : index
    %300 = vector.load %arg5[%c0_102, %c0_103] : memref<32x256xf32, #tpu.memory_space<vmem>>, vector<32x256xf32>
    %cst_104 = arith.constant dense<0.000000e+00> : vector<1x256xf32>
    %301 = tpu.matmul %276, %300, %cst_104 {dimension_numbers = #tpu.dot_dimension_numbers<[1], [0], [0], [1], [0, 0, 1, 1], [], []>} : vector<1x32xf32>, vector<32x256xf32>, vector<1x256xf32> -> vector<1x256xf32>
    %302 = arith.addf %299, %301 : vector<1x256xf32>
    %c0_105 = arith.constant 0 : index
    %c0_106 = arith.constant 0 : index
    %303 = vector.load %arg6[%c0_105, %c0_106] : memref<1x256xf32, #tpu.memory_space<vmem>>, vector<1x256xf32>
    %304 = arith.addf %302, %303 : vector<1x256xf32>
    %305 = vector.extract_strided_slice %304 {offsets = [0, 0], sizes = [1, 192], strides = [1, 1]} : vector<1x256xf32> to vector<1x192xf32>
    %306 = arith.negf %305 : vector<1x192xf32>
    %307 = math.exp %306 : vector<1x192xf32>
    %cst_107 = arith.constant 1.000000e+00 : f32
    %308 = vector.broadcast %cst_107 : f32 to vector<1x192xf32>
    %309 = arith.addf %308, %307 : vector<1x192xf32>
    %310 = arith.divf %308, %309 : vector<1x192xf32>
    %311 = vector.extract_strided_slice %310 {offsets = [0, 0], sizes = [1, 32], strides = [1, 1]} : vector<1x192xf32> to vector<1x32xf32>
    %312 = vector.extract_strided_slice %310 {offsets = [0, 64], sizes = [1, 32], strides = [1, 1]} : vector<1x192xf32> to vector<1x32xf32>
    %313 = vector.extract_strided_slice %310 {offsets = [0, 128], sizes = [1, 32], strides = [1, 1]} : vector<1x192xf32> to vector<1x32xf32>
    %314 = vector.extract_strided_slice %304 {offsets = [0, 192], sizes = [1, 32], strides = [1, 1]} : vector<1x256xf32> to vector<1x32xf32>
    %315 = math.tanh %314 : vector<1x32xf32>
    %316 = arith.mulf %312, %274 : vector<1x32xf32>
    %317 = arith.mulf %311, %315 : vector<1x32xf32>
    %318 = arith.addf %316, %317 : vector<1x32xf32>
    %319 = math.tanh %318 : vector<1x32xf32>
    %320 = arith.mulf %313, %319 : vector<1x32xf32>
    %c7_i32 = arith.constant 7 : i32
    %321 = arith.index_cast %c7_i32 : i32 to index
    %c0_108 = arith.constant 0 : index
    %322 = vector.load %arg16[%321, %c0_108] : memref<8x256xf32, #tpu.memory_space<vmem>>, vector<1x256xf32>
    %c0_109 = arith.constant 0 : index
    %c0_110 = arith.constant 0 : index
    %323 = vector.load %arg2[%c0_109, %c0_110] : memref<64x256xf32, #tpu.memory_space<vmem>>, vector<64x256xf32>
    %cst_111 = arith.constant dense<0.000000e+00> : vector<1x256xf32>
    %324 = tpu.matmul %297, %323, %cst_111 {dimension_numbers = #tpu.dot_dimension_numbers<[1], [0], [0], [1], [0, 0, 1, 1], [], []>} : vector<1x64xf32>, vector<64x256xf32>, vector<1x256xf32> -> vector<1x256xf32>
    %325 = arith.addf %322, %324 : vector<1x256xf32>
    %326 = vector.extract_strided_slice %325 {offsets = [0, 0], sizes = [1, 192], strides = [1, 1]} : vector<1x256xf32> to vector<1x192xf32>
    %327 = arith.negf %326 : vector<1x192xf32>
    %328 = math.exp %327 : vector<1x192xf32>
    %cst_112 = arith.constant 1.000000e+00 : f32
    %329 = vector.broadcast %cst_112 : f32 to vector<1x192xf32>
    %330 = arith.addf %329, %328 : vector<1x192xf32>
    %331 = arith.divf %329, %330 : vector<1x192xf32>
    %332 = vector.extract_strided_slice %331 {offsets = [0, 0], sizes = [1, 64], strides = [1, 1]} : vector<1x192xf32> to vector<1x64xf32>
    %333 = vector.extract_strided_slice %331 {offsets = [0, 64], sizes = [1, 64], strides = [1, 1]} : vector<1x192xf32> to vector<1x64xf32>
    %334 = vector.extract_strided_slice %331 {offsets = [0, 128], sizes = [1, 64], strides = [1, 1]} : vector<1x192xf32> to vector<1x64xf32>
    %335 = vector.extract_strided_slice %325 {offsets = [0, 192], sizes = [1, 64], strides = [1, 1]} : vector<1x256xf32> to vector<1x64xf32>
    %336 = math.tanh %335 : vector<1x64xf32>
    %337 = arith.mulf %333, %295 : vector<1x64xf32>
    %338 = arith.mulf %332, %336 : vector<1x64xf32>
    %339 = arith.addf %337, %338 : vector<1x64xf32>
    %340 = math.tanh %339 : vector<1x64xf32>
    %341 = arith.mulf %334, %340 : vector<1x64xf32>
    %c0_113 = arith.constant 0 : index
    %c0_114 = arith.constant 0 : index
    %342 = vector.load %arg4[%c0_113, %c0_114] : memref<64x256xf32, #tpu.memory_space<vmem>>, vector<64x256xf32>
    %cst_115 = arith.constant dense<0.000000e+00> : vector<1x256xf32>
    %343 = tpu.matmul %341, %342, %cst_115 {dimension_numbers = #tpu.dot_dimension_numbers<[1], [0], [0], [1], [0, 0, 1, 1], [], []>} : vector<1x64xf32>, vector<64x256xf32>, vector<1x256xf32> -> vector<1x256xf32>
    %c0_116 = arith.constant 0 : index
    %c0_117 = arith.constant 0 : index
    %344 = vector.load %arg5[%c0_116, %c0_117] : memref<32x256xf32, #tpu.memory_space<vmem>>, vector<32x256xf32>
    %cst_118 = arith.constant dense<0.000000e+00> : vector<1x256xf32>
    %345 = tpu.matmul %320, %344, %cst_118 {dimension_numbers = #tpu.dot_dimension_numbers<[1], [0], [0], [1], [0, 0, 1, 1], [], []>} : vector<1x32xf32>, vector<32x256xf32>, vector<1x256xf32> -> vector<1x256xf32>
    %346 = arith.addf %343, %345 : vector<1x256xf32>
    %c0_119 = arith.constant 0 : index
    %c0_120 = arith.constant 0 : index
    %347 = vector.load %arg6[%c0_119, %c0_120] : memref<1x256xf32, #tpu.memory_space<vmem>>, vector<1x256xf32>
    %348 = arith.addf %346, %347 : vector<1x256xf32>
    %349 = vector.extract_strided_slice %348 {offsets = [0, 0], sizes = [1, 192], strides = [1, 1]} : vector<1x256xf32> to vector<1x192xf32>
    %350 = arith.negf %349 : vector<1x192xf32>
    %351 = math.exp %350 : vector<1x192xf32>
    %cst_121 = arith.constant 1.000000e+00 : f32
    %352 = vector.broadcast %cst_121 : f32 to vector<1x192xf32>
    %353 = arith.addf %352, %351 : vector<1x192xf32>
    %354 = arith.divf %352, %353 : vector<1x192xf32>
    %355 = vector.extract_strided_slice %354 {offsets = [0, 0], sizes = [1, 32], strides = [1, 1]} : vector<1x192xf32> to vector<1x32xf32>
    %356 = vector.extract_strided_slice %354 {offsets = [0, 64], sizes = [1, 32], strides = [1, 1]} : vector<1x192xf32> to vector<1x32xf32>
    %357 = vector.extract_strided_slice %354 {offsets = [0, 128], sizes = [1, 32], strides = [1, 1]} : vector<1x192xf32> to vector<1x32xf32>
    %358 = vector.extract_strided_slice %348 {offsets = [0, 192], sizes = [1, 32], strides = [1, 1]} : vector<1x256xf32> to vector<1x32xf32>
    %359 = math.tanh %358 : vector<1x32xf32>
    %360 = arith.mulf %356, %318 : vector<1x32xf32>
    %361 = arith.mulf %355, %359 : vector<1x32xf32>
    %362 = arith.addf %360, %361 : vector<1x32xf32>
    %363 = math.tanh %362 : vector<1x32xf32>
    %364 = arith.mulf %357, %363 : vector<1x32xf32>
    %c8_i32 = arith.constant 8 : i32
    %c0_122 = arith.constant 0 : index
    %c0_123 = arith.constant 0 : index
    %365 = vector.load %arg7[%c0_122, %c0_123] : memref<32x256xf32, #tpu.memory_space<vmem>>, vector<32x256xf32>
    %cst_124 = arith.constant dense<0.000000e+00> : vector<1x256xf32>
    %366 = tpu.matmul %364, %365, %cst_124 {dimension_numbers = #tpu.dot_dimension_numbers<[1], [0], [0], [1], [0, 0, 1, 1], [], []>} : vector<1x32xf32>, vector<32x256xf32>, vector<1x256xf32> -> vector<1x256xf32>
    %c0_125 = arith.constant 0 : index
    %c0_126 = arith.constant 0 : index
    %367 = vector.load %arg9[%c0_125, %c0_126] : memref<1x256xf32, #tpu.memory_space<vmem>>, vector<1x256xf32>
    %368 = arith.addf %366, %367 : vector<1x256xf32>
    %cst_127 = arith.constant 0.000000e+00 : f32
    %369 = vector.broadcast %cst_127 : f32 to vector<1x32xf32>
    %cst_128 = arith.constant 0.000000e+00 : f32
    %370 = vector.broadcast %cst_128 : f32 to vector<1x32xf32>
    %cst_129 = arith.constant 0.000000e+00 : f32
    %371 = vector.broadcast %cst_129 : f32 to vector<1x64xf32>
    %cst_130 = arith.constant 0.000000e+00 : f32
    %372 = vector.broadcast %cst_130 : f32 to vector<1x64xf32>
    %c0_i32_131 = arith.constant 0 : i32
    %c0_132 = arith.constant 0 : index
    %c0_133 = arith.constant 0 : index
    %373 = vector.load %arg8[%c0_132, %c0_133] : memref<32x256xf32, #tpu.memory_space<vmem>>, vector<32x256xf32>
    %cst_134 = arith.constant dense<0.000000e+00> : vector<1x256xf32>
    %374 = tpu.matmul %369, %373, %cst_134 {dimension_numbers = #tpu.dot_dimension_numbers<[1], [0], [0], [1], [0, 0, 1, 1], [], []>} : vector<1x32xf32>, vector<32x256xf32>, vector<1x256xf32> -> vector<1x256xf32>
    %375 = arith.addf %368, %374 : vector<1x256xf32>
    %376 = vector.extract_strided_slice %375 {offsets = [0, 0], sizes = [1, 192], strides = [1, 1]} : vector<1x256xf32> to vector<1x192xf32>
    %377 = arith.negf %376 : vector<1x192xf32>
    %378 = math.exp %377 : vector<1x192xf32>
    %cst_135 = arith.constant 1.000000e+00 : f32
    %379 = vector.broadcast %cst_135 : f32 to vector<1x192xf32>
    %380 = arith.addf %379, %378 : vector<1x192xf32>
    %381 = arith.divf %379, %380 : vector<1x192xf32>
    %382 = vector.extract_strided_slice %381 {offsets = [0, 0], sizes = [1, 32], strides = [1, 1]} : vector<1x192xf32> to vector<1x32xf32>
    %383 = vector.extract_strided_slice %381 {offsets = [0, 64], sizes = [1, 32], strides = [1, 1]} : vector<1x192xf32> to vector<1x32xf32>
    %384 = vector.extract_strided_slice %381 {offsets = [0, 128], sizes = [1, 32], strides = [1, 1]} : vector<1x192xf32> to vector<1x32xf32>
    %385 = vector.extract_strided_slice %375 {offsets = [0, 192], sizes = [1, 32], strides = [1, 1]} : vector<1x256xf32> to vector<1x32xf32>
    %386 = math.tanh %385 : vector<1x32xf32>
    %387 = arith.mulf %383, %370 : vector<1x32xf32>
    %388 = arith.mulf %382, %386 : vector<1x32xf32>
    %389 = arith.addf %387, %388 : vector<1x32xf32>
    %390 = math.tanh %389 : vector<1x32xf32>
    %391 = arith.mulf %384, %390 : vector<1x32xf32>
    %c0_136 = arith.constant 0 : index
    %c0_137 = arith.constant 0 : index
    %392 = vector.load %arg10[%c0_136, %c0_137] : memref<32x256xf32, #tpu.memory_space<vmem>>, vector<32x256xf32>
    %cst_138 = arith.constant dense<0.000000e+00> : vector<1x256xf32>
    %393 = tpu.matmul %391, %392, %cst_138 {dimension_numbers = #tpu.dot_dimension_numbers<[1], [0], [0], [1], [0, 0, 1, 1], [], []>} : vector<1x32xf32>, vector<32x256xf32>, vector<1x256xf32> -> vector<1x256xf32>
    %c0_139 = arith.constant 0 : index
    %c0_140 = arith.constant 0 : index
    %394 = vector.load %arg11[%c0_139, %c0_140] : memref<64x256xf32, #tpu.memory_space<vmem>>, vector<64x256xf32>
    %cst_141 = arith.constant dense<0.000000e+00> : vector<1x256xf32>
    %395 = tpu.matmul %371, %394, %cst_141 {dimension_numbers = #tpu.dot_dimension_numbers<[1], [0], [0], [1], [0, 0, 1, 1], [], []>} : vector<1x64xf32>, vector<64x256xf32>, vector<1x256xf32> -> vector<1x256xf32>
    %396 = arith.addf %393, %395 : vector<1x256xf32>
    %c0_142 = arith.constant 0 : index
    %c0_143 = arith.constant 0 : index
    %397 = vector.load %arg12[%c0_142, %c0_143] : memref<1x256xf32, #tpu.memory_space<vmem>>, vector<1x256xf32>
    %398 = arith.addf %396, %397 : vector<1x256xf32>
    %399 = vector.extract_strided_slice %398 {offsets = [0, 0], sizes = [1, 192], strides = [1, 1]} : vector<1x256xf32> to vector<1x192xf32>
    %400 = arith.negf %399 : vector<1x192xf32>
    %401 = math.exp %400 : vector<1x192xf32>
    %cst_144 = arith.constant 1.000000e+00 : f32
    %402 = vector.broadcast %cst_144 : f32 to vector<1x192xf32>
    %403 = arith.addf %402, %401 : vector<1x192xf32>
    %404 = arith.divf %402, %403 : vector<1x192xf32>
    %405 = vector.extract_strided_slice %404 {offsets = [0, 0], sizes = [1, 64], strides = [1, 1]} : vector<1x192xf32> to vector<1x64xf32>
    %406 = vector.extract_strided_slice %404 {offsets = [0, 64], sizes = [1, 64], strides = [1, 1]} : vector<1x192xf32> to vector<1x64xf32>
    %407 = vector.extract_strided_slice %404 {offsets = [0, 128], sizes = [1, 64], strides = [1, 1]} : vector<1x192xf32> to vector<1x64xf32>
    %408 = vector.extract_strided_slice %398 {offsets = [0, 192], sizes = [1, 64], strides = [1, 1]} : vector<1x256xf32> to vector<1x64xf32>
    %409 = math.tanh %408 : vector<1x64xf32>
    %410 = arith.mulf %406, %372 : vector<1x64xf32>
    %411 = arith.mulf %405, %409 : vector<1x64xf32>
    %412 = arith.addf %410, %411 : vector<1x64xf32>
    %413 = math.tanh %412 : vector<1x64xf32>
    %414 = arith.mulf %407, %413 : vector<1x64xf32>
    %415 = arith.index_cast %c0_i32_131 : i32 to index
    %c0_145 = arith.constant 0 : index
    %416 = vector.load %arg17[%415, %c0_145] : memref<8x64xf32, #tpu.memory_space<vmem>>, vector<1x64xf32>
    tpu.vector_store %arg17[%415, %c0_145], %414 {strides = array<i32>} : memref<8x64xf32, #tpu.memory_space<vmem>>, vector<1x64xf32>,
    %c1_i32_146 = arith.constant 1 : i32
    %c0_147 = arith.constant 0 : index
    %c0_148 = arith.constant 0 : index
    %417 = vector.load %arg8[%c0_147, %c0_148] : memref<32x256xf32, #tpu.memory_space<vmem>>, vector<32x256xf32>
    %cst_149 = arith.constant dense<0.000000e+00> : vector<1x256xf32>
    %418 = tpu.matmul %391, %417, %cst_149 {dimension_numbers = #tpu.dot_dimension_numbers<[1], [0], [0], [1], [0, 0, 1, 1], [], []>} : vector<1x32xf32>, vector<32x256xf32>, vector<1x256xf32> -> vector<1x256xf32>
    %419 = arith.addf %368, %418 : vector<1x256xf32>
    %420 = vector.extract_strided_slice %419 {offsets = [0, 0], sizes = [1, 192], strides = [1, 1]} : vector<1x256xf32> to vector<1x192xf32>
    %421 = arith.negf %420 : vector<1x192xf32>
    %422 = math.exp %421 : vector<1x192xf32>
    %cst_150 = arith.constant 1.000000e+00 : f32
    %423 = vector.broadcast %cst_150 : f32 to vector<1x192xf32>
    %424 = arith.addf %423, %422 : vector<1x192xf32>
    %425 = arith.divf %423, %424 : vector<1x192xf32>
    %426 = vector.extract_strided_slice %425 {offsets = [0, 0], sizes = [1, 32], strides = [1, 1]} : vector<1x192xf32> to vector<1x32xf32>
    %427 = vector.extract_strided_slice %425 {offsets = [0, 64], sizes = [1, 32], strides = [1, 1]} : vector<1x192xf32> to vector<1x32xf32>
    %428 = vector.extract_strided_slice %425 {offsets = [0, 128], sizes = [1, 32], strides = [1, 1]} : vector<1x192xf32> to vector<1x32xf32>
    %429 = vector.extract_strided_slice %419 {offsets = [0, 192], sizes = [1, 32], strides = [1, 1]} : vector<1x256xf32> to vector<1x32xf32>
    %430 = math.tanh %429 : vector<1x32xf32>
    %431 = arith.mulf %427, %389 : vector<1x32xf32>
    %432 = arith.mulf %426, %430 : vector<1x32xf32>
    %433 = arith.addf %431, %432 : vector<1x32xf32>
    %434 = math.tanh %433 : vector<1x32xf32>
    %435 = arith.mulf %428, %434 : vector<1x32xf32>
    %c0_151 = arith.constant 0 : index
    %c0_152 = arith.constant 0 : index
    %436 = vector.load %arg10[%c0_151, %c0_152] : memref<32x256xf32, #tpu.memory_space<vmem>>, vector<32x256xf32>
    %cst_153 = arith.constant dense<0.000000e+00> : vector<1x256xf32>
    %437 = tpu.matmul %435, %436, %cst_153 {dimension_numbers = #tpu.dot_dimension_numbers<[1], [0], [0], [1], [0, 0, 1, 1], [], []>} : vector<1x32xf32>, vector<32x256xf32>, vector<1x256xf32> -> vector<1x256xf32>
    %c0_154 = arith.constant 0 : index
    %c0_155 = arith.constant 0 : index
    %438 = vector.load %arg11[%c0_154, %c0_155] : memref<64x256xf32, #tpu.memory_space<vmem>>, vector<64x256xf32>
    %cst_156 = arith.constant dense<0.000000e+00> : vector<1x256xf32>
    %439 = tpu.matmul %414, %438, %cst_156 {dimension_numbers = #tpu.dot_dimension_numbers<[1], [0], [0], [1], [0, 0, 1, 1], [], []>} : vector<1x64xf32>, vector<64x256xf32>, vector<1x256xf32> -> vector<1x256xf32>
    %440 = arith.addf %437, %439 : vector<1x256xf32>
    %c0_157 = arith.constant 0 : index
    %c0_158 = arith.constant 0 : index
    %441 = vector.load %arg12[%c0_157, %c0_158] : memref<1x256xf32, #tpu.memory_space<vmem>>, vector<1x256xf32>
    %442 = arith.addf %440, %441 : vector<1x256xf32>
    %443 = vector.extract_strided_slice %442 {offsets = [0, 0], sizes = [1, 192], strides = [1, 1]} : vector<1x256xf32> to vector<1x192xf32>
    %444 = arith.negf %443 : vector<1x192xf32>
    %445 = math.exp %444 : vector<1x192xf32>
    %cst_159 = arith.constant 1.000000e+00 : f32
    %446 = vector.broadcast %cst_159 : f32 to vector<1x192xf32>
    %447 = arith.addf %446, %445 : vector<1x192xf32>
    %448 = arith.divf %446, %447 : vector<1x192xf32>
    %449 = vector.extract_strided_slice %448 {offsets = [0, 0], sizes = [1, 64], strides = [1, 1]} : vector<1x192xf32> to vector<1x64xf32>
    %450 = vector.extract_strided_slice %448 {offsets = [0, 64], sizes = [1, 64], strides = [1, 1]} : vector<1x192xf32> to vector<1x64xf32>
    %451 = vector.extract_strided_slice %448 {offsets = [0, 128], sizes = [1, 64], strides = [1, 1]} : vector<1x192xf32> to vector<1x64xf32>
    %452 = vector.extract_strided_slice %442 {offsets = [0, 192], sizes = [1, 64], strides = [1, 1]} : vector<1x256xf32> to vector<1x64xf32>
    %453 = math.tanh %452 : vector<1x64xf32>
    %454 = arith.mulf %450, %412 : vector<1x64xf32>
    %455 = arith.mulf %449, %453 : vector<1x64xf32>
    %456 = arith.addf %454, %455 : vector<1x64xf32>
    %457 = math.tanh %456 : vector<1x64xf32>
    %458 = arith.mulf %451, %457 : vector<1x64xf32>
    %459 = arith.index_cast %c1_i32_146 : i32 to index
    %c0_160 = arith.constant 0 : index
    %460 = vector.load %arg17[%459, %c0_160] : memref<8x64xf32, #tpu.memory_space<vmem>>, vector<1x64xf32>
    tpu.vector_store %arg17[%459, %c0_160], %458 {strides = array<i32>} : memref<8x64xf32, #tpu.memory_space<vmem>>, vector<1x64xf32>,
    %c2_i32_161 = arith.constant 2 : i32
    %c0_162 = arith.constant 0 : index
    %c0_163 = arith.constant 0 : index
    %461 = vector.load %arg8[%c0_162, %c0_163] : memref<32x256xf32, #tpu.memory_space<vmem>>, vector<32x256xf32>
    %cst_164 = arith.constant dense<0.000000e+00> : vector<1x256xf32>
    %462 = tpu.matmul %435, %461, %cst_164 {dimension_numbers = #tpu.dot_dimension_numbers<[1], [0], [0], [1], [0, 0, 1, 1], [], []>} : vector<1x32xf32>, vector<32x256xf32>, vector<1x256xf32> -> vector<1x256xf32>
    %463 = arith.addf %368, %462 : vector<1x256xf32>
    %464 = vector.extract_strided_slice %463 {offsets = [0, 0], sizes = [1, 192], strides = [1, 1]} : vector<1x256xf32> to vector<1x192xf32>
    %465 = arith.negf %464 : vector<1x192xf32>
    %466 = math.exp %465 : vector<1x192xf32>
    %cst_165 = arith.constant 1.000000e+00 : f32
    %467 = vector.broadcast %cst_165 : f32 to vector<1x192xf32>
    %468 = arith.addf %467, %466 : vector<1x192xf32>
    %469 = arith.divf %467, %468 : vector<1x192xf32>
    %470 = vector.extract_strided_slice %469 {offsets = [0, 0], sizes = [1, 32], strides = [1, 1]} : vector<1x192xf32> to vector<1x32xf32>
    %471 = vector.extract_strided_slice %469 {offsets = [0, 64], sizes = [1, 32], strides = [1, 1]} : vector<1x192xf32> to vector<1x32xf32>
    %472 = vector.extract_strided_slice %469 {offsets = [0, 128], sizes = [1, 32], strides = [1, 1]} : vector<1x192xf32> to vector<1x32xf32>
    %473 = vector.extract_strided_slice %463 {offsets = [0, 192], sizes = [1, 32], strides = [1, 1]} : vector<1x256xf32> to vector<1x32xf32>
    %474 = math.tanh %473 : vector<1x32xf32>
    %475 = arith.mulf %471, %433 : vector<1x32xf32>
    %476 = arith.mulf %470, %474 : vector<1x32xf32>
    %477 = arith.addf %475, %476 : vector<1x32xf32>
    %478 = math.tanh %477 : vector<1x32xf32>
    %479 = arith.mulf %472, %478 : vector<1x32xf32>
    %c0_166 = arith.constant 0 : index
    %c0_167 = arith.constant 0 : index
    %480 = vector.load %arg10[%c0_166, %c0_167] : memref<32x256xf32, #tpu.memory_space<vmem>>, vector<32x256xf32>
    %cst_168 = arith.constant dense<0.000000e+00> : vector<1x256xf32>
    %481 = tpu.matmul %479, %480, %cst_168 {dimension_numbers = #tpu.dot_dimension_numbers<[1], [0], [0], [1], [0, 0, 1, 1], [], []>} : vector<1x32xf32>, vector<32x256xf32>, vector<1x256xf32> -> vector<1x256xf32>
    %c0_169 = arith.constant 0 : index
    %c0_170 = arith.constant 0 : index
    %482 = vector.load %arg11[%c0_169, %c0_170] : memref<64x256xf32, #tpu.memory_space<vmem>>, vector<64x256xf32>
    %cst_171 = arith.constant dense<0.000000e+00> : vector<1x256xf32>
    %483 = tpu.matmul %458, %482, %cst_171 {dimension_numbers = #tpu.dot_dimension_numbers<[1], [0], [0], [1], [0, 0, 1, 1], [], []>} : vector<1x64xf32>, vector<64x256xf32>, vector<1x256xf32> -> vector<1x256xf32>
    %484 = arith.addf %481, %483 : vector<1x256xf32>
    %c0_172 = arith.constant 0 : index
    %c0_173 = arith.constant 0 : index
    %485 = vector.load %arg12[%c0_172, %c0_173] : memref<1x256xf32, #tpu.memory_space<vmem>>, vector<1x256xf32>
    %486 = arith.addf %484, %485 : vector<1x256xf32>
    %487 = vector.extract_strided_slice %486 {offsets = [0, 0], sizes = [1, 192], strides = [1, 1]} : vector<1x256xf32> to vector<1x192xf32>
    %488 = arith.negf %487 : vector<1x192xf32>
    %489 = math.exp %488 : vector<1x192xf32>
    %cst_174 = arith.constant 1.000000e+00 : f32
    %490 = vector.broadcast %cst_174 : f32 to vector<1x192xf32>
    %491 = arith.addf %490, %489 : vector<1x192xf32>
    %492 = arith.divf %490, %491 : vector<1x192xf32>
    %493 = vector.extract_strided_slice %492 {offsets = [0, 0], sizes = [1, 64], strides = [1, 1]} : vector<1x192xf32> to vector<1x64xf32>
    %494 = vector.extract_strided_slice %492 {offsets = [0, 64], sizes = [1, 64], strides = [1, 1]} : vector<1x192xf32> to vector<1x64xf32>
    %495 = vector.extract_strided_slice %492 {offsets = [0, 128], sizes = [1, 64], strides = [1, 1]} : vector<1x192xf32> to vector<1x64xf32>
    %496 = vector.extract_strided_slice %486 {offsets = [0, 192], sizes = [1, 64], strides = [1, 1]} : vector<1x256xf32> to vector<1x64xf32>
    %497 = math.tanh %496 : vector<1x64xf32>
    %498 = arith.mulf %494, %456 : vector<1x64xf32>
    %499 = arith.mulf %493, %497 : vector<1x64xf32>
    %500 = arith.addf %498, %499 : vector<1x64xf32>
    %501 = math.tanh %500 : vector<1x64xf32>
    %502 = arith.mulf %495, %501 : vector<1x64xf32>
    %503 = arith.index_cast %c2_i32_161 : i32 to index
    %c0_175 = arith.constant 0 : index
    %504 = vector.load %arg17[%503, %c0_175] : memref<8x64xf32, #tpu.memory_space<vmem>>, vector<1x64xf32>
    tpu.vector_store %arg17[%503, %c0_175], %502 {strides = array<i32>} : memref<8x64xf32, #tpu.memory_space<vmem>>, vector<1x64xf32>,
    %c3_i32_176 = arith.constant 3 : i32
    %c0_177 = arith.constant 0 : index
    %c0_178 = arith.constant 0 : index
    %505 = vector.load %arg8[%c0_177, %c0_178] : memref<32x256xf32, #tpu.memory_space<vmem>>, vector<32x256xf32>
    %cst_179 = arith.constant dense<0.000000e+00> : vector<1x256xf32>
    %506 = tpu.matmul %479, %505, %cst_179 {dimension_numbers = #tpu.dot_dimension_numbers<[1], [0], [0], [1], [0, 0, 1, 1], [], []>} : vector<1x32xf32>, vector<32x256xf32>, vector<1x256xf32> -> vector<1x256xf32>
    %507 = arith.addf %368, %506 : vector<1x256xf32>
    %508 = vector.extract_strided_slice %507 {offsets = [0, 0], sizes = [1, 192], strides = [1, 1]} : vector<1x256xf32> to vector<1x192xf32>
    %509 = arith.negf %508 : vector<1x192xf32>
    %510 = math.exp %509 : vector<1x192xf32>
    %cst_180 = arith.constant 1.000000e+00 : f32
    %511 = vector.broadcast %cst_180 : f32 to vector<1x192xf32>
    %512 = arith.addf %511, %510 : vector<1x192xf32>
    %513 = arith.divf %511, %512 : vector<1x192xf32>
    %514 = vector.extract_strided_slice %513 {offsets = [0, 0], sizes = [1, 32], strides = [1, 1]} : vector<1x192xf32> to vector<1x32xf32>
    %515 = vector.extract_strided_slice %513 {offsets = [0, 64], sizes = [1, 32], strides = [1, 1]} : vector<1x192xf32> to vector<1x32xf32>
    %516 = vector.extract_strided_slice %513 {offsets = [0, 128], sizes = [1, 32], strides = [1, 1]} : vector<1x192xf32> to vector<1x32xf32>
    %517 = vector.extract_strided_slice %507 {offsets = [0, 192], sizes = [1, 32], strides = [1, 1]} : vector<1x256xf32> to vector<1x32xf32>
    %518 = math.tanh %517 : vector<1x32xf32>
    %519 = arith.mulf %515, %477 : vector<1x32xf32>
    %520 = arith.mulf %514, %518 : vector<1x32xf32>
    %521 = arith.addf %519, %520 : vector<1x32xf32>
    %522 = math.tanh %521 : vector<1x32xf32>
    %523 = arith.mulf %516, %522 : vector<1x32xf32>
    %c0_181 = arith.constant 0 : index
    %c0_182 = arith.constant 0 : index
    %524 = vector.load %arg10[%c0_181, %c0_182] : memref<32x256xf32, #tpu.memory_space<vmem>>, vector<32x256xf32>
    %cst_183 = arith.constant dense<0.000000e+00> : vector<1x256xf32>
    %525 = tpu.matmul %523, %524, %cst_183 {dimension_numbers = #tpu.dot_dimension_numbers<[1], [0], [0], [1], [0, 0, 1, 1], [], []>} : vector<1x32xf32>, vector<32x256xf32>, vector<1x256xf32> -> vector<1x256xf32>
    %c0_184 = arith.constant 0 : index
    %c0_185 = arith.constant 0 : index
    %526 = vector.load %arg11[%c0_184, %c0_185] : memref<64x256xf32, #tpu.memory_space<vmem>>, vector<64x256xf32>
    %cst_186 = arith.constant dense<0.000000e+00> : vector<1x256xf32>
    %527 = tpu.matmul %502, %526, %cst_186 {dimension_numbers = #tpu.dot_dimension_numbers<[1], [0], [0], [1], [0, 0, 1, 1], [], []>} : vector<1x64xf32>, vector<64x256xf32>, vector<1x256xf32> -> vector<1x256xf32>
    %528 = arith.addf %525, %527 : vector<1x256xf32>
    %c0_187 = arith.constant 0 : index
    %c0_188 = arith.constant 0 : index
    %529 = vector.load %arg12[%c0_187, %c0_188] : memref<1x256xf32, #tpu.memory_space<vmem>>, vector<1x256xf32>
    %530 = arith.addf %528, %529 : vector<1x256xf32>
    %531 = vector.extract_strided_slice %530 {offsets = [0, 0], sizes = [1, 192], strides = [1, 1]} : vector<1x256xf32> to vector<1x192xf32>
    %532 = arith.negf %531 : vector<1x192xf32>
    %533 = math.exp %532 : vector<1x192xf32>
    %cst_189 = arith.constant 1.000000e+00 : f32
    %534 = vector.broadcast %cst_189 : f32 to vector<1x192xf32>
    %535 = arith.addf %534, %533 : vector<1x192xf32>
    %536 = arith.divf %534, %535 : vector<1x192xf32>
    %537 = vector.extract_strided_slice %536 {offsets = [0, 0], sizes = [1, 64], strides = [1, 1]} : vector<1x192xf32> to vector<1x64xf32>
    %538 = vector.extract_strided_slice %536 {offsets = [0, 64], sizes = [1, 64], strides = [1, 1]} : vector<1x192xf32> to vector<1x64xf32>
    %539 = vector.extract_strided_slice %536 {offsets = [0, 128], sizes = [1, 64], strides = [1, 1]} : vector<1x192xf32> to vector<1x64xf32>
    %540 = vector.extract_strided_slice %530 {offsets = [0, 192], sizes = [1, 64], strides = [1, 1]} : vector<1x256xf32> to vector<1x64xf32>
    %541 = math.tanh %540 : vector<1x64xf32>
    %542 = arith.mulf %538, %500 : vector<1x64xf32>
    %543 = arith.mulf %537, %541 : vector<1x64xf32>
    %544 = arith.addf %542, %543 : vector<1x64xf32>
    %545 = math.tanh %544 : vector<1x64xf32>
    %546 = arith.mulf %539, %545 : vector<1x64xf32>
    %547 = arith.index_cast %c3_i32_176 : i32 to index
    %c0_190 = arith.constant 0 : index
    %548 = vector.load %arg17[%547, %c0_190] : memref<8x64xf32, #tpu.memory_space<vmem>>, vector<1x64xf32>
    tpu.vector_store %arg17[%547, %c0_190], %546 {strides = array<i32>} : memref<8x64xf32, #tpu.memory_space<vmem>>, vector<1x64xf32>,
    %c4_i32_191 = arith.constant 4 : i32
    %c0_192 = arith.constant 0 : index
    %c0_193 = arith.constant 0 : index
    %549 = vector.load %arg8[%c0_192, %c0_193] : memref<32x256xf32, #tpu.memory_space<vmem>>, vector<32x256xf32>
    %cst_194 = arith.constant dense<0.000000e+00> : vector<1x256xf32>
    %550 = tpu.matmul %523, %549, %cst_194 {dimension_numbers = #tpu.dot_dimension_numbers<[1], [0], [0], [1], [0, 0, 1, 1], [], []>} : vector<1x32xf32>, vector<32x256xf32>, vector<1x256xf32> -> vector<1x256xf32>
    %551 = arith.addf %368, %550 : vector<1x256xf32>
    %552 = vector.extract_strided_slice %551 {offsets = [0, 0], sizes = [1, 192], strides = [1, 1]} : vector<1x256xf32> to vector<1x192xf32>
    %553 = arith.negf %552 : vector<1x192xf32>
    %554 = math.exp %553 : vector<1x192xf32>
    %cst_195 = arith.constant 1.000000e+00 : f32
    %555 = vector.broadcast %cst_195 : f32 to vector<1x192xf32>
    %556 = arith.addf %555, %554 : vector<1x192xf32>
    %557 = arith.divf %555, %556 : vector<1x192xf32>
    %558 = vector.extract_strided_slice %557 {offsets = [0, 0], sizes = [1, 32], strides = [1, 1]} : vector<1x192xf32> to vector<1x32xf32>
    %559 = vector.extract_strided_slice %557 {offsets = [0, 64], sizes = [1, 32], strides = [1, 1]} : vector<1x192xf32> to vector<1x32xf32>
    %560 = vector.extract_strided_slice %557 {offsets = [0, 128], sizes = [1, 32], strides = [1, 1]} : vector<1x192xf32> to vector<1x32xf32>
    %561 = vector.extract_strided_slice %551 {offsets = [0, 192], sizes = [1, 32], strides = [1, 1]} : vector<1x256xf32> to vector<1x32xf32>
    %562 = math.tanh %561 : vector<1x32xf32>
    %563 = arith.mulf %559, %521 : vector<1x32xf32>
    %564 = arith.mulf %558, %562 : vector<1x32xf32>
    %565 = arith.addf %563, %564 : vector<1x32xf32>
    %566 = math.tanh %565 : vector<1x32xf32>
    %567 = arith.mulf %560, %566 : vector<1x32xf32>
    %c0_196 = arith.constant 0 : index
    %c0_197 = arith.constant 0 : index
    %568 = vector.load %arg10[%c0_196, %c0_197] : memref<32x256xf32, #tpu.memory_space<vmem>>, vector<32x256xf32>
    %cst_198 = arith.constant dense<0.000000e+00> : vector<1x256xf32>
    %569 = tpu.matmul %567, %568, %cst_198 {dimension_numbers = #tpu.dot_dimension_numbers<[1], [0], [0], [1], [0, 0, 1, 1], [], []>} : vector<1x32xf32>, vector<32x256xf32>, vector<1x256xf32> -> vector<1x256xf32>
    %c0_199 = arith.constant 0 : index
    %c0_200 = arith.constant 0 : index
    %570 = vector.load %arg11[%c0_199, %c0_200] : memref<64x256xf32, #tpu.memory_space<vmem>>, vector<64x256xf32>
    %cst_201 = arith.constant dense<0.000000e+00> : vector<1x256xf32>
    %571 = tpu.matmul %546, %570, %cst_201 {dimension_numbers = #tpu.dot_dimension_numbers<[1], [0], [0], [1], [0, 0, 1, 1], [], []>} : vector<1x64xf32>, vector<64x256xf32>, vector<1x256xf32> -> vector<1x256xf32>
    %572 = arith.addf %569, %571 : vector<1x256xf32>
    %c0_202 = arith.constant 0 : index
    %c0_203 = arith.constant 0 : index
    %573 = vector.load %arg12[%c0_202, %c0_203] : memref<1x256xf32, #tpu.memory_space<vmem>>, vector<1x256xf32>
    %574 = arith.addf %572, %573 : vector<1x256xf32>
    %575 = vector.extract_strided_slice %574 {offsets = [0, 0], sizes = [1, 192], strides = [1, 1]} : vector<1x256xf32> to vector<1x192xf32>
    %576 = arith.negf %575 : vector<1x192xf32>
    %577 = math.exp %576 : vector<1x192xf32>
    %cst_204 = arith.constant 1.000000e+00 : f32
    %578 = vector.broadcast %cst_204 : f32 to vector<1x192xf32>
    %579 = arith.addf %578, %577 : vector<1x192xf32>
    %580 = arith.divf %578, %579 : vector<1x192xf32>
    %581 = vector.extract_strided_slice %580 {offsets = [0, 0], sizes = [1, 64], strides = [1, 1]} : vector<1x192xf32> to vector<1x64xf32>
    %582 = vector.extract_strided_slice %580 {offsets = [0, 64], sizes = [1, 64], strides = [1, 1]} : vector<1x192xf32> to vector<1x64xf32>
    %583 = vector.extract_strided_slice %580 {offsets = [0, 128], sizes = [1, 64], strides = [1, 1]} : vector<1x192xf32> to vector<1x64xf32>
    %584 = vector.extract_strided_slice %574 {offsets = [0, 192], sizes = [1, 64], strides = [1, 1]} : vector<1x256xf32> to vector<1x64xf32>
    %585 = math.tanh %584 : vector<1x64xf32>
    %586 = arith.mulf %582, %544 : vector<1x64xf32>
    %587 = arith.mulf %581, %585 : vector<1x64xf32>
    %588 = arith.addf %586, %587 : vector<1x64xf32>
    %589 = math.tanh %588 : vector<1x64xf32>
    %590 = arith.mulf %583, %589 : vector<1x64xf32>
    %591 = arith.index_cast %c4_i32_191 : i32 to index
    %c0_205 = arith.constant 0 : index
    %592 = vector.load %arg17[%591, %c0_205] : memref<8x64xf32, #tpu.memory_space<vmem>>, vector<1x64xf32>
    tpu.vector_store %arg17[%591, %c0_205], %590 {strides = array<i32>} : memref<8x64xf32, #tpu.memory_space<vmem>>, vector<1x64xf32>,
    %c5_i32_206 = arith.constant 5 : i32
    %c0_207 = arith.constant 0 : index
    %c0_208 = arith.constant 0 : index
    %593 = vector.load %arg8[%c0_207, %c0_208] : memref<32x256xf32, #tpu.memory_space<vmem>>, vector<32x256xf32>
    %cst_209 = arith.constant dense<0.000000e+00> : vector<1x256xf32>
    %594 = tpu.matmul %567, %593, %cst_209 {dimension_numbers = #tpu.dot_dimension_numbers<[1], [0], [0], [1], [0, 0, 1, 1], [], []>} : vector<1x32xf32>, vector<32x256xf32>, vector<1x256xf32> -> vector<1x256xf32>
    %595 = arith.addf %368, %594 : vector<1x256xf32>
    %596 = vector.extract_strided_slice %595 {offsets = [0, 0], sizes = [1, 192], strides = [1, 1]} : vector<1x256xf32> to vector<1x192xf32>
    %597 = arith.negf %596 : vector<1x192xf32>
    %598 = math.exp %597 : vector<1x192xf32>
    %cst_210 = arith.constant 1.000000e+00 : f32
    %599 = vector.broadcast %cst_210 : f32 to vector<1x192xf32>
    %600 = arith.addf %599, %598 : vector<1x192xf32>
    %601 = arith.divf %599, %600 : vector<1x192xf32>
    %602 = vector.extract_strided_slice %601 {offsets = [0, 0], sizes = [1, 32], strides = [1, 1]} : vector<1x192xf32> to vector<1x32xf32>
    %603 = vector.extract_strided_slice %601 {offsets = [0, 64], sizes = [1, 32], strides = [1, 1]} : vector<1x192xf32> to vector<1x32xf32>
    %604 = vector.extract_strided_slice %601 {offsets = [0, 128], sizes = [1, 32], strides = [1, 1]} : vector<1x192xf32> to vector<1x32xf32>
    %605 = vector.extract_strided_slice %595 {offsets = [0, 192], sizes = [1, 32], strides = [1, 1]} : vector<1x256xf32> to vector<1x32xf32>
    %606 = math.tanh %605 : vector<1x32xf32>
    %607 = arith.mulf %603, %565 : vector<1x32xf32>
    %608 = arith.mulf %602, %606 : vector<1x32xf32>
    %609 = arith.addf %607, %608 : vector<1x32xf32>
    %610 = math.tanh %609 : vector<1x32xf32>
    %611 = arith.mulf %604, %610 : vector<1x32xf32>
    %c0_211 = arith.constant 0 : index
    %c0_212 = arith.constant 0 : index
    %612 = vector.load %arg10[%c0_211, %c0_212] : memref<32x256xf32, #tpu.memory_space<vmem>>, vector<32x256xf32>
    %cst_213 = arith.constant dense<0.000000e+00> : vector<1x256xf32>
    %613 = tpu.matmul %611, %612, %cst_213 {dimension_numbers = #tpu.dot_dimension_numbers<[1], [0], [0], [1], [0, 0, 1, 1], [], []>} : vector<1x32xf32>, vector<32x256xf32>, vector<1x256xf32> -> vector<1x256xf32>
    %c0_214 = arith.constant 0 : index
    %c0_215 = arith.constant 0 : index
    %614 = vector.load %arg11[%c0_214, %c0_215] : memref<64x256xf32, #tpu.memory_space<vmem>>, vector<64x256xf32>
    %cst_216 = arith.constant dense<0.000000e+00> : vector<1x256xf32>
    %615 = tpu.matmul %590, %614, %cst_216 {dimension_numbers = #tpu.dot_dimension_numbers<[1], [0], [0], [1], [0, 0, 1, 1], [], []>} : vector<1x64xf32>, vector<64x256xf32>, vector<1x256xf32> -> vector<1x256xf32>
    %616 = arith.addf %613, %615 : vector<1x256xf32>
    %c0_217 = arith.constant 0 : index
    %c0_218 = arith.constant 0 : index
    %617 = vector.load %arg12[%c0_217, %c0_218] : memref<1x256xf32, #tpu.memory_space<vmem>>, vector<1x256xf32>
    %618 = arith.addf %616, %617 : vector<1x256xf32>
    %619 = vector.extract_strided_slice %618 {offsets = [0, 0], sizes = [1, 192], strides = [1, 1]} : vector<1x256xf32> to vector<1x192xf32>
    %620 = arith.negf %619 : vector<1x192xf32>
    %621 = math.exp %620 : vector<1x192xf32>
    %cst_219 = arith.constant 1.000000e+00 : f32
    %622 = vector.broadcast %cst_219 : f32 to vector<1x192xf32>
    %623 = arith.addf %622, %621 : vector<1x192xf32>
    %624 = arith.divf %622, %623 : vector<1x192xf32>
    %625 = vector.extract_strided_slice %624 {offsets = [0, 0], sizes = [1, 64], strides = [1, 1]} : vector<1x192xf32> to vector<1x64xf32>
    %626 = vector.extract_strided_slice %624 {offsets = [0, 64], sizes = [1, 64], strides = [1, 1]} : vector<1x192xf32> to vector<1x64xf32>
    %627 = vector.extract_strided_slice %624 {offsets = [0, 128], sizes = [1, 64], strides = [1, 1]} : vector<1x192xf32> to vector<1x64xf32>
    %628 = vector.extract_strided_slice %618 {offsets = [0, 192], sizes = [1, 64], strides = [1, 1]} : vector<1x256xf32> to vector<1x64xf32>
    %629 = math.tanh %628 : vector<1x64xf32>
    %630 = arith.mulf %626, %588 : vector<1x64xf32>
    %631 = arith.mulf %625, %629 : vector<1x64xf32>
    %632 = arith.addf %630, %631 : vector<1x64xf32>
    %633 = math.tanh %632 : vector<1x64xf32>
    %634 = arith.mulf %627, %633 : vector<1x64xf32>
    %635 = arith.index_cast %c5_i32_206 : i32 to index
    %c0_220 = arith.constant 0 : index
    %636 = vector.load %arg17[%635, %c0_220] : memref<8x64xf32, #tpu.memory_space<vmem>>, vector<1x64xf32>
    tpu.vector_store %arg17[%635, %c0_220], %634 {strides = array<i32>} : memref<8x64xf32, #tpu.memory_space<vmem>>, vector<1x64xf32>,
    %c6_i32_221 = arith.constant 6 : i32
    %c0_222 = arith.constant 0 : index
    %c0_223 = arith.constant 0 : index
    %637 = vector.load %arg8[%c0_222, %c0_223] : memref<32x256xf32, #tpu.memory_space<vmem>>, vector<32x256xf32>
    %cst_224 = arith.constant dense<0.000000e+00> : vector<1x256xf32>
    %638 = tpu.matmul %611, %637, %cst_224 {dimension_numbers = #tpu.dot_dimension_numbers<[1], [0], [0], [1], [0, 0, 1, 1], [], []>} : vector<1x32xf32>, vector<32x256xf32>, vector<1x256xf32> -> vector<1x256xf32>
    %639 = arith.addf %368, %638 : vector<1x256xf32>
    %640 = vector.extract_strided_slice %639 {offsets = [0, 0], sizes = [1, 192], strides = [1, 1]} : vector<1x256xf32> to vector<1x192xf32>
    %641 = arith.negf %640 : vector<1x192xf32>
    %642 = math.exp %641 : vector<1x192xf32>
    %cst_225 = arith.constant 1.000000e+00 : f32
    %643 = vector.broadcast %cst_225 : f32 to vector<1x192xf32>
    %644 = arith.addf %643, %642 : vector<1x192xf32>
    %645 = arith.divf %643, %644 : vector<1x192xf32>
    %646 = vector.extract_strided_slice %645 {offsets = [0, 0], sizes = [1, 32], strides = [1, 1]} : vector<1x192xf32> to vector<1x32xf32>
    %647 = vector.extract_strided_slice %645 {offsets = [0, 64], sizes = [1, 32], strides = [1, 1]} : vector<1x192xf32> to vector<1x32xf32>
    %648 = vector.extract_strided_slice %645 {offsets = [0, 128], sizes = [1, 32], strides = [1, 1]} : vector<1x192xf32> to vector<1x32xf32>
    %649 = vector.extract_strided_slice %639 {offsets = [0, 192], sizes = [1, 32], strides = [1, 1]} : vector<1x256xf32> to vector<1x32xf32>
    %650 = math.tanh %649 : vector<1x32xf32>
    %651 = arith.mulf %647, %609 : vector<1x32xf32>
    %652 = arith.mulf %646, %650 : vector<1x32xf32>
    %653 = arith.addf %651, %652 : vector<1x32xf32>
    %654 = math.tanh %653 : vector<1x32xf32>
    %655 = arith.mulf %648, %654 : vector<1x32xf32>
    %c0_226 = arith.constant 0 : index
    %c0_227 = arith.constant 0 : index
    %656 = vector.load %arg10[%c0_226, %c0_227] : memref<32x256xf32, #tpu.memory_space<vmem>>, vector<32x256xf32>
    %cst_228 = arith.constant dense<0.000000e+00> : vector<1x256xf32>
    %657 = tpu.matmul %655, %656, %cst_228 {dimension_numbers = #tpu.dot_dimension_numbers<[1], [0], [0], [1], [0, 0, 1, 1], [], []>} : vector<1x32xf32>, vector<32x256xf32>, vector<1x256xf32> -> vector<1x256xf32>
    %c0_229 = arith.constant 0 : index
    %c0_230 = arith.constant 0 : index
    %658 = vector.load %arg11[%c0_229, %c0_230] : memref<64x256xf32, #tpu.memory_space<vmem>>, vector<64x256xf32>
    %cst_231 = arith.constant dense<0.000000e+00> : vector<1x256xf32>
    %659 = tpu.matmul %634, %658, %cst_231 {dimension_numbers = #tpu.dot_dimension_numbers<[1], [0], [0], [1], [0, 0, 1, 1], [], []>} : vector<1x64xf32>, vector<64x256xf32>, vector<1x256xf32> -> vector<1x256xf32>
    %660 = arith.addf %657, %659 : vector<1x256xf32>
    %c0_232 = arith.constant 0 : index
    %c0_233 = arith.constant 0 : index
    %661 = vector.load %arg12[%c0_232, %c0_233] : memref<1x256xf32, #tpu.memory_space<vmem>>, vector<1x256xf32>
    %662 = arith.addf %660, %661 : vector<1x256xf32>
    %663 = vector.extract_strided_slice %662 {offsets = [0, 0], sizes = [1, 192], strides = [1, 1]} : vector<1x256xf32> to vector<1x192xf32>
    %664 = arith.negf %663 : vector<1x192xf32>
    %665 = math.exp %664 : vector<1x192xf32>
    %cst_234 = arith.constant 1.000000e+00 : f32
    %666 = vector.broadcast %cst_234 : f32 to vector<1x192xf32>
    %667 = arith.addf %666, %665 : vector<1x192xf32>
    %668 = arith.divf %666, %667 : vector<1x192xf32>
    %669 = vector.extract_strided_slice %668 {offsets = [0, 0], sizes = [1, 64], strides = [1, 1]} : vector<1x192xf32> to vector<1x64xf32>
    %670 = vector.extract_strided_slice %668 {offsets = [0, 64], sizes = [1, 64], strides = [1, 1]} : vector<1x192xf32> to vector<1x64xf32>
    %671 = vector.extract_strided_slice %668 {offsets = [0, 128], sizes = [1, 64], strides = [1, 1]} : vector<1x192xf32> to vector<1x64xf32>
    %672 = vector.extract_strided_slice %662 {offsets = [0, 192], sizes = [1, 64], strides = [1, 1]} : vector<1x256xf32> to vector<1x64xf32>
    %673 = math.tanh %672 : vector<1x64xf32>
    %674 = arith.mulf %670, %632 : vector<1x64xf32>
    %675 = arith.mulf %669, %673 : vector<1x64xf32>
    %676 = arith.addf %674, %675 : vector<1x64xf32>
    %677 = math.tanh %676 : vector<1x64xf32>
    %678 = arith.mulf %671, %677 : vector<1x64xf32>
    %679 = arith.index_cast %c6_i32_221 : i32 to index
    %c0_235 = arith.constant 0 : index
    %680 = vector.load %arg17[%679, %c0_235] : memref<8x64xf32, #tpu.memory_space<vmem>>, vector<1x64xf32>
    tpu.vector_store %arg17[%679, %c0_235], %678 {strides = array<i32>} : memref<8x64xf32, #tpu.memory_space<vmem>>, vector<1x64xf32>,
    %c7_i32_236 = arith.constant 7 : i32
    %c0_237 = arith.constant 0 : index
    %c0_238 = arith.constant 0 : index
    %681 = vector.load %arg8[%c0_237, %c0_238] : memref<32x256xf32, #tpu.memory_space<vmem>>, vector<32x256xf32>
    %cst_239 = arith.constant dense<0.000000e+00> : vector<1x256xf32>
    %682 = tpu.matmul %655, %681, %cst_239 {dimension_numbers = #tpu.dot_dimension_numbers<[1], [0], [0], [1], [0, 0, 1, 1], [], []>} : vector<1x32xf32>, vector<32x256xf32>, vector<1x256xf32> -> vector<1x256xf32>
    %683 = arith.addf %368, %682 : vector<1x256xf32>
    %684 = vector.extract_strided_slice %683 {offsets = [0, 0], sizes = [1, 192], strides = [1, 1]} : vector<1x256xf32> to vector<1x192xf32>
    %685 = arith.negf %684 : vector<1x192xf32>
    %686 = math.exp %685 : vector<1x192xf32>
    %cst_240 = arith.constant 1.000000e+00 : f32
    %687 = vector.broadcast %cst_240 : f32 to vector<1x192xf32>
    %688 = arith.addf %687, %686 : vector<1x192xf32>
    %689 = arith.divf %687, %688 : vector<1x192xf32>
    %690 = vector.extract_strided_slice %689 {offsets = [0, 0], sizes = [1, 32], strides = [1, 1]} : vector<1x192xf32> to vector<1x32xf32>
    %691 = vector.extract_strided_slice %689 {offsets = [0, 64], sizes = [1, 32], strides = [1, 1]} : vector<1x192xf32> to vector<1x32xf32>
    %692 = vector.extract_strided_slice %689 {offsets = [0, 128], sizes = [1, 32], strides = [1, 1]} : vector<1x192xf32> to vector<1x32xf32>
    %693 = vector.extract_strided_slice %683 {offsets = [0, 192], sizes = [1, 32], strides = [1, 1]} : vector<1x256xf32> to vector<1x32xf32>
    %694 = math.tanh %693 : vector<1x32xf32>
    %695 = arith.mulf %691, %653 : vector<1x32xf32>
    %696 = arith.mulf %690, %694 : vector<1x32xf32>
    %697 = arith.addf %695, %696 : vector<1x32xf32>
    %698 = math.tanh %697 : vector<1x32xf32>
    %699 = arith.mulf %692, %698 : vector<1x32xf32>
    %c0_241 = arith.constant 0 : index
    %c0_242 = arith.constant 0 : index
    %700 = vector.load %arg10[%c0_241, %c0_242] : memref<32x256xf32, #tpu.memory_space<vmem>>, vector<32x256xf32>
    %cst_243 = arith.constant dense<0.000000e+00> : vector<1x256xf32>
    %701 = tpu.matmul %699, %700, %cst_243 {dimension_numbers = #tpu.dot_dimension_numbers<[1], [0], [0], [1], [0, 0, 1, 1], [], []>} : vector<1x32xf32>, vector<32x256xf32>, vector<1x256xf32> -> vector<1x256xf32>
    %c0_244 = arith.constant 0 : index
    %c0_245 = arith.constant 0 : index
    %702 = vector.load %arg11[%c0_244, %c0_245] : memref<64x256xf32, #tpu.memory_space<vmem>>, vector<64x256xf32>
    %cst_246 = arith.constant dense<0.000000e+00> : vector<1x256xf32>
    %703 = tpu.matmul %678, %702, %cst_246 {dimension_numbers = #tpu.dot_dimension_numbers<[1], [0], [0], [1], [0, 0, 1, 1], [], []>} : vector<1x64xf32>, vector<64x256xf32>, vector<1x256xf32> -> vector<1x256xf32>
    %704 = arith.addf %701, %703 : vector<1x256xf32>
    %c0_247 = arith.constant 0 : index
    %c0_248 = arith.constant 0 : index
    %705 = vector.load %arg12[%c0_247, %c0_248] : memref<1x256xf32, #tpu.memory_space<vmem>>, vector<1x256xf32>
    %706 = arith.addf %704, %705 : vector<1x256xf32>
    %707 = vector.extract_strided_slice %706 {offsets = [0, 0], sizes = [1, 192], strides = [1, 1]} : vector<1x256xf32> to vector<1x192xf32>
    %708 = arith.negf %707 : vector<1x192xf32>
    %709 = math.exp %708 : vector<1x192xf32>
    %cst_249 = arith.constant 1.000000e+00 : f32
    %710 = vector.broadcast %cst_249 : f32 to vector<1x192xf32>
    %711 = arith.addf %710, %709 : vector<1x192xf32>
    %712 = arith.divf %710, %711 : vector<1x192xf32>
    %713 = vector.extract_strided_slice %712 {offsets = [0, 0], sizes = [1, 64], strides = [1, 1]} : vector<1x192xf32> to vector<1x64xf32>
    %714 = vector.extract_strided_slice %712 {offsets = [0, 64], sizes = [1, 64], strides = [1, 1]} : vector<1x192xf32> to vector<1x64xf32>
    %715 = vector.extract_strided_slice %712 {offsets = [0, 128], sizes = [1, 64], strides = [1, 1]} : vector<1x192xf32> to vector<1x64xf32>
    %716 = vector.extract_strided_slice %706 {offsets = [0, 192], sizes = [1, 64], strides = [1, 1]} : vector<1x256xf32> to vector<1x64xf32>
    %717 = math.tanh %716 : vector<1x64xf32>
    %718 = arith.mulf %714, %676 : vector<1x64xf32>
    %719 = arith.mulf %713, %717 : vector<1x64xf32>
    %720 = arith.addf %718, %719 : vector<1x64xf32>
    %721 = math.tanh %720 : vector<1x64xf32>
    %722 = arith.mulf %715, %721 : vector<1x64xf32>
    %723 = arith.index_cast %c7_i32_236 : i32 to index
    %c0_250 = arith.constant 0 : index
    %724 = vector.load %arg17[%723, %c0_250] : memref<8x64xf32, #tpu.memory_space<vmem>>, vector<1x64xf32>
    tpu.vector_store %arg17[%723, %c0_250], %722 {strides = array<i32>} : memref<8x64xf32, #tpu.memory_space<vmem>>, vector<1x64xf32>,
    %c8_i32_251 = arith.constant 8 : i32
    %c0_252 = arith.constant 0 : index
    %c0_253 = arith.constant 0 : index
    %725 = vector.load %arg17[%c0_252, %c0_253] : memref<8x64xf32, #tpu.memory_space<vmem>>, vector<8x64xf32>
    %c0_254 = arith.constant 0 : index
    %c0_255 = arith.constant 0 : index
    %726 = vector.load %arg13[%c0_254, %c0_255] : memref<1x64xf32, #tpu.memory_space<vmem>>, vector<1x64xf32>
    %cst_256 = arith.constant dense<0.000000e+00> : vector<1x8xf32>
    %727 = tpu.matmul %726, %725, %cst_256 {dimension_numbers = #tpu.dot_dimension_numbers<[1], [1], [0], [0], [0, 0, 1, 0], [], []>} : vector<1x64xf32>, vector<8x64xf32>, vector<1x8xf32> -> vector<1x8xf32>
    %c0_257 = arith.constant 0 : index
    %c0_258 = arith.constant 0 : index
    %728 = vector.load %arg14[%c0_257, %c0_258] : memref<1x1xf32, #tpu.memory_space<vmem>>, vector<1x1xf32>
    %729 = vector.broadcast %728 : vector<1x1xf32> to vector<1x8xf32>
    %730 = arith.addf %727, %729 : vector<1x8xf32>
    %c0_259 = arith.constant 0 : index
    %c0_260 = arith.constant 0 : index
    %731 = vector.load %arg15[%c0_259, %c0_260] : memref<1x8xf32, #tpu.memory_space<vmem>>, vector<1x8xf32>
    tpu.vector_store %arg15[%c0_259, %c0_260], %730 {strides = array<i32>} : memref<1x8xf32, #tpu.memory_space<vmem>>, vector<1x8xf32>,
    return
  }
}

</mosaic_0001>

<bundles_post_ra>
// kernel: recurrent_autoencoder.1
= control target key start
LH: loop header
LB: loop body
LE: loop exit
PB: predicated region body
PF: predicated region fallthrough
CT: control target
= control target key end

     0   :  { %s7828_s0 = inlined_call_operand.vmem [shape: f32[8,1], index: 0, kind: input, shape index: {}]   ;;  %s7829_s1 = inlined_call_operand.vmem [shape: f32[1,256], index: 1, kind: input, shape index: {}]   ;;  %s7830_s2 = inlined_call_operand.hbm [shape: f32[64,256], index: 2, kind: input, shape index: {}]   ;;  %s7831_s3 = inlined_call_operand.vmem [shape: f32[1,256], index: 3, kind: input, shape index: {}]   ;;  %s7832_s4 = inlined_call_operand.hbm [shape: f32[64,256], index: 4, kind: input, shape index: {}]   ;;  %s7833_s5 = inlined_call_operand.hbm [shape: f32[32,256], index: 5, kind: input, shape index: {}]   ;;  %s7834_s6 = inlined_call_operand.vmem [shape: f32[1,256], index: 6, kind: input, shape index: {}]   ;;  %s7835_s7 = inlined_call_operand.hbm [shape: f32[32,256], index: 7, kind: input, shape index: {}]   ;;  %s7836_s8 = inlined_call_operand.hbm [shape: f32[32,256], index: 8, kind: input, shape index: {}]   ;;  %s7837_s9 = inlined_call_operand.vmem [shape: f32[1,256], index: 9, kind: input, shape index: {}]   ;;  %s7838_s10 = inlined_call_operand.hbm [shape: f32[32,256], index: 10, kind: input, shape index: {}]   ;;  %s7839_s11 = inlined_call_operand.hbm [shape: f32[64,256], index: 11, kind: input, shape index: {}]   ;;  %s7840_s12 = inlined_call_operand.vmem [shape: f32[1,256], index: 12, kind: input, shape index: {}]   ;;  %s7841_s13 = inlined_call_operand.vmem [shape: f32[1,64], index: 13, kind: input, shape index: {}]   ;;  %s7842_s14 = inlined_call_operand.<no memory space> [shape: f32[1,1], index: 14, kind: input, shape index: {}]   ;;  %s7843_s15 = inlined_call_operand.hbm [shape: f32[1,8], index: 15, kind: output, shape index: {}]  }
   0x1   :  { %v20_v0 = vstv %s7842_s14 }
   0x2   :  { %21 = vst [vmem:[#allocation4] sm:$0x1] %v20_v0 }
   0x3   :  { %22 = vsyncpa [#allocation6], 0 }
   0x4   :  { %23 = vsyncpa [#allocation9], 0 }
   0x5   :  { %24 = vsyncpa [#allocation12], 0 }
   0x6   :  { %25 = vsyncpa [#allocation15], 0 }
   0x7   :  { %26 = vsyncpa [#allocation7], 0  ;;  %s6744_s20 = smov [#allocation8]   ;;  %s6745_s22 = smov [#allocation11]  }
   0x8   :  { %s50_s21 = sshll.u32 %s6744_s20, 4  ;;  %s76_s23 = sshll.u32 %s6745_s22, 4  ;;  %s51_s21 = int_to_ptr.vmem [resolvable:$true] %s50_s21  ;;  %s6842_s23 = int_to_ptr.vmem [resolvable:$true] %s76_s23 }
   0x9   :  { %s6558_s26 = scalar_lea.hbm %s7832_s4, 2048 }
   0xa   :  { %p6559_p0 = scmp.ne.s32.totalorder %s7832_s4, %s6558_s26  ;;  %p6562_p1 = scmp.lt.u32.totalorder %s6558_s26, %s7832_s4 }
   0xc   :  { %p6564_p2 = pnand %p6562_p1, %p6559_p0 }
   0xe   :  { %6567 = shalt.err (!%p6564_p2)
}
   0xf   :  { %s6568_s30 = scalar_lea.vmem %s51_s21, 2048  ;;  %p6573_p4 = scmp.lt.s32.totalorder %s51_s21, %s51_s21 }
  0x10   :  { %p6569_p3 = scmp.ne.s32.totalorder %s51_s21, %s6568_s30  ;;  %p6574_p5 = scmp.lt.s32.totalorder %s6568_s30, %s6568_s30 }
  0x12   :  { %p6575_p6 = por %p6574_p5, %p6573_p4 }
  0x14   :  { %p6576_p7 = pnand %p6575_p6, %p6569_p3 }
  0x16   :  { %6579 = shalt.err (!%p6576_p7)
}
  0x17   :  { %s6746_s16 = smov 256   ;;  %s6747_s17 = smov 16  }
  0x18   :  { %56 = dma.hbm_to_vmem [thread:$0]  %s7832_s4, 2048, %s51_s21, [#allocation9], %s6746_s16, %s6746_s16, %s6747_s17  }
  0x19   :  { %s6580_s24 = scalar_lea.hbm %s7835_s7, 1024 }
  0x1a   :  { %p6581_p8 = scmp.ne.s32.totalorder %s7835_s7, %s6580_s24  ;;  %p6584_p9 = scmp.lt.u32.totalorder %s6580_s24, %s7835_s7 }
  0x1c   :  { %p6586_p10 = pnand %p6584_p9, %p6581_p8 }
  0x1e   :  { %6589 = shalt.err (!%p6586_p10)
}
  0x1f   :  { %s6590_s14 = scalar_lea.vmem %s6842_s23, 1024  ;;  %p6595_p12 = scmp.lt.s32.totalorder %s6842_s23, %s6842_s23 }
  0x20   :  { %p6591_p11 = scmp.ne.s32.totalorder %s6842_s23, %s6590_s14  ;;  %p6596_p13 = scmp.lt.s32.totalorder %s6590_s14, %s6590_s14 }
  0x22   :  { %p6597_p0 = por %p6596_p13, %p6595_p12 }
  0x24   :  { %p6598_p1 = pnand %p6597_p0, %p6591_p11 }
  0x26   :  { %6601 = shalt.err (!%p6598_p1)
}
  0x27   :  { %82 = dma.hbm_to_vmem [thread:$0]  %s7835_s7, 1024, %s6842_s23, [#allocation12], %s6746_s16, %s6746_s16, %s6747_s17  }
  0x28   :  { %s6748_s29 = smov [#allocation14]   ;;  %s6749_s18 = smov [#allocation5]  }
  0x29   :  { %s102_s30 = sshll.u32 %s6748_s29, 4  ;;  %s36_s19 = sshll.u32 %s6749_s18, 4  ;;  %s103_s30 = int_to_ptr.vmem [resolvable:$true] %s102_s30  ;;  %s6879_s19 = int_to_ptr.vmem [resolvable:$true] %s36_s19 }
  0x2a   :  { %s6602_s24 = scalar_lea.hbm %s7838_s10, 1024 }
  0x2b   :  { %p6603_p2 = scmp.ne.s32.totalorder %s7838_s10, %s6602_s24  ;;  %p6606_p3 = scmp.lt.u32.totalorder %s6602_s24, %s7838_s10 }
  0x2d   :  { %p6608_p4 = pnand %p6606_p3, %p6603_p2 }
  0x2f   :  { %6611 = shalt.err (!%p6608_p4)
}
  0x30   :  { %s6612_s7 = scalar_lea.vmem %s103_s30, 1024  ;;  %p6617_p6 = scmp.lt.s32.totalorder %s103_s30, %s103_s30 }
  0x31   :  { %p6613_p5 = scmp.ne.s32.totalorder %s103_s30, %s6612_s7  ;;  %p6618_p7 = scmp.lt.s32.totalorder %s6612_s7, %s6612_s7 }
  0x33   :  { %p6619_p8 = por %p6618_p7, %p6617_p6 }
  0x35   :  { %p6620_p9 = pnand %p6619_p8, %p6613_p5 }
  0x37   :  { %6623 = shalt.err (!%p6620_p9)
}
  0x38   :  { %108 = dma.hbm_to_vmem [thread:$0]  %s7838_s10, 1024, %s103_s30, [#allocation15], %s6746_s16, %s6746_s16, %s6747_s17  }
  0x39   :  { %s6624_s29 = scalar_lea.hbm %s7830_s2, 2048 }
  0x3a   :  { %p6625_p10 = scmp.ne.s32.totalorder %s7830_s2, %s6624_s29  ;;  %p6628_p11 = scmp.lt.u32.totalorder %s6624_s29, %s7830_s2 }
  0x3c   :  { %p6630_p12 = pnand %p6628_p11, %p6625_p10 }
  0x3e   :  { %6633 = shalt.err (!%p6630_p12)
}
  0x3f   :  { %s6634_s25 = scalar_lea.vmem %s6879_s19, 2048  ;;  %p6639_p0 = scmp.lt.s32.totalorder %s6879_s19, %s6879_s19 }
  0x40   :  { %p6635_p13 = scmp.ne.s32.totalorder %s6879_s19, %s6634_s25  ;;  %p6640_p1 = scmp.lt.s32.totalorder %s6634_s25, %s6634_s25 }
  0x42   :  { %p6641_p2 = por %p6640_p1, %p6639_p0 }
  0x44   :  { %p6642_p3 = pnand %p6641_p2, %p6635_p13 }
  0x46   :  { %6645 = shalt.err (!%p6642_p3)
}
  0x47   :  { %42 = dma.hbm_to_vmem [thread:$0]  %s7830_s2, 2048, %s6879_s19, [#allocation6], %s6746_s16, %s6746_s16, %s6747_s17  }
  0x48   :  { %s6750_s26 = smov [#allocation10]   ;;  %s6751_s28 = smov [#allocation13]  }
  0x49   :  { %s62_s27 = sshll.u32 %s6750_s26, 4  ;;  %s88_s7 = sshll.u32 %s6751_s28, 4  ;;  %s63_s27 = int_to_ptr.vmem [resolvable:$true] %s62_s27  ;;  %s6916_s7 = int_to_ptr.vmem [resolvable:$true] %s88_s7 }
  0x4a   :  { %s6646_s4 = scalar_lea.hbm %s7833_s5, 1024 }
  0x4b   :  { %p6647_p4 = scmp.ne.s32.totalorder %s7833_s5, %s6646_s4  ;;  %p6650_p5 = scmp.lt.u32.totalorder %s6646_s4, %s7833_s5 }
  0x4d   :  { %p6652_p6 = pnand %p6650_p5, %p6647_p4 }
  0x4f   :  { %6655 = shalt.err (!%p6652_p6)
}
  0x50   :  { %s6656_s2 = scalar_lea.vmem %s63_s27, 1024  ;;  %p6661_p8 = scmp.lt.s32.totalorder %s63_s27, %s63_s27 }
  0x51   :  { %p6657_p7 = scmp.ne.s32.totalorder %s63_s27, %s6656_s2  ;;  %p6662_p9 = scmp.lt.s32.totalorder %s6656_s2, %s6656_s2 }
  0x53   :  { %p6663_p10 = por %p6662_p9, %p6661_p8 }
  0x55   :  { %p6664_p11 = pnand %p6663_p10, %p6657_p7 }
  0x57   :  { %6667 = shalt.err (!%p6664_p11)
}
  0x58   :  { %68 = dma.hbm_to_vmem [thread:$0]  %s7833_s5, 1024, %s63_s27, [#allocation9], %s6746_s16, %s6746_s16, %s6747_s17  }
  0x59   :  { %s6668_s10 = scalar_lea.hbm %s7836_s8, 1024 }
  0x5a   :  { %p6669_p12 = scmp.ne.s32.totalorder %s7836_s8, %s6668_s10  ;;  %p6672_p13 = scmp.lt.u32.totalorder %s6668_s10, %s7836_s8 }
  0x5c   :  { %p6674_p0 = pnand %p6672_p13, %p6669_p12 }
  0x5e   :  { %6677 = shalt.err (!%p6674_p0)
}
  0x5f   :  { %s6678_s14 = scalar_lea.vmem %s6916_s7, 1024  ;;  %p6683_p2 = scmp.lt.s32.totalorder %s6916_s7, %s6916_s7 }
  0x60   :  { %p6679_p1 = scmp.ne.s32.totalorder %s6916_s7, %s6678_s14  ;;  %p6684_p3 = scmp.lt.s32.totalorder %s6678_s14, %s6678_s14 }
  0x62   :  { %p6685_p4 = por %p6684_p3, %p6683_p2 }
  0x64   :  { %p6686_p5 = pnand %p6685_p4, %p6679_p1 }
  0x66   :  { %6689 = shalt.err (!%p6686_p5)
}
  0x67   :  { %94 = dma.hbm_to_vmem [thread:$0]  %s7836_s8, 1024, %s6916_s7, [#allocation12], %s6746_s16, %s6746_s16, %s6747_s17  }
  0x68   :  { %s6752_s4 = smov [#allocation16]   ;;  %s6690_s20 = scalar_lea.hbm %s7839_s11, 2048 }
  0x69   :  { %s114_s21 = sshll.u32 %s6752_s4, 4  ;;  %p6691_p6 = scmp.ne.s32.totalorder %s7839_s11, %s6690_s20  ;;  %s115_s21 = int_to_ptr.vmem [resolvable:$true] %s114_s21 }
  0x6a   :  { %p6694_p7 = scmp.lt.u32.totalorder %s6690_s20, %s7839_s11 }
  0x6c   :  { %p6696_p8 = pnand %p6694_p7, %p6691_p6 }
  0x6e   :  { %6699 = shalt.err (!%p6696_p8)
}
  0x6f   :  { %s6700_s25 = scalar_lea.vmem %s115_s21, 2048  ;;  %p6705_p10 = scmp.lt.s32.totalorder %s115_s21, %s115_s21 }
  0x70   :  { %p6701_p9 = scmp.ne.s32.totalorder %s115_s21, %s6700_s25  ;;  %p6706_p11 = scmp.lt.s32.totalorder %s6700_s25, %s6700_s25 }
  0x72   :  { %p6707_p12 = por %p6706_p11, %p6705_p10 }
  0x74   :  { %p6708_p13 = pnand %p6707_p12, %p6701_p9 }
  0x76   :  { %6711 = shalt.err (!%p6708_p13)
}
  0x77   :  { %120 = dma.hbm_to_vmem [thread:$0]  %s7839_s11, 2048, %s115_s21, [#allocation15], %s6746_s16, %s6746_s16, %s6747_s17  }
  0x78   :  { %6734 = dma.done.wait [#allocation6], 2048  }
  0x79   :  { %6735 = vsyncadd [#allocation6], 4294965248 }
  0x7a   :  { %6736 = dma.done.wait [#allocation9], 3072  }
  0x7b   :  { %6737 = vsyncadd [#allocation9], 4294964224 }
  0x7c   :  { %6738 = dma.done.wait [#allocation12], 2048  }
  0x7d   :  { %6739 = vsyncadd [#allocation12], 4294965248 }
  0x7e   :  { %6740 = dma.done.wait [#allocation15], 3072  }
  0x7f   :  { %6741 = vsyncadd [#allocation15], 4294964224  ;;  %v6753_v1 = vmov 0.0   ;;  %v6754_v2 = vmov 0   ;;  %v186_v3 = vld [vmem:[#allocation5 + $0x8] sm:$0xff]  ;;  %v188_v4 = vld [vmem:[#allocation5 + $0x18] sm:$0xff]  ;;  %v156_v28 = vlaneseq }
  0x80   :  { %269 = vmatprep.mubr.f32.mxu0 %v6753_v1  ;;  %6204 = vset.pattern.permute.xlu0 %v6754_v2  ;;  %v185_v5 = vld [vmem:[#allocation5] sm:$0xff]  ;;  %v6970_v6 = vpack.c.bf16 %v188_v4, %v186_v3  ;;  %v187_v7 = vld [vmem:[#allocation5 + $0x10] sm:$0xff]  ;;  %v190_v8 = vld [vmem:[#allocation5 + $0x28] sm:$0xff]  ;;  %v6755_v43 = vmov 1966171168   ;;  %vm201_vm0 = vcmask 523264  }
  0x81   :  { %414 = vmatprep.mubr.f32.mxu1 %v6753_v1  ;;  %6205 = vset.pattern.permute.xlu1 %v6754_v2  ;;  %v192_v9 = vld [vmem:[#allocation5 + $0x38] sm:$0xff]  ;;  %v6972_v10 = vpack.c.bf16 %v187_v7, %v185_v5  ;;  %v189_v12 = vld [vmem:[#allocation5 + $0x20] sm:$0xff]  ;;  %v191_v13 = vld [vmem:[#allocation5 + $0x30] sm:$0xff]  ;;  %v157_v29 = vshrl.u32 %v156_v28, 7  ;;  %v280_v44 = vunpack.c.l.s4 %v6755_v43  ;;  %vm347_vm1 = vcmask 261120   ;;  %s6758_s11 = smov [#allocation17]  }
  0x82   :  { %v6974_v11 = vpack.c.bf16 %v192_v9, %v190_v8  ;;  %v194_v14 = vld [vmem:[#allocation5 + $0x48] sm:$0xff]  ;;  %5574 = vmatprep.subr.bf16.mxu0 %v6970_v6  ;;  %v196_v15 = vld [vmem:[#allocation5 + $0x58] sm:$0xff]  ;;  %v6978_v16 = vpack.c.bf16 %v191_v13, %v189_v12  ;;  %v193_v18 = vld [vmem:[#allocation5 + $0x40] sm:$0xff]  ;;  %vm3057_vm2 = vcmask 516096   ;;  %vm6757_vm3 = vmmov 0   ;;  %s5451_s16 = sshll.u32 %s6758_s11, 4  ;;  %s5452_s16 = int_to_ptr.vmem [resolvable:$true] %s5451_s16 }
  0x83   :  { %5576 = vmatpush1.bf16.msra.mxu0 %v6972_v10  ;;  %v6981_v17 = vpack.c.bf16 %v196_v15, %v194_v14  ;;  %v195_v19 = vld [vmem:[#allocation5 + $0x50] sm:$0xff]  ;;  %v148_v20 = vld [vmem:[%s7828_s0] sm:$0xff]  ;;  %v200_v22 = vld [vmem:[#allocation5 + $0x78] sm:$0xff]  ;;  %v7008_v30 = vsub.s32 0, %v157_v29  ;;  %v7010_v31 = vsub.s32 1, %v157_v29  ;;  %v281_v45 = vunpack.c.0.s8 %v280_v44  ;;  %s6712_s0 = scalar_lea.vmem %s5452_s16, 16  ;;  %p6717_p1 = scmp.lt.s32.totalorder %s5452_s16, %s5452_s16 }
  0x84   :  { %5578 = vmatprep.subr.bf16.mxu0 %v6974_v11  ;;  %v198_v21 = vld [vmem:[#allocation5 + $0x68] sm:$0xff]  ;;  %152 = vperm.xlu0 %6204, %v148_v20   ;;  %v6987_v23 = vpack.c.bf16 %v195_v19, %v193_v18  ;;  %v197_v25 = vld [vmem:[#allocation5 + $0x60] sm:$0xff]  ;;  %v199_v26 = vld [vmem:[#allocation5 + $0x70] sm:$0xff]  ;;  %vm5443_vm4 = vcmask 57344   ;;  %p6713_p0 = scmp.ne.s32.totalorder %s5452_s16, %s6712_s0  ;;  %s6716_s17 = scalar_lea.vmem %s5452_s16, 32 }
  0x85   :  { %v6990_v24 = vpack.c.bf16 %v200_v22, %v198_v21  ;;  %v6993_v27 = vpack.c.bf16 %v199_v26, %v197_v25  ;;  %v149_v32 = vld [vmem:[%s7829_s1] sm:$0x3]  ;;  %v7022_v46 = vsub.s32 %v281_v45, %v157_v29  ;;  %s6756_s1 = smov 64   ;;  %v342_v63 = vld [vmem:[#allocation10 + $0x18] sm:$0xff]  ;;  %v341_v3 = vld [vmem:[#allocation10 + $0x10] sm:$0xff]  ;;  %p6718_p2 = scmp.lt.s32.totalorder %s6716_s17, %s6712_s0 }
  0x86   :  { %v168_v33 = vld [vmem:[%s7831_s3] sm:$0x3]  ;;  %v159_v34 = vrot.slane %v149_v32, %v7008_v30  ;;  %v163_v35 = vrot.slane %v149_v32, %v7010_v31  ;;  %v346_v5 = vld [vmem:[#allocation10 + $0x38] sm:$0xff]  ;;  %v345_v12 = vld [vmem:[#allocation10 + $0x30] sm:$0xff] }
  0x87   :  { %5580 = vmatpush1.bf16.msra.mxu0 %v6978_v16  ;;  %v173_v36 = vrot.slane %v168_v33, %v7008_v30  ;;  %v177_v37 = vrot.slane %v168_v33, %v7010_v31  ;;  %v340_v62 = vld [vmem:[#allocation10 + $0x8] sm:$0xff]  ;;  %v339_v0 = vld [vmem:[#allocation10] sm:$0xff]  ;;  %v326_v14 = vld [vmem:[#allocation8 + $0x18] sm:$0xff]  ;;  %p6719_p3 = por %p6718_p2, %p6717_p1 }
  0x88   :  { %5582 = vmatprep.subr.bf16.mxu0 %v6981_v17  ;;  %v7031_v2 = vpack.c.bf16 %v342_v63, %v340_v62  ;;  %v344_v4 = vld [vmem:[#allocation10 + $0x28] sm:$0xff]  ;;  %v7033_v7 = vpack.c.bf16 %v341_v3, %v339_v0  ;;  %v343_v9 = vld [vmem:[#allocation10 + $0x20] sm:$0xff]  ;;  %v325_v20 = vld [vmem:[#allocation8 + $0x10] sm:$0xff] }
  0x89   :  { %v7035_v8 = vpack.c.bf16 %v346_v5, %v344_v4  ;;  %v324_v13 = vld [vmem:[#allocation8 + $0x8] sm:$0xff]  ;;  %v7039_v15 = vpack.c.bf16 %v345_v12, %v343_v9  ;;  %v323_v19 = vld [vmem:[#allocation8] sm:$0xff]  ;;  %v330_v22 = vld [vmem:[#allocation8 + $0x38] sm:$0xff]  ;;  %p6720_p4 = pnand %p6719_p3, %p6713_p0 }
  0x8a   :  { %5590 = vmatprep.subr.bf16.mxu1 %v7031_v2  ;;  %v7042_v18 = vpack.c.bf16 %v326_v14, %v324_v13  ;;  %v328_v21 = vld [vmem:[#allocation8 + $0x28] sm:$0xff]  ;;  %v7045_v25 = vpack.c.bf16 %v325_v20, %v323_v19  ;;  %v327_v28 = vld [vmem:[#allocation8 + $0x20] sm:$0xff]  ;;  %v329_v29 = vld [vmem:[#allocation8 + $0x30] sm:$0xff] }
  0x8b   :  { %5584 = vmatpush1.bf16.msra.mxu0 %v6987_v23  ;;  %5592 = vmatpush1.bf16.msra.mxu1 %v7033_v7  ;;  %v7048_v26 = vpack.c.bf16 %v330_v22, %v328_v21  ;;  %v332_v32 = vld [vmem:[#allocation8 + $0x48] sm:$0xff]  ;;  %v334_v33 = vld [vmem:[#allocation8 + $0x58] sm:$0xff]  ;;  %v337_v43 = vld [vmem:[#allocation8 + $0x70] sm:$0xff] }
  0x8c   :  { %5586 = vmatprep.subr.bf16.mxu0 %v6990_v24  ;;  %5594 = vmatprep.subr.bf16.mxu1 %v7035_v8 }
  0x8f   :  { %5588 = vmatpush1.bf16.msra.mxu0 %v6993_v27  ;;  %5596 = vmatpush1.bf16.msra.mxu1 %v7039_v15 }
  0x90   :  { %5614 = vmatprep.subr.bf16.mxu0 %v6970_v6  ;;  %5598 = vmatprep.subr.bf16.mxu1 %v7042_v18 }
  0x92   :  { %270 = vmatmul.mubr.f32.vlgmr.msra.gmra.mrb[0].mxu0 %v6753_v1  ;;  %415 = vmatmul.mubr.f32.vlgmr.msra.gmra.mrb[0].mxu1 %v6753_v1 }
  0x93   :  { %5616 = vmatpush1.bf16.msra.mxu0 %v6972_v10  ;;  %605 = vmatprep.mubr.f32.mxu0 %v6753_v1 }
  0x94   :  { %5618 = vmatprep.subr.bf16.mxu0 %v6974_v11  ;;  %5600 = vmatpush1.bf16.msra.mxu1 %v7045_v25 }
  0x95   :  { %488 = vmatprep.mubr.f32.mxu1 %v6753_v1  ;;  %5602 = vmatprep.subr.bf16.mxu1 %v7048_v26 }
  0x97   :  { %5620 = vmatpush1.bf16.msra.mxu0 %v6978_v16 }
  0x98   :  { %5622 = vmatprep.subr.bf16.mxu0 %v6981_v17 }
  0x9b   :  { %5624 = vmatpush1.bf16.msra.mxu0 %v6987_v23 }
  0x9c   :  { %5626 = vmatprep.subr.bf16.mxu0 %v6990_v24 }
  0x9f   :  { %5628 = vmatpush1.bf16.msra.mxu0 %v6993_v27 }
  0xa0   :  { %5654 = vmatprep.subr.bf16.mxu0 %v6970_v6 }
 0x103   :  { %v153_v38 = vpop.permute.xlu0 %152 }
 0x104   :  { %v166_v39 = vmul.f32 %v159_v34, %v153_v38  ;;  %v167_v40 = vmul.f32 %v163_v35, %v153_v38  ;;  %v7052_v34 = vpack.c.bf16 %v329_v29, %v327_v28  ;;  %v7056_v35 = vpack.c.bf16 %v334_v33, %v332_v32  ;;  %v336_v38 = vld [vmem:[#allocation8 + $0x68] sm:$0xff] }
 0x106   :  { %v180_v41 = vadd.f32 %v173_v36, %v166_v39  ;;  %v181_v42 = vadd.f32 %v177_v37, %v167_v40  ;;  %v331_v36 = vld [vmem:[#allocation8 + $0x40] sm:$0xff]  ;;  %v333_v37 = vld [vmem:[#allocation8 + $0x50] sm:$0xff]  ;;  %v338_v39 = vld [vmem:[#allocation8 + $0x78] sm:$0xff]  ;;  %5604 = vmatpush1.bf16.msra.mxu1 %v7052_v34 }
 0x107   :  { %v7059_v40 = vpack.c.bf16 %v333_v37, %v331_v36  ;;  %5606 = vmatprep.subr.bf16.mxu1 %v7056_v35 }
 0x108   :  { %182 = vst [vmem:[#allocation2] sm:$0xff] %v180_v41  ;;  %183 = vst [vmem:[#allocation2 + $0x8] sm:$0xff] %v181_v42  ;;  %v7062_v41 = vpack.c.bf16 %v338_v39, %v336_v38  ;;  %v335_v42 = vld [vmem:[#allocation8 + $0x60] sm:$0xff] }
 0x109   :  { %v7065_v44 = vpack.c.bf16 %v337_v43, %v335_v42 }
 0x10a   :  { %5608 = vmatpush1.bf16.msra.mxu1 %v7059_v40 }
 0x10b   :  { %5610 = vmatprep.subr.bf16.mxu1 %v7062_v41 }
 0x10e   :  { %5612 = vmatpush1.bf16.msra.mxu1 %v7065_v44 }
 0x10f   :  { %v184_v51 = vld [vmem:[#allocation2] ss:$8 sm:$0x3]  ;;  %5630 = vmatprep.subr.bf16.mxu1 %v7031_v2  ;;  %v540_v63 = vld [vmem:[#allocation2 + $0x1] ss:$8 sm:$0x3] }
 0x165   :  { %v271_v47 = vpop.f32.mrb[0].mxu0 }
 0x166   :  { %v273_v48 = vpop.f32.mrb[1].mxu0 }
 0x167   :  { %v278_v49 = vcombine.low %v271_v47, %v273_v48 }
 0x169   :  { %v285_v50 = vrot.slane %v278_v49, %v7022_v46 }
 0x16b   :  { %v292_v52 = vrot.slane %v285_v50, %v7022_v46 }
 0x16d   :  { %v294_v53 = vadd.f32 %v292_v52, %v184_v51 }
 0x16f   :  { %302 = vrot.lane.b32.xlu0 %v294_v53, %s6756_s1  ;;  %v5463_v54 = vmul.f32 -1.442695, %v294_v53  ;;  %v495_v53 = vld [vmem:[%s7834_s6] sm:$0x3] }
 0x170   :  { %v7104_v4 = vrot.slane %v495_v53, %v7008_v30 }
 0x171   :  { %6206 = vpow2.f32 %v5463_v54  ;;  %v7096_v54 = vrot.slane %v495_v53, %v7010_v31 }
 0x17b   :  { %v6207_v55 = vpop.eup %6206 }
 0x17c   :  { %v298_v56 = vadd.f32 1.0, %v6207_v55 }
 0x17e   :  { %6208 = vrcp.f32 %v298_v56 }
 0x188   :  { %v7027_v59 = vpop.eup %6208 }
 0x189   :  { %v307_v45 = vmul.f32 0.0, %v7027_v59  ;;  %v316_v50 = vrot.slane %v7027_v59, 1 }
 0x1e1   :  { %v303_v57 = vpop.permute.xlu0 %302 }
 0x1e2   :  { %v304_v58 = vrot.slane %v303_v57, 1 }
 0x1e4   :  { %6210 = vtanh.f32 %v304_v58 }
 0x1ee   :  { %v6211_v60 = vpop.eup %6210 }
 0x1ef   :  { %v308_v61 = vmul.f32 %v6211_v60, %v7027_v59 }
 0x1f1   :  { %310 = vrot.lane.b32.xlu1 %v308_v61, %s6756_s1 }
 0x263   :  { %v311_v47 = vpop.permute.xlu1 %310 }
 0x264   :  { %v7071_v48 = vadd.f32 %v311_v47, %v307_v45 }
 0x266   :  { %6212 = vtanh.f32 %v7071_v48 }
 0x270   :  { %v6213_v49 = vpop.eup %6212 }
 0x271   :  { %319 = vrot.lane.b32.xlu1 %v6213_v49, %s6756_s1 }
 0x2e3   :  { %v320_v51 = vpop.permute.xlu1 %319 }
 0x2e4   :  { %v322_v52 = vmul.f32 %v320_v51, %v316_v50 }
 0x2e6   :  { %5464 = vmatmul.mubr.msk.f32.vlgmr.msra.gmra.mrb[0].mxu1 %vm201_vm0, %v322_v52  ;;  %5467 = vmatmul.mubr.msk.f32.vlgmr.msra.gmra.mrb[2].mxu0 %vm201_vm0, %v322_v52 }
 0x2e7   :  { %5632 = vmatpush1.bf16.msra.mxu1 %v7033_v7  ;;  %5656 = vmatpush1.bf16.msra.mxu0 %v6972_v10 }
 0x2e8   :  { %5634 = vmatprep.subr.bf16.mxu1 %v7035_v8  ;;  %5658 = vmatprep.subr.bf16.mxu0 %v6974_v11 }
 0x2e9   :  { %726 = vmatprep.mubr.f32.mxu1 %v6753_v1  ;;  %905 = vmatprep.mubr.f32.mxu0 %v6753_v1 }
 0x2eb   :  { %5636 = vmatpush1.bf16.msra.mxu1 %v7039_v15  ;;  %5660 = vmatpush1.bf16.msra.mxu0 %v6978_v16 }
 0x2ec   :  { %5638 = vmatprep.subr.bf16.mxu1 %v7042_v18  ;;  %5662 = vmatprep.subr.bf16.mxu0 %v6981_v17 }
 0x2ef   :  { %5664 = vmatpush1.bf16.msra.mxu0 %v6987_v23 }
 0x2f0   :  { %5666 = vmatprep.subr.bf16.mxu0 %v6990_v24 }
 0x2f3   :  { %5668 = vmatpush1.bf16.msra.mxu0 %v6993_v27 }
 0x2f4   :  { %5670 = vmatprep.subr.bf16.mxu0 %v7031_v2 }
 0x3b9   :  { %v490_v55 = vpop.f32.mrb[0].mxu1  ;;  %v607_v56 = vpop.f32.mrb[2].mxu0 }
 0x3ba   :  { %v492_v57 = vpop.f32.mrb[1].mxu1  ;;  %v609_v58 = vpop.f32.mrb[3].mxu0  ;;  %v507_v5 = vadd.f32 %v7104_v4, %v490_v55 }
 0x3bb   :  { %v508_v59 = vadd.f32 %v7096_v54, %v492_v57  ;;  %v614_v60 = vcombine.low %v607_v56, %v609_v58 }
 0x3bc   :  { %v5465_v9 = vmul.f32 -1.442695, %v507_v5 }
 0x3bd   :  { %6214 = vtanh.f32 %v508_v59  ;;  %v621_v61 = vrot.slane %v614_v60, %v7022_v46  ;;  %v5466_v51 = vmul.f32 -1.442695, %v508_v59 }
 0x3be   :  { %6216 = vpow2.f32 %v5465_v9 }
 0x3bf   :  { %v628_v62 = vrot.slane %v621_v61, %v7022_v46 }
 0x3c1   :  { %v630_v0 = vadd.f32 %v628_v62, %v540_v63 }
 0x3c3   :  { %638 = vrot.lane.b32.xlu1 %v630_v0, %s6756_s1  ;;  %v5468_v12 = vmul.f32 -1.442695, %v630_v0 }
 0x3c5   :  { %6218 = vpow2.f32 %v5468_v12 }
 0x3c7   :  { %v6215_v3 = vpop.eup %6214 }
 0x3c8   :  { %524 = vrot.lane.b32.xlu0 %v6215_v3, %s6756_s1  ;;  %v6217_v13 = vpop.eup %6216  ;;  %v840_v3 = vld [vmem:[#allocation2 + $0x2] ss:$8 sm:$0x3] }
 0x3c9   :  { %v515_v14 = vadd.f32 1.0, %v6217_v13 }
 0x3cb   :  { %6220 = vrcp.f32 %v515_v14 }
 0x3cf   :  { %v6219_v19 = vpop.eup %6218 }
 0x3d0   :  { %v634_v20 = vadd.f32 1.0, %v6219_v19 }
 0x3d2   :  { %6222 = vrcp.f32 %v634_v20 }
 0x3d5   :  { %v6221_v28 = vpop.eup %6220 }
 0x3d6   :  { %v522_v38 = vmul.f32 0.0, %v6221_v28 }
 0x3dc   :  { %v6223_v33 = vpop.eup %6222 }
 0x3dd   :  { %v643_v43 = vmul.f32 %v6223_v33, %v7071_v48  ;;  %v652_v57 = vrot.slane %v6223_v33, 1 }
 0x435   :  { %v639_v21 = vpop.permute.xlu1 %638 }
 0x436   :  { %v640_v22 = vrot.slane %v639_v21, 1 }
 0x438   :  { %6224 = vtanh.f32 %v640_v22 }
 0x43a   :  { %v525_v29 = vpop.permute.xlu0 %524 }
 0x43b   :  { %v527_v32 = vmul.f32 %v6221_v28, %v525_v29 }
 0x43d   :  { %529 = vrot.lane.b32.xlu0 %v527_v32, %s6756_s1 }
 0x442   :  { %v6225_v36 = vpop.eup %6224 }
 0x443   :  { %v644_v37 = vmul.f32 %v6225_v36, %v6223_v33 }
 0x445   :  { %646 = vrot.lane.b32.xlu1 %v644_v37, %s6756_s1 }
 0x4af   :  { %v530_v39 = vpop.permute.xlu0 %529 }
 0x4b0   :  { %v7109_v42 = vadd.f32 %v530_v39, %v522_v38 }
 0x4b2   :  { %6226 = vtanh.f32 %v7109_v42 }
 0x4b7   :  { %v647_v45 = vpop.permute.xlu1 %646 }
 0x4b8   :  { %v7113_v47 = vadd.f32 %v647_v45, %v643_v43 }
 0x4ba   :  { %6228 = vtanh.f32 %v7113_v47 }
 0x4bb   :  { %6230 = vpow2.f32 %v5466_v51 }
 0x4bc   :  { %v6227_v49 = vpop.eup %6226 }
 0x4bd   :  { %535 = vrot.lane.b32.xlu0 %v6227_v49, %s6756_s1 }
 0x4c4   :  { %v6229_v50 = vpop.eup %6228 }
 0x4c5   :  { %655 = vrot.lane.b32.xlu1 %v6229_v50, %s6756_s1  ;;  %v6231_v52 = vpop.eup %6230 }
 0x4c6   :  { %v516_v53 = vadd.f32 1.0, %v6231_v52 }
 0x4c8   :  { %6232 = vrcp.f32 %v516_v53 }
 0x4d2   :  { %v6233_v55 = vpop.eup %6232 }
 0x52f   :  { %v536_v56 = vpop.permute.xlu0 %535 }
 0x530   :  { %v538_v48 = vmul.f32 %v6233_v55, %v536_v56 }
 0x532   :  { %5469 = vmatmul.mubr.msk.f32.vlgmr.msra.gmra.mrb[2].mxu1 %vm347_vm1, %v538_v48 }
 0x533   :  { %5640 = vmatpush1.bf16.msra.mxu1 %v7045_v25  ;;  %800 = vmatprep.mubr.f32.mxu1 %v6753_v1 }
 0x534   :  { %5642 = vmatprep.subr.bf16.mxu1 %v7048_v26 }
 0x537   :  { %5644 = vmatpush1.bf16.msra.mxu1 %v7052_v34  ;;  %v656_v58 = vpop.permute.xlu1 %655 }
 0x538   :  { %v658_v59 = vmul.f32 %v656_v58, %v652_v57  ;;  %5646 = vmatprep.subr.bf16.mxu1 %v7056_v35 }
 0x53a   :  { %5473 = vmatmul.mubr.msk.f32.vlgmr.msra.gmra.mrb[4].mxu0 %vm201_vm0, %v658_v59 }
 0x53b   :  { %5648 = vmatpush1.bf16.msra.mxu1 %v7059_v40  ;;  %5672 = vmatpush1.bf16.msra.mxu0 %v7033_v7 }
 0x53c   :  { %5650 = vmatprep.subr.bf16.mxu1 %v7062_v41  ;;  %5674 = vmatprep.subr.bf16.mxu0 %v7035_v8 }
 0x53d   :  { %1026 = vmatprep.mubr.f32.mxu0 %v6753_v1 }
 0x53f   :  { %5652 = vmatpush1.bf16.msra.mxu1 %v7065_v44  ;;  %5676 = vmatpush1.bf16.msra.mxu0 %v7039_v15 }
 0x540   :  { %5694 = vmatprep.subr.bf16.mxu1 %v6970_v6  ;;  %5678 = vmatprep.subr.bf16.mxu0 %v7042_v18 }
 0x542   :  { %5470 = vmatmul.mubr.msk.f32.vlgmr.msra.gmra.mrb[2].mxu1 %vm201_vm0, %v658_v59 }
 0x543   :  { %5696 = vmatpush1.bf16.msra.mxu1 %v6972_v10  ;;  %1205 = vmatprep.mubr.f32.mxu1 %v6753_v1 }
 0x544   :  { %5698 = vmatprep.subr.bf16.mxu1 %v6974_v11 }
 0x547   :  { %5700 = vmatpush1.bf16.msra.mxu1 %v6978_v16 }
 0x548   :  { %5702 = vmatprep.subr.bf16.mxu1 %v6981_v17 }
 0x54b   :  { %5704 = vmatpush1.bf16.msra.mxu1 %v6987_v23 }
 0x54c   :  { %5706 = vmatprep.subr.bf16.mxu1 %v6990_v24 }
 0x54f   :  { %5708 = vmatpush1.bf16.msra.mxu1 %v6993_v27 }
 0x550   :  { %5710 = vmatprep.subr.bf16.mxu1 %v7031_v2 }
 0x60d   :  { %v907_v60 = vpop.f32.mrb[4].mxu0 }
 0x60e   :  { %v909_v61 = vpop.f32.mrb[5].mxu0 }
 0x60f   :  { %v914_v62 = vcombine.low %v907_v60, %v909_v61 }
 0x611   :  { %v921_v63 = vrot.slane %v914_v62, %v7022_v46 }
 0x613   :  { %v928_v0 = vrot.slane %v921_v63, %v7022_v46 }
 0x615   :  { %v802_v5 = vpop.f32.mrb[2].mxu1  ;;  %v930_v9 = vadd.f32 %v928_v0, %v840_v3 }
 0x616   :  { %v804_v12 = vpop.f32.mrb[3].mxu1  ;;  %v807_v19 = vadd.f32 %v802_v5, %v7104_v4 }
 0x617   :  { %v808_v13 = vadd.f32 %v804_v12, %v7096_v54  ;;  %938 = vrot.lane.b32.xlu1 %v930_v9, %s6756_s1  ;;  %v5474_v21 = vmul.f32 -1.442695, %v930_v9 }
 0x618   :  { %v5471_v20 = vmul.f32 -1.442695, %v807_v19 }
 0x619   :  { %6234 = vtanh.f32 %v808_v13  ;;  %v5472_v58 = vmul.f32 -1.442695, %v808_v13 }
 0x61a   :  { %6236 = vpow2.f32 %v5471_v20 }
 0x61b   :  { %6238 = vpow2.f32 %v5474_v21 }
 0x623   :  { %v6235_v14 = vpop.eup %6234 }
 0x624   :  { %824 = vrot.lane.b32.xlu0 %v6235_v14, %s6756_s1  ;;  %v6237_v22 = vpop.eup %6236  ;;  %v1140_v14 = vld [vmem:[#allocation2 + $0x3] ss:$8 sm:$0x3] }
 0x625   :  { %v6239_v28 = vpop.eup %6238  ;;  %v815_v29 = vadd.f32 1.0, %v6237_v22 }
 0x626   :  { %v934_v32 = vadd.f32 1.0, %v6239_v28 }
 0x627   :  { %6240 = vrcp.f32 %v815_v29 }
 0x628   :  { %6242 = vrcp.f32 %v934_v32 }
 0x631   :  { %v6241_v37 = vpop.eup %6240 }
 0x632   :  { %v6243_v38 = vpop.eup %6242  ;;  %v822_v50 = vmul.f32 %v6241_v37, %v7109_v42 }
 0x633   :  { %v943_v51 = vmul.f32 %v6243_v38, %v7113_v47  ;;  %v952_v61 = vrot.slane %v6243_v38, 1 }
 0x689   :  { %v939_v33 = vpop.permute.xlu1 %938 }
 0x68a   :  { %v940_v36 = vrot.slane %v939_v33, 1 }
 0x68c   :  { %6244 = vtanh.f32 %v940_v36 }
 0x696   :  { %v6245_v39 = vpop.eup %6244  ;;  %v825_v43 = vpop.permute.xlu0 %824 }
 0x697   :  { %v827_v45 = vmul.f32 %v6241_v37, %v825_v43  ;;  %v944_v49 = vmul.f32 %v6245_v39, %v6243_v38 }
 0x699   :  { %829 = vrot.lane.b32.xlu0 %v827_v45, %s6756_s1  ;;  %946 = vrot.lane.b32.xlu1 %v944_v49, %s6756_s1 }
 0x70b   :  { %v830_v52 = vpop.permute.xlu0 %829  ;;  %v947_v53 = vpop.permute.xlu1 %946 }
 0x70c   :  { %v7154_v55 = vadd.f32 %v830_v52, %v822_v50  ;;  %v7156_v56 = vadd.f32 %v947_v53, %v943_v51 }
 0x70e   :  { %6246 = vtanh.f32 %v7154_v55 }
 0x70f   :  { %6248 = vtanh.f32 %v7156_v56 }
 0x710   :  { %6250 = vpow2.f32 %v5472_v58 }
 0x718   :  { %v6247_v48 = vpop.eup %6246 }
 0x719   :  { %v6249_v57 = vpop.eup %6248  ;;  %835 = vrot.lane.b32.xlu0 %v6247_v48, %s6756_s1 }
 0x71a   :  { %955 = vrot.lane.b32.xlu1 %v6249_v57, %s6756_s1  ;;  %v6251_v42 = vpop.eup %6250 }
 0x71b   :  { %v816_v47 = vadd.f32 1.0, %v6251_v42 }
 0x71d   :  { %6252 = vrcp.f32 %v816_v47 }
 0x727   :  { %v6253_v59 = vpop.eup %6252 }
 0x78b   :  { %v836_v60 = vpop.permute.xlu0 %835 }
 0x78c   :  { %v838_v62 = vmul.f32 %v6253_v59, %v836_v60  ;;  %v956_v63 = vpop.permute.xlu1 %955 }
 0x78d   :  { %v958_v0 = vmul.f32 %v956_v63, %v952_v61 }
 0x78e   :  { %5475 = vmatmul.mubr.msk.f32.vlgmr.msra.gmra.mrb[6].mxu0 %vm347_vm1, %v838_v62 }
 0x78f   :  { %5680 = vmatpush1.bf16.msra.mxu0 %v7045_v25  ;;  %5479 = vmatmul.mubr.msk.f32.vlgmr.msra.gmra.mrb[4].mxu1 %vm201_vm0, %v958_v0 }
 0x790   :  { %5682 = vmatprep.subr.bf16.mxu0 %v7048_v26  ;;  %1100 = vmatprep.mubr.f32.mxu0 %v6753_v1 }
 0x791   :  { %5712 = vmatpush1.bf16.msra.mxu1 %v7033_v7  ;;  %1326 = vmatprep.mubr.f32.mxu1 %v6753_v1 }
 0x792   :  { %5714 = vmatprep.subr.bf16.mxu1 %v7035_v8 }
 0x793   :  { %5684 = vmatpush1.bf16.msra.mxu0 %v7052_v34 }
 0x794   :  { %5686 = vmatprep.subr.bf16.mxu0 %v7056_v35 }
 0x795   :  { %5716 = vmatpush1.bf16.msra.mxu1 %v7039_v15 }
 0x796   :  { %5718 = vmatprep.subr.bf16.mxu1 %v7042_v18 }
 0x797   :  { %5688 = vmatpush1.bf16.msra.mxu0 %v7059_v40 }
 0x798   :  { %5690 = vmatprep.subr.bf16.mxu0 %v7062_v41 }
 0x79b   :  { %5692 = vmatpush1.bf16.msra.mxu0 %v7065_v44 }
 0x79c   :  { %5734 = vmatprep.subr.bf16.mxu0 %v6970_v6 }
 0x79e   :  { %5476 = vmatmul.mubr.msk.f32.vlgmr.msra.gmra.mrb[6].mxu0 %vm201_vm0, %v958_v0 }
 0x79f   :  { %5736 = vmatpush1.bf16.msra.mxu0 %v6972_v10  ;;  %1505 = vmatprep.mubr.f32.mxu0 %v6753_v1 }
 0x7a0   :  { %5738 = vmatprep.subr.bf16.mxu0 %v6974_v11 }
 0x7a3   :  { %5740 = vmatpush1.bf16.msra.mxu0 %v6978_v16 }
 0x7a4   :  { %5742 = vmatprep.subr.bf16.mxu0 %v6981_v17 }
 0x7a7   :  { %5744 = vmatpush1.bf16.msra.mxu0 %v6987_v23 }
 0x7a8   :  { %5746 = vmatprep.subr.bf16.mxu0 %v6990_v24 }
 0x7ab   :  { %5748 = vmatpush1.bf16.msra.mxu0 %v6993_v27 }
 0x7ac   :  { %5750 = vmatprep.subr.bf16.mxu0 %v7031_v2 }
 0x862   :  { %v1207_v3 = vpop.f32.mrb[4].mxu1 }
 0x863   :  { %v1209_v5 = vpop.f32.mrb[5].mxu1 }
 0x864   :  { %v1214_v9 = vcombine.low %v1207_v3, %v1209_v5 }
 0x866   :  { %v1221_v12 = vrot.slane %v1214_v9, %v7022_v46 }
 0x868   :  { %v1228_v13 = vrot.slane %v1221_v12, %v7022_v46 }
 0x86a   :  { %v1230_v19 = vadd.f32 %v1228_v13, %v1140_v14 }
 0x86c   :  { %1238 = vrot.lane.b32.xlu1 %v1230_v19, %s6756_s1  ;;  %v5480_v29 = vmul.f32 -1.442695, %v1230_v19 }
 0x871   :  { %v1102_v20 = vpop.f32.mrb[6].mxu0 }
 0x872   :  { %v1104_v21 = vpop.f32.mrb[7].mxu0  ;;  %v1107_v32 = vadd.f32 %v1102_v20, %v7104_v4 }
 0x873   :  { %v1108_v22 = vadd.f32 %v1104_v21, %v7096_v54 }
 0x874   :  { %v5477_v33 = vmul.f32 -1.442695, %v1107_v32 }
 0x875   :  { %6254 = vtanh.f32 %v1108_v22  ;;  %v5478_v63 = vmul.f32 -1.442695, %v1108_v22 }
 0x876   :  { %6256 = vpow2.f32 %v5480_v29 }
 0x877   :  { %6258 = vpow2.f32 %v5477_v33 }
 0x87f   :  { %v6255_v28 = vpop.eup %6254 }
 0x880   :  { %1124 = vrot.lane.b32.xlu0 %v6255_v28, %s6756_s1  ;;  %v6257_v36 = vpop.eup %6256  ;;  %v1440_v28 = vld [vmem:[#allocation2 + $0x4] ss:$8 sm:$0x3] }
 0x881   :  { %v1234_v37 = vadd.f32 1.0, %v6257_v36  ;;  %v6259_v43 = vpop.eup %6258 }
 0x882   :  { %v1115_v45 = vadd.f32 1.0, %v6259_v43 }
 0x883   :  { %6260 = vrcp.f32 %v1234_v37 }
 0x88d   :  { %v6261_v49 = vpop.eup %6260 }
 0x88e   :  { %v1243_v57 = vmul.f32 %v6261_v49, %v7156_v56  ;;  %v1252_v3 = vrot.slane %v6261_v49, 1 }
 0x8de   :  { %v1239_v38 = vpop.permute.xlu1 %1238 }
 0x8df   :  { %v1240_v39 = vrot.slane %v1239_v38, 1 }
 0x8e1   :  { %6262 = vtanh.f32 %v1240_v39 }
 0x8e2   :  { %6264 = vrcp.f32 %v1115_v45 }
 0x8eb   :  { %v6263_v50 = vpop.eup %6262 }
 0x8ec   :  { %v1244_v51 = vmul.f32 %v6263_v50, %v6261_v49  ;;  %v6265_v52 = vpop.eup %6264 }
 0x8ed   :  { %v1122_v47 = vmul.f32 %v6265_v52, %v7154_v55 }
 0x8ee   :  { %1246 = vrot.lane.b32.xlu1 %v1244_v51, %s6756_s1 }
 0x8f2   :  { %v1125_v53 = vpop.permute.xlu0 %1124 }
 0x8f3   :  { %v1127_v48 = vmul.f32 %v6265_v52, %v1125_v53 }
 0x8f5   :  { %1129 = vrot.lane.b32.xlu0 %v1127_v48, %s6756_s1 }
 0x960   :  { %v1247_v58 = vpop.permute.xlu1 %1246 }
 0x961   :  { %v7197_v42 = vadd.f32 %v1247_v58, %v1243_v57 }
 0x963   :  { %6266 = vtanh.f32 %v7197_v42 }
 0x967   :  { %v1130_v59 = vpop.permute.xlu0 %1129 }
 0x968   :  { %v7201_v60 = vadd.f32 %v1130_v59, %v1122_v47 }
 0x96a   :  { %6268 = vtanh.f32 %v7201_v60 }
 0x96b   :  { %6270 = vpow2.f32 %v5478_v63 }
 0x96d   :  { %v6267_v61 = vpop.eup %6266 }
 0x96e   :  { %1255 = vrot.lane.b32.xlu1 %v6267_v61, %s6756_s1 }
 0x974   :  { %v6269_v62 = vpop.eup %6268 }
 0x975   :  { %1135 = vrot.lane.b32.xlu0 %v6269_v62, %s6756_s1  ;;  %v6271_v56 = vpop.eup %6270 }
 0x976   :  { %v1116_v0 = vadd.f32 1.0, %v6271_v56 }
 0x978   :  { %6272 = vrcp.f32 %v1116_v0 }
 0x982   :  { %v6273_v55 = vpop.eup %6272 }
 0x9e0   :  { %v1256_v5 = vpop.permute.xlu1 %1255 }
 0x9e1   :  { %v1258_v9 = vmul.f32 %v1256_v5, %v1252_v3 }
 0x9e3   :  { %5485 = vmatmul.mubr.msk.f32.vlgmr.msra.gmra.mrb[8].mxu0 %vm201_vm0, %v1258_v9 }
 0x9e4   :  { %5752 = vmatpush1.bf16.msra.mxu0 %v7033_v7  ;;  %1626 = vmatprep.mubr.f32.mxu0 %v6753_v1 }
 0x9e5   :  { %5754 = vmatprep.subr.bf16.mxu0 %v7035_v8 }
 0x9e7   :  { %v1136_v12 = vpop.permute.xlu0 %1135 }
 0x9e8   :  { %v1138_v13 = vmul.f32 %v6273_v55, %v1136_v12  ;;  %5756 = vmatpush1.bf16.msra.mxu0 %v7039_v15 }
 0x9e9   :  { %5758 = vmatprep.subr.bf16.mxu0 %v7042_v18 }
 0x9ea   :  { %5481 = vmatmul.mubr.msk.f32.vlgmr.msra.gmra.mrb[6].mxu1 %vm347_vm1, %v1138_v13 }
 0x9eb   :  { %5720 = vmatpush1.bf16.msra.mxu1 %v7045_v25  ;;  %1400 = vmatprep.mubr.f32.mxu1 %v6753_v1 }
 0x9ec   :  { %5722 = vmatprep.subr.bf16.mxu1 %v7048_v26 }
 0x9ef   :  { %5724 = vmatpush1.bf16.msra.mxu1 %v7052_v34 }
 0x9f0   :  { %5726 = vmatprep.subr.bf16.mxu1 %v7056_v35 }
 0x9f3   :  { %5728 = vmatpush1.bf16.msra.mxu1 %v7059_v40 }
 0x9f4   :  { %5730 = vmatprep.subr.bf16.mxu1 %v7062_v41 }
 0x9f7   :  { %5732 = vmatpush1.bf16.msra.mxu1 %v7065_v44 }
 0x9f8   :  { %5774 = vmatprep.subr.bf16.mxu1 %v6970_v6 }
 0x9fa   :  { %5482 = vmatmul.mubr.msk.f32.vlgmr.msra.gmra.mrb[6].mxu1 %vm201_vm0, %v1258_v9 }
 0x9fb   :  { %5776 = vmatpush1.bf16.msra.mxu1 %v6972_v10  ;;  %1805 = vmatprep.mubr.f32.mxu1 %v6753_v1 }
 0x9fc   :  { %5778 = vmatprep.subr.bf16.mxu1 %v6974_v11 }
 0x9ff   :  { %5780 = vmatpush1.bf16.msra.mxu1 %v6978_v16 }
 0xa00   :  { %5782 = vmatprep.subr.bf16.mxu1 %v6981_v17 }
 0xa03   :  { %5784 = vmatpush1.bf16.msra.mxu1 %v6987_v23 }
 0xa04   :  { %5786 = vmatprep.subr.bf16.mxu1 %v6990_v24 }
 0xa07   :  { %5788 = vmatpush1.bf16.msra.mxu1 %v6993_v27 }
 0xa08   :  { %5790 = vmatprep.subr.bf16.mxu1 %v7031_v2 }
 0xab6   :  { %v1507_v14 = vpop.f32.mrb[8].mxu0 }
 0xab7   :  { %v1509_v19 = vpop.f32.mrb[9].mxu0 }
 0xab8   :  { %v1514_v20 = vcombine.low %v1507_v14, %v1509_v19 }
 0xaba   :  { %v1521_v21 = vrot.slane %v1514_v20, %v7022_v46 }
 0xabc   :  { %v1528_v22 = vrot.slane %v1521_v21, %v7022_v46 }
 0xabe   :  { %v1530_v29 = vadd.f32 %v1528_v22, %v1440_v28 }
 0xac0   :  { %1538 = vrot.lane.b32.xlu1 %v1530_v29, %s6756_s1  ;;  %v5486_v38 = vmul.f32 -1.442695, %v1530_v29 }
 0xacd   :  { %v1402_v32 = vpop.f32.mrb[6].mxu1 }
 0xace   :  { %v1404_v33 = vpop.f32.mrb[7].mxu1  ;;  %v1407_v39 = vadd.f32 %v1402_v32, %v7104_v4 }
 0xacf   :  { %v1408_v36 = vadd.f32 %v1404_v33, %v7096_v54 }
 0xad0   :  { %v5483_v45 = vmul.f32 -1.442695, %v1407_v39 }
 0xad1   :  { %6274 = vtanh.f32 %v1408_v36  ;;  %v5484_v12 = vmul.f32 -1.442695, %v1408_v36 }
 0xad2   :  { %6276 = vpow2.f32 %v5486_v38 }
 0xad3   :  { %6278 = vpow2.f32 %v5483_v45 }
 0xadb   :  { %v6275_v37 = vpop.eup %6274 }
 0xadc   :  { %1424 = vrot.lane.b32.xlu0 %v6275_v37, %s6756_s1  ;;  %v6277_v43 = vpop.eup %6276  ;;  %v1740_v37 = vld [vmem:[#allocation2 + $0x5] ss:$8 sm:$0x3] }
 0xadd   :  { %v1534_v49 = vadd.f32 1.0, %v6277_v43  ;;  %v6279_v52 = vpop.eup %6278 }
 0xade   :  { %v1415_v57 = vadd.f32 1.0, %v6279_v52 }
 0xadf   :  { %6280 = vrcp.f32 %v1534_v49 }
 0xae9   :  { %v6281_v53 = vpop.eup %6280 }
 0xaea   :  { %v1543_v62 = vmul.f32 %v6281_v53, %v7197_v42  ;;  %v1552_v13 = vrot.slane %v6281_v53, 1 }
 0xb32   :  { %v1539_v50 = vpop.permute.xlu1 %1538 }
 0xb33   :  { %v1540_v51 = vrot.slane %v1539_v50, 1 }
 0xb35   :  { %6282 = vtanh.f32 %v1540_v51 }
 0xb36   :  { %6284 = vrcp.f32 %v1415_v57 }
 0xb3f   :  { %v6283_v48 = vpop.eup %6282 }
 0xb40   :  { %v1544_v58 = vmul.f32 %v6283_v48, %v6281_v53  ;;  %v6285_v47 = vpop.eup %6284 }
 0xb41   :  { %v1422_v3 = vmul.f32 %v6285_v47, %v7201_v60 }
 0xb42   :  { %1546 = vrot.lane.b32.xlu1 %v1544_v58, %s6756_s1 }
 0xb4e   :  { %v1425_v59 = vpop.permute.xlu0 %1424 }
 0xb4f   :  { %v1427_v61 = vmul.f32 %v6285_v47, %v1425_v59 }
 0xb51   :  { %1429 = vrot.lane.b32.xlu0 %v1427_v61, %s6756_s1 }
 0xbb4   :  { %v1547_v63 = vpop.permute.xlu1 %1546 }
 0xbb5   :  { %v7241_v56 = vadd.f32 %v1547_v63, %v1543_v62 }
 0xbb7   :  { %6286 = vtanh.f32 %v7241_v56 }
 0xbc1   :  { %v6287_v0 = vpop.eup %6286 }
 0xbc2   :  { %1555 = vrot.lane.b32.xlu1 %v6287_v0, %s6756_s1 }
 0xbc3   :  { %v1430_v5 = vpop.permute.xlu0 %1429 }
 0xbc4   :  { %v7246_v9 = vadd.f32 %v1430_v5, %v1422_v3 }
 0xbc6   :  { %6288 = vtanh.f32 %v7246_v9 }
 0xbc7   :  { %6290 = vpow2.f32 %v5484_v12 }
 0xbd0   :  { %v6289_v55 = vpop.eup %6288 }
 0xbd1   :  { %1435 = vrot.lane.b32.xlu0 %v6289_v55, %s6756_s1  ;;  %v6291_v42 = vpop.eup %6290 }
 0xbd2   :  { %v1416_v19 = vadd.f32 1.0, %v6291_v42 }
 0xbd4   :  { %6292 = vrcp.f32 %v1416_v19 }
 0xbde   :  { %v6293_v60 = vpop.eup %6292 }
 0xc34   :  { %v1556_v14 = vpop.permute.xlu1 %1555 }
 0xc35   :  { %v1558_v20 = vmul.f32 %v1556_v14, %v1552_v13 }
 0xc37   :  { %5491 = vmatmul.mubr.msk.f32.vlgmr.msra.gmra.mrb[8].mxu1 %vm201_vm0, %v1558_v20 }
 0xc38   :  { %5792 = vmatpush1.bf16.msra.mxu1 %v7033_v7  ;;  %1926 = vmatprep.mubr.f32.mxu1 %v6753_v1 }
 0xc39   :  { %5794 = vmatprep.subr.bf16.mxu1 %v7035_v8 }
 0xc3c   :  { %5796 = vmatpush1.bf16.msra.mxu1 %v7039_v15 }
 0xc3d   :  { %5798 = vmatprep.subr.bf16.mxu1 %v7042_v18 }
 0xc43   :  { %v1436_v21 = vpop.permute.xlu0 %1435 }
 0xc44   :  { %v1438_v22 = vmul.f32 %v6293_v60, %v1436_v21 }
 0xc46   :  { %5487 = vmatmul.mubr.msk.f32.vlgmr.msra.gmra.mrb[10].mxu0 %vm347_vm1, %v1438_v22 }
 0xc47   :  { %5760 = vmatpush1.bf16.msra.mxu0 %v7045_v25  ;;  %1700 = vmatprep.mubr.f32.mxu0 %v6753_v1 }
 0xc48   :  { %5762 = vmatprep.subr.bf16.mxu0 %v7048_v26 }
 0xc4b   :  { %5764 = vmatpush1.bf16.msra.mxu0 %v7052_v34 }
 0xc4c   :  { %5766 = vmatprep.subr.bf16.mxu0 %v7056_v35 }
 0xc4f   :  { %5768 = vmatpush1.bf16.msra.mxu0 %v7059_v40 }
 0xc50   :  { %5770 = vmatprep.subr.bf16.mxu0 %v7062_v41 }
 0xc53   :  { %5772 = vmatpush1.bf16.msra.mxu0 %v7065_v44 }
 0xc54   :  { %5814 = vmatprep.subr.bf16.mxu0 %v6970_v6 }
 0xc56   :  { %5488 = vmatmul.mubr.msk.f32.vlgmr.msra.gmra.mrb[10].mxu0 %vm201_vm0, %v1558_v20 }
 0xc57   :  { %5816 = vmatpush1.bf16.msra.mxu0 %v6972_v10  ;;  %2105 = vmatprep.mubr.f32.mxu0 %v6753_v1 }
 0xc58   :  { %5818 = vmatprep.subr.bf16.mxu0 %v6974_v11 }
 0xc5b   :  { %5820 = vmatpush1.bf16.msra.mxu0 %v6978_v16 }
 0xc5c   :  { %5822 = vmatprep.subr.bf16.mxu0 %v6981_v17 }
 0xc5f   :  { %5824 = vmatpush1.bf16.msra.mxu0 %v6987_v23 }
 0xc60   :  { %5826 = vmatprep.subr.bf16.mxu0 %v6990_v24 }
 0xc63   :  { %5828 = vmatpush1.bf16.msra.mxu0 %v6993_v27 }
 0xc64   :  { %5830 = vmatprep.subr.bf16.mxu0 %v7031_v2 }
 0xd0a   :  { %v1807_v28 = vpop.f32.mrb[8].mxu1 }
 0xd0b   :  { %v1809_v29 = vpop.f32.mrb[9].mxu1 }
 0xd0c   :  { %v1814_v32 = vcombine.low %v1807_v28, %v1809_v29 }
 0xd0e   :  { %v1821_v33 = vrot.slane %v1814_v32, %v7022_v46 }
 0xd10   :  { %v1828_v36 = vrot.slane %v1821_v33, %v7022_v46 }
 0xd12   :  { %v1830_v38 = vadd.f32 %v1828_v36, %v1740_v37 }
 0xd14   :  { %1838 = vrot.lane.b32.xlu1 %v1830_v38, %s6756_s1  ;;  %v5492_v50 = vmul.f32 -1.442695, %v1830_v38 }
 0xd29   :  { %v1702_v39 = vpop.f32.mrb[10].mxu0 }
 0xd2a   :  { %v1704_v43 = vpop.f32.mrb[11].mxu0  ;;  %v1707_v48 = vadd.f32 %v1702_v39, %v7104_v4 }
 0xd2b   :  { %v1708_v45 = vadd.f32 %v1704_v43, %v7096_v54 }
 0xd2c   :  { %v5489_v58 = vmul.f32 -1.442695, %v1707_v48 }
 0xd2d   :  { %6294 = vtanh.f32 %v1708_v45  ;;  %v5490_v21 = vmul.f32 -1.442695, %v1708_v45 }
 0xd2e   :  { %6296 = vpow2.f32 %v5492_v50 }
 0xd37   :  { %v6295_v49 = vpop.eup %6294 }
 0xd38   :  { %1724 = vrot.lane.b32.xlu0 %v6295_v49, %s6756_s1  ;;  %v6297_v51 = vpop.eup %6296 }
 0xd39   :  { %v1834_v52 = vadd.f32 1.0, %v6297_v51 }
 0xd3b   :  { %6298 = vrcp.f32 %v1834_v52 }
 0xd45   :  { %v6299_v47 = vpop.eup %6298 }
 0xd46   :  { %v1843_v55 = vmul.f32 %v6299_v47, %v7241_v56  ;;  %v1852_v56 = vrot.slane %v6299_v47, 1 }
 0xd86   :  { %v1839_v53 = vpop.permute.xlu1 %1838 }
 0xd87   :  { %v1840_v57 = vrot.slane %v1839_v53, 1 }
 0xd89   :  { %6300 = vtanh.f32 %v1840_v57 }
 0xd8a   :  { %6302 = vpow2.f32 %v5489_v58 }
 0xd93   :  { %v6301_v59 = vpop.eup %6300 }
 0xd94   :  { %v1844_v61 = vmul.f32 %v6301_v59, %v6299_v47  ;;  %v6303_v62 = vpop.eup %6302 }
 0xd95   :  { %v1715_v63 = vadd.f32 1.0, %v6303_v62 }
 0xd96   :  { %1846 = vrot.lane.b32.xlu1 %v1844_v61, %s6756_s1 }
 0xd97   :  { %6304 = vrcp.f32 %v1715_v63 }
 0xda1   :  { %v6305_v0 = vpop.eup %6304 }
 0xda2   :  { %v1722_v14 = vmul.f32 %v6305_v0, %v7246_v9 }
 0xdaa   :  { %v1725_v3 = vpop.permute.xlu0 %1724 }
 0xdab   :  { %v1727_v5 = vmul.f32 %v6305_v0, %v1725_v3 }
 0xdad   :  { %1729 = vrot.lane.b32.xlu0 %v1727_v5, %s6756_s1 }
 0xe08   :  { %v1847_v12 = vpop.permute.xlu1 %1846 }
 0xe09   :  { %v7285_v42 = vadd.f32 %v1847_v12, %v1843_v55 }
 0xe0b   :  { %6306 = vtanh.f32 %v7285_v42 }
 0xe15   :  { %v6307_v13 = vpop.eup %6306 }
 0xe16   :  { %1855 = vrot.lane.b32.xlu1 %v6307_v13, %s6756_s1 }
 0xe1f   :  { %v1730_v19 = vpop.permute.xlu0 %1729 }
 0xe20   :  { %v7290_v20 = vadd.f32 %v1730_v19, %v1722_v14 }
 0xe22   :  { %6308 = vtanh.f32 %v7290_v20 }
 0xe23   :  { %6310 = vpow2.f32 %v5490_v21 }
 0xe2c   :  { %v6309_v60 = vpop.eup %6308 }
 0xe2d   :  { %1735 = vrot.lane.b32.xlu0 %v6309_v60, %s6756_s1  ;;  %v6311_v9 = vpop.eup %6310 }
 0xe2e   :  { %v1716_v29 = vadd.f32 1.0, %v6311_v9 }
 0xe30   :  { %6312 = vrcp.f32 %v1716_v29 }
 0xe3a   :  { %v6313_v32 = vpop.eup %6312 }
 0xe88   :  { %v1856_v22 = vpop.permute.xlu1 %1855 }
 0xe89   :  { %v1858_v28 = vmul.f32 %v1856_v22, %v1852_v56 }
 0xe8b   :  { %5497 = vmatmul.mubr.msk.f32.vlgmr.msra.gmra.mrb[12].mxu0 %vm201_vm0, %v1858_v28 }
 0xe8c   :  { %5832 = vmatpush1.bf16.msra.mxu0 %v7033_v7  ;;  %2226 = vmatprep.mubr.f32.mxu0 %v6753_v1 }
 0xe8d   :  { %5834 = vmatprep.subr.bf16.mxu0 %v7035_v8 }
 0xe90   :  { %5836 = vmatpush1.bf16.msra.mxu0 %v7039_v15 }
 0xe91   :  { %5838 = vmatprep.subr.bf16.mxu0 %v7042_v18 }
 0xe9f   :  { %v1736_v33 = vpop.permute.xlu0 %1735 }
 0xea0   :  { %v1738_v36 = vmul.f32 %v6313_v32, %v1736_v33  ;;  %v2340_v32 = vld [vmem:[#allocation2 + $0x7] ss:$8 sm:$0x3] }
 0xea2   :  { %5493 = vmatmul.mubr.msk.f32.vlgmr.msra.gmra.mrb[10].mxu1 %vm347_vm1, %v1738_v36 }
 0xea3   :  { %5800 = vmatpush1.bf16.msra.mxu1 %v7045_v25  ;;  %2000 = vmatprep.mubr.f32.mxu1 %v6753_v1 }
 0xea4   :  { %5802 = vmatprep.subr.bf16.mxu1 %v7048_v26 }
 0xea7   :  { %5804 = vmatpush1.bf16.msra.mxu1 %v7052_v34 }
 0xea8   :  { %5806 = vmatprep.subr.bf16.mxu1 %v7056_v35 }
 0xeab   :  { %5808 = vmatpush1.bf16.msra.mxu1 %v7059_v40 }
 0xeac   :  { %5810 = vmatprep.subr.bf16.mxu1 %v7062_v41 }
 0xeaf   :  { %5812 = vmatpush1.bf16.msra.mxu1 %v7065_v44 }
 0xeb0   :  { %5854 = vmatprep.subr.bf16.mxu1 %v6970_v6 }
 0xeb2   :  { %5494 = vmatmul.mubr.msk.f32.vlgmr.msra.gmra.mrb[10].mxu1 %vm201_vm0, %v1858_v28 }
 0xeb3   :  { %5856 = vmatpush1.bf16.msra.mxu1 %v6972_v10  ;;  %2405 = vmatprep.mubr.f32.mxu1 %v6753_v1 }
 0xeb4   :  { %5858 = vmatprep.subr.bf16.mxu1 %v6974_v11  ;;  %v2040_v11 = vld [vmem:[#allocation2 + $0x6] ss:$8 sm:$0x3] }
 0xeb7   :  { %5860 = vmatpush1.bf16.msra.mxu1 %v6978_v16 }
 0xeb8   :  { %5862 = vmatprep.subr.bf16.mxu1 %v6981_v17 }
 0xebb   :  { %5864 = vmatpush1.bf16.msra.mxu1 %v6987_v23 }
 0xebc   :  { %5866 = vmatprep.subr.bf16.mxu1 %v6990_v24 }
 0xebf   :  { %5868 = vmatpush1.bf16.msra.mxu1 %v6993_v27 }
 0xec0   :  { %5870 = vmatprep.subr.bf16.mxu1 %v7031_v2 }
 0xf5e   :  { %v2107_v6 = vpop.f32.mrb[12].mxu0 }
 0xf5f   :  { %v2109_v37 = vpop.f32.mrb[13].mxu0 }
 0xf60   :  { %v2114_v38 = vcombine.low %v2107_v6, %v2109_v37 }
 0xf62   :  { %v2121_v10 = vrot.slane %v2114_v38, %v7022_v46 }
 0xf64   :  { %v2128_v39 = vrot.slane %v2121_v10, %v7022_v46 }
 0xf66   :  { %v2130_v43 = vadd.f32 %v2128_v39, %v2040_v11 }
 0xf68   :  { %2138 = vrot.lane.b32.xlu1 %v2130_v43, %s6756_s1  ;;  %v5498_v27 = vmul.f32 -1.442695, %v2130_v43 }
 0xf85   :  { %v2002_v16 = vpop.f32.mrb[10].mxu1 }
 0xf86   :  { %v2004_v17 = vpop.f32.mrb[11].mxu1  ;;  %v2007_v51 = vadd.f32 %v2002_v16, %v7104_v4 }
 0xf87   :  { %v2008_v23 = vadd.f32 %v2004_v17, %v7096_v54 }
 0xf88   :  { %v5495_v48 = vmul.f32 -1.442695, %v2007_v51 }
 0xf89   :  { %6314 = vtanh.f32 %v2008_v23 }
 0xf8a   :  { %6316 = vpow2.f32 %v5498_v27 }
 0xf93   :  { %v6315_v24 = vpop.eup %6314 }
 0xf94   :  { %2024 = vrot.lane.b32.xlu0 %v6315_v24, %s6756_s1  ;;  %v6317_v2 = vpop.eup %6316 }
 0xf95   :  { %v2134_v45 = vadd.f32 1.0, %v6317_v2 }
 0xf97   :  { %6318 = vrcp.f32 %v2134_v45 }
 0xfa1   :  { %v6319_v52 = vpop.eup %6318 }
 0xfa2   :  { %v2143_v63 = vmul.f32 %v6319_v52, %v7285_v42  ;;  %v2152_v19 = vrot.slane %v6319_v52, 1  ;;  %v5496_v42 = vmul.f32 -1.442695, %v2008_v23 }
 0xfda   :  { %v2139_v49 = vpop.permute.xlu1 %2138 }
 0xfdb   :  { %v2140_v50 = vrot.slane %v2139_v49, 1 }
 0xfdd   :  { %6320 = vtanh.f32 %v2140_v50 }
 0xfde   :  { %6322 = vpow2.f32 %v5495_v48 }
 0xfe7   :  { %v6321_v53 = vpop.eup %6320 }
 0xfe8   :  { %v2144_v57 = vmul.f32 %v6321_v53, %v6319_v52  ;;  %v6323_v58 = vpop.eup %6322 }
 0xfe9   :  { %v2015_v47 = vadd.f32 1.0, %v6323_v58 }
 0xfea   :  { %2146 = vrot.lane.b32.xlu1 %v2144_v57, %s6756_s1 }
 0xfeb   :  { %6324 = vrcp.f32 %v2015_v47 }
 0xff5   :  { %v6325_v59 = vpop.eup %6324 }
 0xff6   :  { %v2022_v55 = vmul.f32 %v6325_v59, %v7290_v20 }
0x1006   :  { %v2025_v61 = vpop.permute.xlu0 %2024 }
0x1007   :  { %v2027_v62 = vmul.f32 %v6325_v59, %v2025_v61 }
0x1009   :  { %2029 = vrot.lane.b32.xlu0 %v2027_v62, %s6756_s1 }
0x105c   :  { %v2147_v0 = vpop.permute.xlu1 %2146 }
0x105d   :  { %v7329_v3 = vadd.f32 %v2147_v0, %v2143_v63 }
0x105f   :  { %6326 = vtanh.f32 %v7329_v3 }
0x1069   :  { %v6327_v5 = vpop.eup %6326 }
0x106a   :  { %2155 = vrot.lane.b32.xlu1 %v6327_v5, %s6756_s1 }
0x107b   :  { %v2030_v12 = vpop.permute.xlu0 %2029 }
0x107c   :  { %v7334_v13 = vadd.f32 %v2030_v12, %v2022_v55 }
0x107e   :  { %6328 = vtanh.f32 %v7334_v13 }
0x107f   :  { %6330 = vpow2.f32 %v5496_v42 }
0x1088   :  { %v6329_v14 = vpop.eup %6328 }
0x1089   :  { %2035 = vrot.lane.b32.xlu0 %v6329_v14, %s6756_s1  ;;  %v6331_v20 = vpop.eup %6330 }
0x108a   :  { %v2016_v56 = vadd.f32 1.0, %v6331_v20  ;;  %v2640_v20 = vld [vmem:[#allocation11 + $0x8] sm:$0xff] }
0x108c   :  { %6332 = vrcp.f32 %v2016_v56  ;;  %v2642_v56 = vld [vmem:[#allocation11 + $0x18] sm:$0xff] }
0x1096   :  { %v6333_v22 = vpop.eup %6332 }
0x10dc   :  { %v2156_v60 = vpop.permute.xlu1 %2155 }
0x10dd   :  { %v2158_v21 = vmul.f32 %v2156_v60, %v2152_v19 }
0x10df   :  { %5503 = vmatmul.mubr.msk.f32.vlgmr.msra.gmra.mrb[12].mxu1 %vm201_vm0, %v2158_v21 }
0x10e0   :  { %5872 = vmatpush1.bf16.msra.mxu1 %v7033_v7  ;;  %2526 = vmatprep.mubr.f32.mxu1 %v6753_v1 }
0x10e1   :  { %5874 = vmatprep.subr.bf16.mxu1 %v7035_v8 }
0x10e4   :  { %5876 = vmatpush1.bf16.msra.mxu1 %v7039_v15 }
0x10e5   :  { %5878 = vmatprep.subr.bf16.mxu1 %v7042_v18 }
0x10fb   :  { %v2036_v28 = vpop.permute.xlu0 %2035 }
0x10fc   :  { %v2038_v9 = vmul.f32 %v6333_v22, %v2036_v28  ;;  %v2639_v22 = vld [vmem:[#allocation11] sm:$0xff]  ;;  %v2641_v28 = vld [vmem:[#allocation11 + $0x10] sm:$0xff] }
0x10fe   :  { %5499 = vmatmul.mubr.msk.f32.vlgmr.msra.gmra.mrb[14].mxu0 %vm347_vm1, %v2038_v9  ;;  %v2644_v9 = vld [vmem:[#allocation11 + $0x28] sm:$0xff] }
0x10ff   :  { %5840 = vmatpush1.bf16.msra.mxu0 %v7045_v25  ;;  %2300 = vmatprep.mubr.f32.mxu0 %v6753_v1 }
0x1100   :  { %5842 = vmatprep.subr.bf16.mxu0 %v7048_v26 }
0x1103   :  { %5844 = vmatpush1.bf16.msra.mxu0 %v7052_v34 }
0x1104   :  { %5846 = vmatprep.subr.bf16.mxu0 %v7056_v35 }
0x1107   :  { %5848 = vmatpush1.bf16.msra.mxu0 %v7059_v40 }
0x1108   :  { %5850 = vmatprep.subr.bf16.mxu0 %v7062_v41 }
0x110b   :  { %5852 = vmatpush1.bf16.msra.mxu0 %v7065_v44 }
0x110e   :  { %5500 = vmatmul.mubr.msk.f32.vlgmr.msra.gmra.mrb[14].mxu0 %vm201_vm0, %v2158_v21 }
0x110f   :  { %2726 = vmatprep.mubr.f32.mxu0 %v6753_v1 }
0x11b2   :  { %v2407_v7 = vpop.f32.mrb[12].mxu1 }
0x11b3   :  { %v2409_v8 = vpop.f32.mrb[13].mxu1 }
0x11b4   :  { %v2414_v15 = vcombine.low %v2407_v7, %v2409_v8  ;;  %v2646_v7 = vld [vmem:[#allocation11 + $0x38] sm:$0xff]  ;;  %v5895_v8 = vpack.c.bf16 %v2641_v28, %v2639_v22  ;;  %v2861_v22 = vld [vmem:[#allocation16 + $0x48] sm:$0xff] }
0x11b6   :  { %v2421_v18 = vrot.slane %v2414_v15, %v7022_v46  ;;  %v5897_v15 = vpack.c.bf16 %v2646_v7, %v2644_v9  ;;  %v2860_v7 = vld [vmem:[#allocation16 + $0x40] sm:$0xff] }
0x11b8   :  { %v2428_v29 = vrot.slane %v2421_v18, %v7022_v46  ;;  %v2645_v18 = vld [vmem:[#allocation11 + $0x30] sm:$0xff] }
0x11ba   :  { %v2430_v33 = vadd.f32 %v2428_v29, %v2340_v32 }
0x11bc   :  { %2438 = vrot.lane.b32.xlu1 %v2430_v33, %s6756_s1  ;;  %v5504_v10 = vmul.f32 -1.442695, %v2430_v33  ;;  %v2734_v33 = vld [vmem:[#allocation13 + $0x8] sm:$0xff] }
0x11e1   :  { %v2302_v36 = vpop.f32.mrb[14].mxu0 }
0x11e2   :  { %v2304_v6 = vpop.f32.mrb[15].mxu0  ;;  %v2307_v24 = vadd.f32 %v2302_v36, %v7104_v4  ;;  %v2736_v36 = vld [vmem:[#allocation13 + $0x18] sm:$0xff] }
0x11e3   :  { %v2308_v37 = vadd.f32 %v2304_v6, %v7096_v54 }
0x11e4   :  { %v5501_v27 = vmul.f32 -1.442695, %v2307_v24 }
0x11e5   :  { %6334 = vtanh.f32 %v2308_v37  ;;  %v5502_v62 = vmul.f32 -1.442695, %v2308_v37  ;;  %v7382_v37 = vpack.c.bf16 %v2736_v36, %v2734_v33  ;;  %v2866_v33 = vld [vmem:[#allocation16 + $0x70] sm:$0xff]  ;;  %v2845_v36 = vld [vmem:[#allocation14 + $0x8] sm:$0xff] }
0x11e6   :  { %6336 = vpow2.f32 %v5504_v10  ;;  %v2735_v10 = vld [vmem:[#allocation13 + $0x10] sm:$0xff] }
0x11ef   :  { %v6335_v38 = vpop.eup %6334 }
0x11f0   :  { %2324 = vrot.lane.b32.xlu0 %v6335_v38, %s6756_s1  ;;  %v6337_v39 = vpop.eup %6336  ;;  %v2733_v38 = vld [vmem:[#allocation13] sm:$0xff] }
0x11f1   :  { %v2434_v11 = vadd.f32 1.0, %v6337_v39 }
0x11f3   :  { %6338 = vrcp.f32 %v2434_v11  ;;  %v7384_v11 = vpack.c.bf16 %v2735_v10, %v2733_v38 }
0x11fd   :  { %v6339_v46 = vpop.eup %6338 }
0x11fe   :  { %v2443_v52 = vmul.f32 %v6339_v46, %v7329_v3 }
0x122e   :  { %v2439_v43 = vpop.permute.xlu1 %2438 }
0x122f   :  { %v2440_v16 = vrot.slane %v2439_v43, 1  ;;  %v2738_v43 = vld [vmem:[#allocation13 + $0x28] sm:$0xff] }
0x1231   :  { %6340 = vtanh.f32 %v2440_v16  ;;  %v2740_v16 = vld [vmem:[#allocation13 + $0x38] sm:$0xff] }
0x1232   :  { %6342 = vpow2.f32 %v5501_v27 }
0x123b   :  { %v6341_v17 = vpop.eup %6340 }
0x123c   :  { %v2444_v23 = vmul.f32 %v6341_v17, %v6339_v46  ;;  %v6343_v2 = vpop.eup %6342  ;;  %v2737_v17 = vld [vmem:[#allocation13 + $0x20] sm:$0xff] }
0x123d   :  { %v2315_v45 = vadd.f32 1.0, %v6343_v2 }
0x123e   :  { %2446 = vrot.lane.b32.xlu1 %v2444_v23, %s6756_s1  ;;  %v2739_v23 = vld [vmem:[#allocation13 + $0x30] sm:$0xff] }
0x123f   :  { %6344 = vrcp.f32 %v2315_v45  ;;  %v7391_v24 = vpack.c.bf16 %v2739_v23, %v2737_v17  ;;  %v2851_v17 = vld [vmem:[#allocation14 + $0x38] sm:$0xff] }
0x1249   :  { %v6345_v49 = vpop.eup %6344 }
0x124a   :  { %v2322_v58 = vmul.f32 %v6345_v49, %v7334_v13  ;;  %v2452_v13 = vrot.slane %v6339_v46, 1  ;;  %v7389_v46 = vpack.c.bf16 %v2740_v16, %v2738_v43  ;;  %v2846_v43 = vld [vmem:[#allocation14 + $0x10] sm:$0xff]  ;;  %v2849_v16 = vld [vmem:[#allocation14 + $0x28] sm:$0xff] }
0x1262   :  { %v2325_v50 = vpop.permute.xlu0 %2324 }
0x1263   :  { %v2327_v51 = vmul.f32 %v6345_v49, %v2325_v50 }
0x1265   :  { %2329 = vrot.lane.b32.xlu0 %v2327_v51, %s6756_s1 }
0x12b0   :  { %v2447_v53 = vpop.permute.xlu1 %2446 }
0x12b1   :  { %v2449_v48 = vadd.f32 %v2447_v53, %v2443_v52 }
0x12b3   :  { %6346 = vtanh.f32 %v2449_v48  ;;  %v2647_v48 = vld [vmem:[%s7837_s9] sm:$0x3] }
0x12bd   :  { %v6347_v57 = vpop.eup %6346 }
0x12be   :  { %2455 = vrot.lane.b32.xlu1 %v6347_v57, %s6756_s1 }
0x12d7   :  { %v2330_v47 = vpop.permute.xlu0 %2329 }
0x12d8   :  { %v2332_v59 = vadd.f32 %v2330_v47, %v2322_v58  ;;  %v2656_v58 = vrot.slane %v2647_v48, %v7010_v31 }
0x12da   :  { %6348 = vtanh.f32 %v2332_v59 }
0x12db   :  { %6350 = vpow2.f32 %v5502_v62 }
0x12e4   :  { %v6349_v61 = vpop.eup %6348 }
0x12e5   :  { %2335 = vrot.lane.b32.xlu0 %v6349_v61, %s6756_s1  ;;  %v6351_v63 = vpop.eup %6350 }
0x12e6   :  { %v2316_v0 = vadd.f32 1.0, %v6351_v63 }
0x12e8   :  { %6352 = vrcp.f32 %v2316_v0  ;;  %v2652_v0 = vrot.slane %v2647_v48, %v7008_v30 }
0x12f2   :  { %v6353_v3 = vpop.eup %6352 }
0x1330   :  { %v2456_v12 = vpop.permute.xlu1 %2455 }
0x1331   :  { %v2458_v14 = vmul.f32 %v2456_v12, %v2452_v13 }
0x1357   :  { %v2336_v5 = vpop.permute.xlu0 %2335 }
0x1358   :  { %v2338_v55 = vmul.f32 %v6353_v3, %v2336_v5 }
0x135a   :  { %5505 = vmatmul.mubr.msk.f32.vlgmr.msra.gmra.mrb[14].mxu1 %vm347_vm1, %v2338_v55 }
0x135b   :  { %5880 = vmatpush1.bf16.msra.mxu1 %v7045_v25  ;;  %2600 = vmatprep.mubr.f32.mxu1 %v6753_v1 }
0x135c   :  { %5882 = vmatprep.subr.bf16.mxu1 %v7048_v26 }
0x135f   :  { %5884 = vmatpush1.bf16.msra.mxu1 %v7052_v34 }
0x1360   :  { %5886 = vmatprep.subr.bf16.mxu1 %v7056_v35 }
0x1363   :  { %5888 = vmatpush1.bf16.msra.mxu1 %v7059_v40 }
0x1364   :  { %5890 = vmatprep.subr.bf16.mxu1 %v7062_v41 }
0x1367   :  { %5892 = vmatpush1.bf16.msra.mxu1 %v7065_v44 }
0x1368   :  { %5934 = vmatprep.subr.bf16.mxu1 %v7382_v37 }
0x136a   :  { %5506 = vmatmul.mubr.msk.f32.vlgmr.msra.gmra.mrb[14].mxu1 %vm201_vm0, %v2458_v14 }
0x136b   :  { %3131 = vmatprep.mubr.f32.mxu1 %v6753_v1  ;;  %5936 = vmatpush1.bf16.msra.mxu1 %v7384_v11 }
0x136c   :  { %5938 = vmatprep.subr.bf16.mxu1 %v7389_v46 }
0x136f   :  { %5940 = vmatpush1.bf16.msra.mxu1 %v7391_v24 }
0x143d   :  { %v2602_v25 = vpop.f32.mrb[14].mxu1 }
0x143e   :  { %v2604_v19 = vpop.f32.mrb[15].mxu1  ;;  %v2607_v35 = vadd.f32 %v2602_v25, %v7104_v4  ;;  %v2643_v4 = vld [vmem:[#allocation11 + $0x20] sm:$0xff] }
0x143f   :  { %v2608_v26 = vadd.f32 %v2604_v19, %v7096_v54  ;;  %v5893_v54 = vpack.c.bf16 %v2642_v56, %v2640_v20  ;;  %v5899_v29 = vpack.c.bf16 %v2645_v18, %v2643_v4  ;;  %v2856_v20 = vld [vmem:[#allocation16 + $0x20] sm:$0xff]  ;;  %v2858_v56 = vld [vmem:[#allocation16 + $0x30] sm:$0xff]  ;;  %v2867_v4 = vld [vmem:[#allocation16 + $0x78] sm:$0xff] }
0x1440   :  { %v5507_v40 = vmul.f32 -1.442695, %v2607_v35  ;;  %v2852_v35 = vld [vmem:[#allocation16] sm:$0xff]  ;;  %v7428_v28 = vpack.c.bf16 %v2858_v56, %v2856_v20 }
0x1441   :  { %6354 = vtanh.f32 %v2608_v26  ;;  %5894 = vmatprep.subr.bf16.mxu0 %v5893_v54  ;;  %v5508_v2 = vmul.f32 -1.442695, %v2608_v26  ;;  %v2853_v26 = vld [vmem:[#allocation16 + $0x8] sm:$0xff]  ;;  %v2863_v54 = vld [vmem:[#allocation16 + $0x58] sm:$0xff] }
0x1442   :  { %6356 = vpow2.f32 %v5507_v40  ;;  %5896 = vmatpush1.bf16.msra.mxu0 %v5895_v8  ;;  %v7431_v9 = vpack.c.bf16 %v2863_v54, %v2861_v22  ;;  %v2862_v8 = vld [vmem:[#allocation16 + $0x50] sm:$0xff] }
0x1443   :  { %5898 = vmatprep.subr.bf16.mxu0 %v5897_v15  ;;  %v2865_v15 = vld [vmem:[#allocation16 + $0x68] sm:$0xff]  ;;  %v7434_v18 = vpack.c.bf16 %v2862_v8, %v2860_v7 }
0x1446   :  { %5900 = vmatpush1.bf16.msra.mxu0 %v5899_v29  ;;  %v7437_v29 = vpack.c.bf16 %v2867_v4, %v2865_v15 }
0x1447   :  { %5902 = vmatprep.subr.bf16.mxu0 %v7382_v37 }
0x144b   :  { %v6355_v34 = vpop.eup %6354 }
0x144c   :  { %2624 = vrot.lane.b32.xlu0 %v6355_v34, %s6756_s1  ;;  %v6357_v41 = vpop.eup %6356  ;;  %v2855_v34 = vld [vmem:[#allocation16 + $0x18] sm:$0xff] }
0x144d   :  { %v2615_v42 = vadd.f32 1.0, %v6357_v41  ;;  %v7419_v40 = vpack.c.bf16 %v2855_v34, %v2853_v26  ;;  %v2854_v41 = vld [vmem:[#allocation16 + $0x10] sm:$0xff] }
0x144f   :  { %6358 = vrcp.f32 %v2615_v42  ;;  %v2857_v42 = vld [vmem:[#allocation16 + $0x28] sm:$0xff]  ;;  %5942 = vmatprep.subr.bf16.mxu1 %v7419_v40 }
0x1459   :  { %v6359_v44 = vpop.eup %6358 }
0x145a   :  { %v2622_v32 = vmul.f32 %v6359_v44, %v2332_v59 }
0x14be   :  { %v2625_v60 = vpop.permute.xlu0 %2624 }
0x14bf   :  { %v2627_v21 = vmul.f32 %v6359_v44, %v2625_v60  ;;  %v2859_v44 = vld [vmem:[#allocation16 + $0x38] sm:$0xff]  ;;  %v7421_v60 = vpack.c.bf16 %v2854_v41, %v2852_v35 }
0x14c1   :  { %2629 = vrot.lane.b32.xlu1 %v2627_v21, %s6756_s1  ;;  %v7423_v21 = vpack.c.bf16 %v2859_v44, %v2857_v42 }
0x1533   :  { %v2630_v6 = vpop.permute.xlu1 %2629 }
0x1534   :  { %v2632_v39 = vadd.f32 %v2630_v6, %v2622_v32  ;;  %v2864_v32 = vld [vmem:[#allocation16 + $0x60] sm:$0xff]  ;;  %v2847_v6 = vld [vmem:[#allocation14 + $0x18] sm:$0xff] }
0x1535   :  { %v7440_v38 = vpack.c.bf16 %v2866_v33, %v2864_v32  ;;  %v7443_v10 = vpack.c.bf16 %v2847_v6, %v2845_v36 }
0x1536   :  { %6360 = vtanh.f32 %v2632_v39  ;;  %v2844_v39 = vld [vmem:[#allocation14] sm:$0xff] }
0x1537   :  { %6362 = vpow2.f32 %v5508_v2  ;;  %v7446_v23 = vpack.c.bf16 %v2846_v43, %v2844_v39  ;;  %v2848_v2 = vld [vmem:[#allocation14 + $0x20] sm:$0xff] }
0x1540   :  { %v6361_v27 = vpop.eup %6360 }
0x1541   :  { %2635 = vrot.lane.b32.xlu0 %v6361_v27, %s6756_s1  ;;  %v6363_v45 = vpop.eup %6362  ;;  %v7449_v27 = vpack.c.bf16 %v2851_v17, %v2849_v16 }
0x1542   :  { %v2616_v49 = vadd.f32 1.0, %v6363_v45  ;;  %v2850_v45 = vld [vmem:[#allocation14 + $0x30] sm:$0xff] }
0x1544   :  { %6364 = vrcp.f32 %v2616_v49  ;;  %v7453_v49 = vpack.c.bf16 %v2850_v45, %v2848_v2 }
0x154e   :  { %v6365_v50 = vpop.eup %6364 }
0x15b3   :  { %v2636_v51 = vpop.permute.xlu0 %2635 }
0x15b4   :  { %v2638_v52 = vmul.f32 %v6365_v50, %v2636_v51 }
0x15b6   :  { %5509 = vmatmul.mubr.msk.f32.vlgmr.msra.gmra.mrb[16].mxu0 %vm347_vm1, %v2638_v52 }
0x15b7   :  { %5904 = vmatpush1.bf16.msra.mxu0 %v7384_v11  ;;  %2805 = vmatprep.mubr.f32.mxu0 %v6753_v1 }
0x15b8   :  { %5906 = vmatprep.subr.bf16.mxu0 %v7389_v46 }
0x15bb   :  { %5908 = vmatpush1.bf16.msra.mxu0 %v7391_v24 }
0x15bc   :  { %5910 = vmatprep.subr.bf16.mxu0 %v7419_v40 }
0x15be   :  { %2806 = vmatmul.mubr.f32.vlgmr.msra.gmra.mrb[18].mxu0 %v6753_v1 }
0x15bf   :  { %2932 = vmatprep.mubr.f32.mxu0 %v6753_v1  ;;  %5912 = vmatpush1.bf16.msra.mxu0 %v7421_v60 }
0x15c0   :  { %5914 = vmatprep.subr.bf16.mxu0 %v7423_v21 }
0x15c3   :  { %5916 = vmatpush1.bf16.msra.mxu0 %v7428_v28 }
0x15c4   :  { %5918 = vmatprep.subr.bf16.mxu0 %v7431_v9 }
0x15c7   :  { %5920 = vmatpush1.bf16.msra.mxu0 %v7434_v18 }
0x15c8   :  { %5922 = vmatprep.subr.bf16.mxu0 %v7437_v29 }
0x15cb   :  { %5924 = vmatpush1.bf16.msra.mxu0 %v7440_v38 }
0x15cc   :  { %5926 = vmatprep.subr.bf16.mxu0 %v7443_v10 }
0x15ce   :  { %2933 = vmatmul.mubr.f32.vlgmr.msra.gmra.mrb[20].mxu0 %v6753_v1 }
0x15cf   :  { %5928 = vmatpush1.bf16.msra.mxu0 %v7446_v23  ;;  %3006 = vmatprep.mubr.f32.mxu0 %v6753_v1 }
0x15d0   :  { %5930 = vmatprep.subr.bf16.mxu0 %v7449_v27 }
0x15d3   :  { %5932 = vmatpush1.bf16.msra.mxu0 %v7453_v49 }
0x15d4   :  { %5966 = vmatprep.subr.bf16.mxu0 %v7382_v37 }
0x1689   :  { %v2728_v53 = vpop.f32.mrb[16].mxu0 }
0x168a   :  { %v2730_v57 = vpop.f32.mrb[17].mxu0  ;;  %v7415_v3 = vadd.f32 %v2728_v53, %v2652_v0 }
0x168b   :  { %v7407_v47 = vadd.f32 %v2730_v57, %v2656_v58 }
0x1691   :  { %v2807_v59 = vpop.f32.mrb[18].mxu0 }
0x1692   :  { %v2809_v61 = vpop.f32.mrb[19].mxu0  ;;  %v2812_v5 = vadd.f32 %v2807_v59, %v7415_v3 }
0x1693   :  { %v7410_v62 = vadd.f32 %v2809_v61, %v7407_v47 }
0x1694   :  { %v5510_v55 = vmul.f32 -1.442695, %v2812_v5 }
0x1695   :  { %6366 = vtanh.f32 %v7410_v62  ;;  %v5511_v48 = vmul.f32 -1.442695, %v7410_v62  ;;  %v3013_v62 = vld [vmem:[%s7840_s12] sm:$0x3] }
0x1696   :  { %6368 = vpow2.f32 %v5510_v55  ;;  %v3018_v0 = vrot.slane %v3013_v62, %v7008_v30  ;;  %v3022_v5 = vrot.slane %v3013_v62, %v7010_v31 }
0x169f   :  { %v6367_v63 = vpop.eup %6366 }
0x16a0   :  { %2829 = vrot.lane.b32.xlu1 %v6367_v63, %s6756_s1  ;;  %v6369_v12 = vpop.eup %6368 }
0x16a1   :  { %v2820_v13 = vadd.f32 1.0, %v6369_v12 }
0x16a3   :  { %6370 = vrcp.f32 %v2820_v13 }
0x16ad   :  { %v6371_v14 = vpop.eup %6370 }
0x16ae   :  { %v2827_v50 = vmul.f32 0.0, %v6371_v14 }
0x1712   :  { %v2830_v25 = vpop.permute.xlu1 %2829 }
0x1713   :  { %v2832_v19 = vmul.f32 %v6371_v14, %v2830_v25 }
0x1715   :  { %2834 = vrot.lane.b32.xlu0 %v2832_v19, %s6756_s1 }
0x1787   :  { %v2835_v51 = vpop.permute.xlu0 %2834 }
0x1788   :  { %v7459_v52 = vadd.f32 %v2835_v51, %v2827_v50 }
0x178a   :  { %6372 = vtanh.f32 %v7459_v52 }
0x178b   :  { %6374 = vpow2.f32 %v5511_v48 }
0x1794   :  { %v6373_v53 = vpop.eup %6372 }
0x1795   :  { %2840 = vrot.lane.b32.xlu1 %v6373_v53, %s6756_s1  ;;  %v6375_v57 = vpop.eup %6374 }
0x1796   :  { %v2821_v58 = vadd.f32 1.0, %v6375_v57 }
0x1798   :  { %6376 = vrcp.f32 %v2821_v58 }
0x17a2   :  { %v6377_v59 = vpop.eup %6376 }
0x1807   :  { %v2841_v61 = vpop.permute.xlu1 %2840 }
0x1808   :  { %v2843_v63 = vmul.f32 %v6377_v59, %v2841_v61 }
0x180a   :  { %5512 = vmatmul.mubr.msk.f32.vlgmr.msra.gmra.mrb[20].mxu0 %vm347_vm1, %v2843_v63  ;;  %5515 = vmatmul.mubr.msk.f32.vlgmr.msra.gmra.mrb[16].mxu1 %vm347_vm1, %v2843_v63 }
0x180b   :  { %5944 = vmatpush1.bf16.msra.mxu1 %v7421_v60  ;;  %5968 = vmatpush1.bf16.msra.mxu0 %v7384_v11 }
0x180c   :  { %5946 = vmatprep.subr.bf16.mxu1 %v7423_v21  ;;  %5970 = vmatprep.subr.bf16.mxu0 %v7389_v46 }
0x180d   :  { %3261 = vmatprep.mubr.f32.mxu1 %v6753_v1  ;;  %3459 = vmatprep.mubr.f32.mxu0 %v6753_v1 }
0x180f   :  { %5948 = vmatpush1.bf16.msra.mxu1 %v7428_v28  ;;  %5972 = vmatpush1.bf16.msra.mxu0 %v7391_v24 }
0x1810   :  { %5950 = vmatprep.subr.bf16.mxu1 %v7431_v9  ;;  %5974 = vmatprep.subr.bf16.mxu0 %v7419_v40 }
0x1813   :  { %5952 = vmatpush1.bf16.msra.mxu1 %v7434_v18 }
0x1814   :  { %5954 = vmatprep.subr.bf16.mxu1 %v7437_v29 }
0x1817   :  { %5956 = vmatpush1.bf16.msra.mxu1 %v7440_v38 }
0x1818   :  { %5958 = vmatprep.subr.bf16.mxu1 %v7443_v10 }
0x18dd   :  { %v3008_v55 = vpop.f32.mrb[20].mxu0  ;;  %v3133_v12 = vpop.f32.mrb[16].mxu1 }
0x18de   :  { %v3025_v13 = vadd.f32 %v3018_v0, %v3008_v55  ;;  %v3010_v14 = vpop.f32.mrb[21].mxu0  ;;  %v3135_v25 = vpop.f32.mrb[17].mxu1  ;;  %v3138_v42 = vadd.f32 %v3133_v12, %v7415_v3 }
0x18df   :  { %v3026_v19 = vadd.f32 %v3022_v5, %v3010_v14  ;;  %v3139_v26 = vadd.f32 %v3135_v25, %v7407_v47  ;;  %v3342_v5 = vld [vmem:[%s7840_s12] sm:$0x3] }
0x18e0   :  { %v5513_v41 = vmul.f32 -1.442695, %v3025_v13  ;;  %v5516_v44 = vmul.f32 -1.442695, %v3138_v42  ;;  %v3347_v12 = vrot.slane %v3342_v5, %v7008_v30  ;;  %v3351_v14 = vrot.slane %v3342_v5, %v7010_v31 }
0x18e1   :  { %6378 = vtanh.f32 %v3026_v19  ;;  %v5514_v50 = vmul.f32 -1.442695, %v3026_v19  ;;  %v5517_v51 = vmul.f32 -1.442695, %v3139_v26 }
0x18e2   :  { %6380 = vtanh.f32 %v3139_v26 }
0x18e3   :  { %6382 = vpow2.f32 %v5513_v41 }
0x18e4   :  { %6384 = vpow2.f32 %v5516_v44 }
0x18eb   :  { %v6379_v34 = vpop.eup %6378 }
0x18ec   :  { %3042 = vrot.lane.b32.xlu0 %v6379_v34, %s6756_s1  ;;  %v6381_v35 = vpop.eup %6380 }
0x18ed   :  { %3155 = vrot.lane.b32.xlu1 %v6381_v35, %s6756_s1  ;;  %v6383_v20 = vpop.eup %6382 }
0x18ee   :  { %v3033_v56 = vadd.f32 1.0, %v6383_v20  ;;  %v6385_v22 = vpop.eup %6384 }
0x18ef   :  { %v3146_v54 = vadd.f32 1.0, %v6385_v22 }
0x18f0   :  { %6386 = vrcp.f32 %v3033_v56 }
0x18f1   :  { %6388 = vrcp.f32 %v3146_v54 }
0x18fa   :  { %v6387_v7 = vpop.eup %6386 }
0x18fb   :  { %v6389_v4 = vpop.eup %6388  ;;  %v3040_v36 = vmul.f32 0.0, %v6387_v7 }
0x18fc   :  { %v3153_v43 = vmul.f32 %v6389_v4, %v7459_v52 }
0x195e   :  { %v3043_v8 = vpop.permute.xlu0 %3042 }
0x195f   :  { %v3045_v15 = vmul.f32 %v6387_v7, %v3043_v8  ;;  %v3156_v32 = vpop.permute.xlu1 %3155 }
0x1960   :  { %v3158_v33 = vmul.f32 %v6389_v4, %v3156_v32 }
0x1961   :  { %3047 = vrot.lane.b32.xlu0 %v3045_v15, %s6756_s1 }
0x1962   :  { %3160 = vrot.lane.b32.xlu1 %v3158_v33, %s6756_s1 }
0x19d3   :  { %v3048_v6 = vpop.permute.xlu0 %3047 }
0x19d4   :  { %v7491_v39 = vadd.f32 %v3048_v6, %v3040_v36  ;;  %v3161_v16 = vpop.permute.xlu1 %3160 }
0x19d5   :  { %v7495_v17 = vadd.f32 %v3161_v16, %v3153_v43 }
0x19d6   :  { %6390 = vtanh.f32 %v7491_v39 }
0x19d7   :  { %6392 = vtanh.f32 %v7495_v17 }
0x19d8   :  { %6394 = vpow2.f32 %v5514_v50 }
0x19d9   :  { %6396 = vpow2.f32 %v5517_v51 }
0x19e0   :  { %v6391_v2 = vpop.eup %6390 }
0x19e1   :  { %3053 = vrot.lane.b32.xlu0 %v6391_v2, %s6756_s1  ;;  %v6393_v45 = vpop.eup %6392 }
0x19e2   :  { %3166 = vrot.lane.b32.xlu1 %v6393_v45, %s6756_s1  ;;  %v6395_v53 = vpop.eup %6394 }
0x19e3   :  { %v3034_v48 = vadd.f32 1.0, %v6395_v53  ;;  %v6397_v57 = vpop.eup %6396 }
0x19e4   :  { %v3147_v52 = vadd.f32 1.0, %v6397_v57 }
0x19e5   :  { %6398 = vrcp.f32 %v3034_v48 }
0x19e6   :  { %6400 = vrcp.f32 %v3147_v52 }
0x19ef   :  { %v6399_v58 = vpop.eup %6398 }
0x19f0   :  { %v6401_v63 = vpop.eup %6400 }
0x1a53   :  { %v3054_v59 = vpop.permute.xlu0 %3053 }
0x1a54   :  { %v3056_v61 = vmul.f32 %v6399_v58, %v3054_v59  ;;  %v3167_v62 = vpop.permute.xlu1 %3166 }
0x1a55   :  { %v3169_v0 = vmul.f32 %v6401_v63, %v3167_v62 }
0x1a56   :  { %3058 = vst.msk [vmem:[#allocation3] sm:$0x1] %vm3057_vm2, %v3056_v61  ;;  %5518 = vmatmul.mubr.msk.f32.vlgmr.msra.gmra.mrb[18].mxu1 %vm201_vm0, %v3056_v61 }
0x1a57   :  { %5960 = vmatpush1.bf16.msra.mxu1 %v7446_v23  ;;  %3335 = vmatprep.mubr.f32.mxu1 %v6753_v1 }
0x1a58   :  { %5962 = vmatprep.subr.bf16.mxu1 %v7449_v27  ;;  %5522 = vmatmul.mubr.msk.f32.vlgmr.msra.gmra.mrb[22].mxu0 %vm347_vm1, %v3169_v0 }
0x1a59   :  { %5976 = vmatpush1.bf16.msra.mxu0 %v7421_v60  ;;  %3589 = vmatprep.mubr.f32.mxu0 %v6753_v1 }
0x1a5a   :  { %5978 = vmatprep.subr.bf16.mxu0 %v7423_v21 }
0x1a5b   :  { %5964 = vmatpush1.bf16.msra.mxu1 %v7453_v49 }
0x1a5c   :  { %5998 = vmatprep.subr.bf16.mxu1 %v7382_v37 }
0x1a5d   :  { %5980 = vmatpush1.bf16.msra.mxu0 %v7428_v28 }
0x1a5e   :  { %5519 = vmatmul.mubr.msk.f32.vlgmr.msra.gmra.mrb[18].mxu1 %vm347_vm1, %v3169_v0  ;;  %5982 = vmatprep.subr.bf16.mxu0 %v7431_v9 }
0x1a5f   :  { %6000 = vmatpush1.bf16.msra.mxu1 %v7384_v11  ;;  %3787 = vmatprep.mubr.f32.mxu1 %v6753_v1 }
0x1a60   :  { %6002 = vmatprep.subr.bf16.mxu1 %v7389_v46 }
0x1a61   :  { %5984 = vmatpush1.bf16.msra.mxu0 %v7434_v18 }
0x1a62   :  { %5986 = vmatprep.subr.bf16.mxu0 %v7437_v29 }
0x1a63   :  { %6004 = vmatpush1.bf16.msra.mxu1 %v7391_v24 }
0x1a64   :  { %6006 = vmatprep.subr.bf16.mxu1 %v7419_v40 }
0x1a65   :  { %5988 = vmatpush1.bf16.msra.mxu0 %v7440_v38 }
0x1a66   :  { %5990 = vmatprep.subr.bf16.mxu0 %v7443_v10 }
0x1b2b   :  { %v3461_v55 = vpop.f32.mrb[22].mxu0 }
0x1b2c   :  { %v3463_v13 = vpop.f32.mrb[23].mxu0  ;;  %v3466_v44 = vadd.f32 %v3461_v55, %v7415_v3 }
0x1b2d   :  { %v3467_v25 = vadd.f32 %v3463_v13, %v7407_v47 }
0x1b2e   :  { %v5523_v20 = vmul.f32 -1.442695, %v3466_v44 }
0x1b2f   :  { %6402 = vtanh.f32 %v3467_v25  ;;  %v5524_v57 = vmul.f32 -1.442695, %v3467_v25 }
0x1b31   :  { %v3337_v19 = vpop.f32.mrb[18].mxu1 }
0x1b32   :  { %v3354_v26 = vadd.f32 %v3347_v12, %v3337_v19  ;;  %v3339_v34 = vpop.f32.mrb[19].mxu1 }
0x1b33   :  { %v3355_v35 = vadd.f32 %v3351_v14, %v3339_v34 }
0x1b34   :  { %v5520_v56 = vmul.f32 -1.442695, %v3354_v26 }
0x1b35   :  { %6404 = vtanh.f32 %v3355_v35 }
0x1b36   :  { %6406 = vpow2.f32 %v5523_v20 }
0x1b37   :  { %6408 = vpow2.f32 %v5520_v56 }
0x1b39   :  { %v6403_v41 = vpop.eup %6402 }
0x1b3a   :  { %3483 = vrot.lane.b32.xlu1 %v6403_v41, %s6756_s1 }
0x1b3f   :  { %v6405_v42 = vpop.eup %6404 }
0x1b40   :  { %3371 = vrot.lane.b32.xlu0 %v6405_v42, %s6756_s1  ;;  %v6407_v22 = vpop.eup %6406 }
0x1b41   :  { %v6409_v54 = vpop.eup %6408  ;;  %v3474_v7 = vadd.f32 1.0, %v6407_v22 }
0x1b42   :  { %v3362_v8 = vadd.f32 1.0, %v6409_v54 }
0x1b43   :  { %6410 = vrcp.f32 %v3474_v7 }
0x1b44   :  { %6412 = vrcp.f32 %v3362_v8 }
0x1b4d   :  { %v6411_v15 = vpop.eup %6410 }
0x1b4e   :  { %v6413_v33 = vpop.eup %6412  ;;  %v3481_v43 = vmul.f32 %v6411_v15, %v7495_v17  ;;  %v5521_v17 = vmul.f32 -1.442695, %v3355_v35 }
0x1b4f   :  { %v3369_v45 = vmul.f32 %v6413_v33, %v7491_v39 }
0x1bac   :  { %v3484_v4 = vpop.permute.xlu1 %3483 }
0x1bad   :  { %v3486_v32 = vmul.f32 %v6411_v15, %v3484_v4 }
0x1baf   :  { %3488 = vrot.lane.b32.xlu1 %v3486_v32, %s6756_s1 }
0x1bb2   :  { %v3372_v36 = vpop.permute.xlu0 %3371 }
0x1bb3   :  { %v3374_v6 = vmul.f32 %v6413_v33, %v3372_v36 }
0x1bb5   :  { %3376 = vrot.lane.b32.xlu0 %v3374_v6, %s6756_s1 }
0x1c21   :  { %v3489_v16 = vpop.permute.xlu1 %3488 }
0x1c22   :  { %v7535_v2 = vadd.f32 %v3489_v16, %v3481_v43 }
0x1c24   :  { %6414 = vtanh.f32 %v7535_v2 }
0x1c27   :  { %v3377_v50 = vpop.permute.xlu0 %3376 }
0x1c28   :  { %v7539_v51 = vadd.f32 %v3377_v50, %v3369_v45 }
0x1c2a   :  { %6416 = vtanh.f32 %v7539_v51 }
0x1c2b   :  { %6418 = vpow2.f32 %v5524_v57 }
0x1c2c   :  { %6420 = vpow2.f32 %v5521_v17 }
0x1c2e   :  { %v6415_v53 = vpop.eup %6414 }
0x1c2f   :  { %3494 = vrot.lane.b32.xlu1 %v6415_v53, %s6756_s1 }
0x1c34   :  { %v6417_v48 = vpop.eup %6416 }
0x1c35   :  { %3382 = vrot.lane.b32.xlu0 %v6417_v48, %s6756_s1  ;;  %v6419_v52 = vpop.eup %6418 }
0x1c36   :  { %v6421_v58 = vpop.eup %6420  ;;  %v3475_v39 = vadd.f32 1.0, %v6419_v52 }
0x1c37   :  { %v3363_v59 = vadd.f32 1.0, %v6421_v58 }
0x1c38   :  { %6422 = vrcp.f32 %v3475_v39 }
0x1c39   :  { %6424 = vrcp.f32 %v3363_v59 }
0x1c42   :  { %v6423_v61 = vpop.eup %6422 }
0x1c43   :  { %v6425_v0 = vpop.eup %6424 }
0x1ca1   :  { %v3495_v63 = vpop.permute.xlu1 %3494 }
0x1ca2   :  { %v3497_v62 = vmul.f32 %v6423_v61, %v3495_v63 }
0x1ca4   :  { %5529 = vmatmul.mubr.msk.f32.vlgmr.msra.gmra.mrb[20].mxu1 %vm347_vm1, %v3497_v62 }
0x1ca5   :  { %6008 = vmatpush1.bf16.msra.mxu1 %v7421_v60  ;;  %3917 = vmatprep.mubr.f32.mxu1 %v6753_v1 }
0x1ca6   :  { %6010 = vmatprep.subr.bf16.mxu1 %v7423_v21 }
0x1ca7   :  { %v3383_v5 = vpop.permute.xlu0 %3382 }
0x1ca8   :  { %v3385_v55 = vmul.f32 %v6425_v0, %v3383_v5 }
0x1ca9   :  { %6012 = vmatpush1.bf16.msra.mxu1 %v7428_v28 }
0x1caa   :  { %3386 = vst.msk [vmem:[#allocation3 + $0x1] sm:$0x1] %vm3057_vm2, %v3385_v55  ;;  %5525 = vmatmul.mubr.msk.f32.vlgmr.msra.gmra.mrb[24].mxu0 %vm201_vm0, %v3385_v55  ;;  %6014 = vmatprep.subr.bf16.mxu1 %v7431_v9 }
0x1cab   :  { %5992 = vmatpush1.bf16.msra.mxu0 %v7446_v23  ;;  %3663 = vmatprep.mubr.f32.mxu0 %v6753_v1 }
0x1cac   :  { %5994 = vmatprep.subr.bf16.mxu0 %v7449_v27 }
0x1cad   :  { %6016 = vmatpush1.bf16.msra.mxu1 %v7434_v18 }
0x1cae   :  { %6018 = vmatprep.subr.bf16.mxu1 %v7437_v29 }
0x1caf   :  { %5996 = vmatpush1.bf16.msra.mxu0 %v7453_v49 }
0x1cb0   :  { %6030 = vmatprep.subr.bf16.mxu0 %v7382_v37 }
0x1cb1   :  { %6020 = vmatpush1.bf16.msra.mxu1 %v7440_v38 }
0x1cb2   :  { %5526 = vmatmul.mubr.msk.f32.vlgmr.msra.gmra.mrb[24].mxu0 %vm347_vm1, %v3497_v62  ;;  %6022 = vmatprep.subr.bf16.mxu1 %v7443_v10 }
0x1cb3   :  { %6032 = vmatpush1.bf16.msra.mxu0 %v7384_v11  ;;  %4115 = vmatprep.mubr.f32.mxu0 %v6753_v1  ;;  %v3670_v11 = vld [vmem:[%s7840_s12] sm:$0x3] }
0x1cb4   :  { %6034 = vmatprep.subr.bf16.mxu0 %v7389_v46  ;;  %v3675_v14 = vrot.slane %v3670_v11, %v7008_v30  ;;  %v3679_v46 = vrot.slane %v3670_v11, %v7010_v31 }
0x1cb7   :  { %6036 = vmatpush1.bf16.msra.mxu0 %v7391_v24 }
0x1cb8   :  { %6038 = vmatprep.subr.bf16.mxu0 %v7419_v40 }
0x1d77   :  { %v3789_v37 = vpop.f32.mrb[20].mxu1 }
0x1d78   :  { %v3791_v12 = vpop.f32.mrb[21].mxu1  ;;  %v3794_v35 = vadd.f32 %v3789_v37, %v7415_v3 }
0x1d79   :  { %v3795_v13 = vadd.f32 %v3791_v12, %v7407_v47 }
0x1d7a   :  { %v5530_v41 = vmul.f32 -1.442695, %v3794_v35 }
0x1d7b   :  { %6426 = vtanh.f32 %v3795_v13  ;;  %v5531_v48 = vmul.f32 -1.442695, %v3795_v13 }
0x1d85   :  { %v3665_v25 = vpop.f32.mrb[24].mxu0  ;;  %v6427_v24 = vpop.eup %6426 }
0x1d86   :  { %v3682_v19 = vadd.f32 %v3675_v14, %v3665_v25  ;;  %v3667_v26 = vpop.f32.mrb[25].mxu0  ;;  %3811 = vrot.lane.b32.xlu1 %v6427_v24, %s6756_s1 }
0x1d87   :  { %v3683_v34 = vadd.f32 %v3679_v46, %v3667_v26 }
0x1d88   :  { %v5527_v42 = vmul.f32 -1.442695, %v3682_v19 }
0x1d89   :  { %6428 = vtanh.f32 %v3683_v34 }
0x1d8a   :  { %6430 = vpow2.f32 %v5530_v41 }
0x1d8b   :  { %6432 = vpow2.f32 %v5527_v42  ;;  %v4372_v42 = vld [vmem:[#allocation13 + $0x8] sm:$0xff] }
0x1d93   :  { %v6429_v40 = vpop.eup %6428 }
0x1d94   :  { %3699 = vrot.lane.b32.xlu0 %v6429_v40, %s6756_s1  ;;  %v6431_v44 = vpop.eup %6430 }
0x1d95   :  { %v3802_v20 = vadd.f32 1.0, %v6431_v44  ;;  %v6433_v56 = vpop.eup %6432  ;;  %v4374_v44 = vld [vmem:[#allocation13 + $0x18] sm:$0xff] }
0x1d96   :  { %v3690_v22 = vadd.f32 1.0, %v6433_v56  ;;  %v7617_v56 = vpack.c.bf16 %v4374_v44, %v4372_v42  ;;  %v4491_v44 = vld [vmem:[#allocation16 + $0x8] sm:$0xff] }
0x1d97   :  { %6434 = vrcp.f32 %v3802_v20  ;;  %v4371_v20 = vld [vmem:[#allocation13] sm:$0xff] }
0x1d98   :  { %6436 = vrcp.f32 %v3690_v22  ;;  %v4373_v22 = vld [vmem:[#allocation13 + $0x10] sm:$0xff] }
0x1da1   :  { %v6435_v54 = vpop.eup %6434 }
0x1da2   :  { %v6437_v15 = vpop.eup %6436  ;;  %v3809_v33 = vmul.f32 %v6435_v54, %v7535_v2  ;;  %v5528_v2 = vmul.f32 -1.442695, %v3683_v34 }
0x1da3   :  { %v3697_v43 = vmul.f32 %v6437_v15, %v7539_v51 }
0x1df8   :  { %v3812_v7 = vpop.permute.xlu1 %3811 }
0x1df9   :  { %v3814_v8 = vmul.f32 %v6435_v54, %v3812_v7  ;;  %v4376_v54 = vld [vmem:[#allocation13 + $0x28] sm:$0xff]  ;;  %v4378_v7 = vld [vmem:[#allocation13 + $0x38] sm:$0xff] }
0x1dfb   :  { %3816 = vrot.lane.b32.xlu1 %v3814_v8, %s6756_s1  ;;  %v7619_v8 = vpack.c.bf16 %v4373_v22, %v4371_v20  ;;  %v4493_v20 = vld [vmem:[#allocation16 + $0x18] sm:$0xff]  ;;  %v4490_v22 = vld [vmem:[#allocation16] sm:$0xff] }
0x1e06   :  { %v3700_v4 = vpop.permute.xlu0 %3699 }
0x1e07   :  { %v3702_v32 = vmul.f32 %v6437_v15, %v3700_v4  ;;  %v7621_v15 = vpack.c.bf16 %v4378_v7, %v4376_v54  ;;  %v4375_v4 = vld [vmem:[#allocation13 + $0x20] sm:$0xff]  ;;  %v7674_v54 = vpack.c.bf16 %v4493_v20, %v4491_v44  ;;  %v4492_v7 = vld [vmem:[#allocation16 + $0x10] sm:$0xff] }
0x1e09   :  { %3704 = vrot.lane.b32.xlu0 %v3702_v32, %s6756_s1  ;;  %v4377_v32 = vld [vmem:[#allocation13 + $0x30] sm:$0xff] }
0x1e6d   :  { %v3817_v36 = vpop.permute.xlu1 %3816 }
0x1e6e   :  { %v7579_v6 = vadd.f32 %v3817_v36, %v3809_v33  ;;  %v7626_v33 = vpack.c.bf16 %v4377_v32, %v4375_v4  ;;  %v4495_v4 = vld [vmem:[#allocation16 + $0x28] sm:$0xff]  ;;  %v4497_v32 = vld [vmem:[#allocation16 + $0x38] sm:$0xff] }
0x1e70   :  { %6438 = vtanh.f32 %v7579_v6 }
0x1e7a   :  { %v6439_v50 = vpop.eup %6438 }
0x1e7b   :  { %v3705_v16 = vpop.permute.xlu0 %3704  ;;  %3822 = vrot.lane.b32.xlu1 %v6439_v50, %s6756_s1 }
0x1e7c   :  { %v7583_v45 = vadd.f32 %v3705_v16, %v3697_v43 }
0x1e7e   :  { %6440 = vtanh.f32 %v7583_v45 }
0x1e7f   :  { %6442 = vpow2.f32 %v5531_v48 }
0x1e80   :  { %6444 = vpow2.f32 %v5528_v2 }
0x1e88   :  { %v6441_v53 = vpop.eup %6440 }
0x1e89   :  { %3710 = vrot.lane.b32.xlu0 %v6441_v53, %s6756_s1  ;;  %v6443_v57 = vpop.eup %6442 }
0x1e8a   :  { %v3803_v17 = vadd.f32 1.0, %v6443_v57  ;;  %v6445_v52 = vpop.eup %6444 }
0x1e8b   :  { %v3691_v51 = vadd.f32 1.0, %v6445_v52 }
0x1e8c   :  { %6446 = vrcp.f32 %v3803_v17 }
0x1e8d   :  { %6448 = vrcp.f32 %v3691_v51 }
0x1e96   :  { %v6447_v58 = vpop.eup %6446 }
0x1e97   :  { %v6449_v61 = vpop.eup %6448 }
0x1eed   :  { %v3823_v39 = vpop.permute.xlu1 %3822 }
0x1eee   :  { %v3825_v59 = vmul.f32 %v6447_v58, %v3823_v39 }
0x1ef0   :  { %5536 = vmatmul.mubr.msk.f32.vlgmr.msra.gmra.mrb[26].mxu0 %vm347_vm1, %v3825_v59 }
0x1ef1   :  { %6040 = vmatpush1.bf16.msra.mxu0 %v7421_v60  ;;  %4245 = vmatprep.mubr.f32.mxu0 %v6753_v1 }
0x1ef2   :  { %6042 = vmatprep.subr.bf16.mxu0 %v7423_v21 }
0x1ef5   :  { %6044 = vmatpush1.bf16.msra.mxu0 %v7428_v28 }
0x1ef6   :  { %6046 = vmatprep.subr.bf16.mxu0 %v7431_v9  ;;  %v3998_v9 = vld [vmem:[%s7840_s12] sm:$0x3] }
0x1ef9   :  { %6048 = vmatpush1.bf16.msra.mxu0 %v7434_v18 }
0x1efa   :  { %6050 = vmatprep.subr.bf16.mxu0 %v7437_v29  ;;  %v4003_v29 = vrot.slane %v3998_v9, %v7008_v30 }
0x1efb   :  { %v3711_v63 = vpop.permute.xlu0 %3710 }
0x1efc   :  { %v3713_v62 = vmul.f32 %v6449_v61, %v3711_v63 }
0x1efd   :  { %6052 = vmatpush1.bf16.msra.mxu0 %v7440_v38  ;;  %v4007_v38 = vrot.slane %v3998_v9, %v7010_v31 }
0x1efe   :  { %3714 = vst.msk [vmem:[#allocation3 + $0x2] sm:$0x1] %vm3057_vm2, %v3713_v62  ;;  %5532 = vmatmul.mubr.msk.f32.vlgmr.msra.gmra.mrb[22].mxu1 %vm201_vm0, %v3713_v62  ;;  %6054 = vmatprep.subr.bf16.mxu0 %v7443_v10 }
0x1eff   :  { %6024 = vmatpush1.bf16.msra.mxu1 %v7446_v23  ;;  %3991 = vmatprep.mubr.f32.mxu1 %v6753_v1 }
0x1f00   :  { %6026 = vmatprep.subr.bf16.mxu1 %v7449_v27 }
0x1f03   :  { %6028 = vmatpush1.bf16.msra.mxu1 %v7453_v49 }
0x1f04   :  { %6062 = vmatprep.subr.bf16.mxu1 %v7617_v56 }
0x1f06   :  { %5533 = vmatmul.mubr.msk.f32.vlgmr.msra.gmra.mrb[22].mxu1 %vm347_vm1, %v3825_v59 }
0x1f07   :  { %4443 = vmatprep.mubr.f32.mxu1 %v6753_v1  ;;  %6064 = vmatpush1.bf16.msra.mxu1 %v7619_v8 }
0x1f08   :  { %6066 = vmatprep.subr.bf16.mxu1 %v7621_v15 }
0x1f0b   :  { %6068 = vmatpush1.bf16.msra.mxu1 %v7626_v33 }
0x1f0c   :  { %6070 = vmatprep.subr.bf16.mxu1 %v7674_v54 }
0x1fc3   :  { %v4117_v60 = vpop.f32.mrb[26].mxu0 }
0x1fc4   :  { %v4119_v21 = vpop.f32.mrb[27].mxu0  ;;  %v4122_v12 = vadd.f32 %v4117_v60, %v7415_v3 }
0x1fc5   :  { %v4123_v28 = vadd.f32 %v4119_v21, %v7407_v47 }
0x1fc6   :  { %v5537_v13 = vmul.f32 -1.442695, %v4122_v12 }
0x1fc7   :  { %6450 = vtanh.f32 %v4123_v28 }
0x1fd1   :  { %v6451_v18 = vpop.eup %6450 }
0x1fd2   :  { %4139 = vrot.lane.b32.xlu1 %v6451_v18, %s6756_s1 }
0x1fd9   :  { %v3993_v10 = vpop.f32.mrb[22].mxu1 }
0x1fda   :  { %v4010_v0 = vadd.f32 %v4003_v29, %v3993_v10  ;;  %v3995_v5 = vpop.f32.mrb[23].mxu1 }
0x1fdb   :  { %v4011_v55 = vadd.f32 %v4007_v38, %v3995_v5 }
0x1fdc   :  { %v5534_v46 = vmul.f32 -1.442695, %v4010_v0 }
0x1fdd   :  { %6452 = vtanh.f32 %v4011_v55  ;;  %v5535_v51 = vmul.f32 -1.442695, %v4011_v55 }
0x1fde   :  { %6454 = vpow2.f32 %v5537_v13 }
0x1fe7   :  { %v6453_v37 = vpop.eup %6452 }
0x1fe8   :  { %4027 = vrot.lane.b32.xlu0 %v6453_v37, %s6756_s1  ;;  %v6455_v11 = vpop.eup %6454 }
0x1fe9   :  { %v4130_v14 = vadd.f32 1.0, %v6455_v11 }
0x1feb   :  { %6456 = vrcp.f32 %v4130_v14 }
0x1fec   :  { %6458 = vpow2.f32 %v5534_v46 }
0x1ff5   :  { %v6457_v25 = vpop.eup %6456 }
0x1ff6   :  { %v6459_v34 = vpop.eup %6458  ;;  %v4137_v36 = vmul.f32 %v6457_v25, %v7579_v6  ;;  %v5538_v6 = vmul.f32 -1.442695, %v4123_v28 }
0x1ff7   :  { %v4018_v24 = vadd.f32 1.0, %v6459_v34 }
0x1ff9   :  { %6460 = vrcp.f32 %v4018_v24 }
0x2003   :  { %v6461_v40 = vpop.eup %6460 }
0x2004   :  { %v4025_v53 = vmul.f32 %v6461_v40, %v7583_v45 }
0x2044   :  { %v4140_v19 = vpop.permute.xlu1 %4139 }
0x2045   :  { %v4142_v26 = vmul.f32 %v6457_v25, %v4140_v19 }
0x2047   :  { %4144 = vrot.lane.b32.xlu1 %v4142_v26, %s6756_s1 }
0x205a   :  { %v4028_v35 = vpop.permute.xlu0 %4027 }
0x205b   :  { %v4030_v41 = vmul.f32 %v6461_v40, %v4028_v35 }
0x205d   :  { %4032 = vrot.lane.b32.xlu0 %v4030_v41, %s6756_s1 }
0x20b9   :  { %v4145_v43 = vpop.permute.xlu1 %4144 }
0x20ba   :  { %v7630_v16 = vadd.f32 %v4145_v43, %v4137_v36  ;;  %v7676_v36 = vpack.c.bf16 %v4492_v7, %v4490_v22  ;;  %v7678_v43 = vpack.c.bf16 %v4497_v32, %v4495_v4 }
0x20bc   :  { %6462 = vtanh.f32 %v7630_v16 }
0x20c6   :  { %v6463_v50 = vpop.eup %6462 }
0x20c7   :  { %4150 = vrot.lane.b32.xlu1 %v6463_v50, %s6756_s1  ;;  %v4494_v50 = vld [vmem:[#allocation16 + $0x20] sm:$0xff] }
0x20cf   :  { %v4033_v48 = vpop.permute.xlu0 %4032 }
0x20d0   :  { %v7635_v2 = vadd.f32 %v4033_v48, %v4025_v53  ;;  %v4496_v53 = vld [vmem:[#allocation16 + $0x30] sm:$0xff]  ;;  %v4501_v48 = vld [vmem:[#allocation16 + $0x58] sm:$0xff] }
0x20d2   :  { %6464 = vtanh.f32 %v7635_v2 }
0x20d3   :  { %6466 = vpow2.f32 %v5538_v6 }
0x20dc   :  { %v6465_v57 = vpop.eup %6464 }
0x20dd   :  { %4038 = vrot.lane.b32.xlu0 %v6465_v57, %s6756_s1  ;;  %v6467_v17 = vpop.eup %6466  ;;  %v7683_v57 = vpack.c.bf16 %v4496_v53, %v4494_v50 }
0x20de   :  { %v4131_v52 = vadd.f32 1.0, %v6467_v17  ;;  %v4498_v17 = vld [vmem:[#allocation16 + $0x40] sm:$0xff] }
0x20e0   :  { %6468 = vrcp.f32 %v4131_v52  ;;  %v4500_v52 = vld [vmem:[#allocation16 + $0x50] sm:$0xff] }
0x20e1   :  { %6470 = vpow2.f32 %v5535_v51  ;;  %v4503_v51 = vld [vmem:[#allocation16 + $0x68] sm:$0xff] }
0x20ea   :  { %v6469_v58 = vpop.eup %6468 }
0x20eb   :  { %v6471_v61 = vpop.eup %6470 }
0x20ec   :  { %v4019_v45 = vadd.f32 1.0, %v6471_v61  ;;  %v4502_v61 = vld [vmem:[#allocation16 + $0x60] sm:$0xff] }
0x20ee   :  { %6472 = vrcp.f32 %v4019_v45  ;;  %v4504_v45 = vld [vmem:[#allocation16 + $0x70] sm:$0xff] }
0x20f8   :  { %v6473_v63 = vpop.eup %6472 }
0x2139   :  { %v4151_v39 = vpop.permute.xlu1 %4150 }
0x213a   :  { %v4153_v59 = vmul.f32 %v6469_v58, %v4151_v39  ;;  %v4505_v58 = vld [vmem:[#allocation16 + $0x78] sm:$0xff]  ;;  %v7689_v39 = vpack.c.bf16 %v4500_v52, %v4498_v17 }
0x213c   :  { %5543 = vmatmul.mubr.msk.f32.vlgmr.msra.gmra.mrb[24].mxu1 %vm347_vm1, %v4153_v59 }
0x213d   :  { %4573 = vmatprep.mubr.f32.mxu1 %v6753_v1  ;;  %6072 = vmatpush1.bf16.msra.mxu1 %v7676_v36 }
0x213e   :  { %6074 = vmatprep.subr.bf16.mxu1 %v7678_v43 }
0x2141   :  { %6076 = vmatpush1.bf16.msra.mxu1 %v7683_v57 }
0x214f   :  { %v4039_v62 = vpop.permute.xlu0 %4038 }
0x2150   :  { %v4041_v60 = vmul.f32 %v6473_v63, %v4039_v62  ;;  %v7696_v62 = vpack.c.bf16 %v4504_v45, %v4502_v61 }
0x2152   :  { %4042 = vst.msk [vmem:[#allocation3 + $0x3] sm:$0x1] %vm3057_vm2, %v4041_v60  ;;  %5539 = vmatmul.mubr.msk.f32.vlgmr.msra.gmra.mrb[28].mxu0 %vm201_vm0, %v4041_v60 }
0x2153   :  { %6056 = vmatpush1.bf16.msra.mxu0 %v7446_v23  ;;  %4319 = vmatprep.mubr.f32.mxu0 %v6753_v1 }
0x2154   :  { %6058 = vmatprep.subr.bf16.mxu0 %v7449_v27 }
0x2157   :  { %6060 = vmatpush1.bf16.msra.mxu0 %v7453_v49  ;;  %v4326_v49 = vld [vmem:[%s7840_s12] sm:$0x3] }
0x2158   :  { %6094 = vmatprep.subr.bf16.mxu0 %v7617_v56  ;;  %v4331_v9 = vrot.slane %v4326_v49, %v7008_v30  ;;  %v4335_v18 = vrot.slane %v4326_v49, %v7010_v31  ;;  %v4485_v49 = vld [vmem:[#allocation14 + $0x18] sm:$0xff] }
0x215a   :  { %5540 = vmatmul.mubr.msk.f32.vlgmr.msra.gmra.mrb[28].mxu0 %vm347_vm1, %v4153_v59  ;;  %v7692_v59 = vpack.c.bf16 %v4505_v58, %v4503_v51 }
0x215b   :  { %6096 = vmatpush1.bf16.msra.mxu0 %v7619_v8  ;;  %4771 = vmatprep.mubr.f32.mxu0 %v6753_v1 }
0x215c   :  { %6098 = vmatprep.subr.bf16.mxu0 %v7621_v15 }
0x215f   :  { %6100 = vmatpush1.bf16.msra.mxu0 %v7626_v33 }
0x2160   :  { %6102 = vmatprep.subr.bf16.mxu0 %v7674_v54 }
0x220f   :  { %v4445_v21 = vpop.f32.mrb[24].mxu1 }
0x2210   :  { %v4447_v23 = vpop.f32.mrb[25].mxu1  ;;  %v4450_v55 = vadd.f32 %v4445_v21, %v7415_v3 }
0x2211   :  { %v7654_v28 = vadd.f32 %v4447_v23, %v7407_v47 }
0x2212   :  { %v5544_v37 = vmul.f32 -1.442695, %v4450_v55 }
0x2213   :  { %6474 = vtanh.f32 %v7654_v28 }
0x221d   :  { %v6475_v27 = vpop.eup %6474 }
0x221e   :  { %4467 = vrot.lane.b32.xlu1 %v6475_v27, %s6756_s1  ;;  %v4483_v27 = vld [vmem:[#allocation14 + $0x8] sm:$0xff] }
0x222d   :  { %v4321_v29 = vpop.f32.mrb[28].mxu0 }
0x222e   :  { %v4338_v38 = vadd.f32 %v4331_v9, %v4321_v29  ;;  %v4323_v10 = vpop.f32.mrb[29].mxu0  ;;  %v7704_v9 = vpack.c.bf16 %v4485_v49, %v4483_v27  ;;  %v5545_v29 = vmul.f32 -1.442695, %v7654_v28 }
0x222f   :  { %v7663_v0 = vadd.f32 %v4335_v18, %v4323_v10 }
0x2230   :  { %v5541_v11 = vmul.f32 -1.442695, %v4338_v38 }
0x2231   :  { %6476 = vtanh.f32 %v7663_v0 }
0x2232   :  { %6478 = vpow2.f32 %v5544_v37 }
0x223b   :  { %v6477_v5 = vpop.eup %6476 }
0x223c   :  { %4355 = vrot.lane.b32.xlu0 %v6477_v5, %s6756_s1  ;;  %v6479_v12 = vpop.eup %6478 }
0x223d   :  { %v4458_v13 = vadd.f32 1.0, %v6479_v12  ;;  %v4482_v12 = vld [vmem:[#allocation14] sm:$0xff] }
0x223f   :  { %6480 = vrcp.f32 %v4458_v13  ;;  %v4484_v13 = vld [vmem:[#allocation14 + $0x10] sm:$0xff] }
0x2240   :  { %6482 = vpow2.f32 %v5541_v11  ;;  %v4487_v11 = vld [vmem:[#allocation14 + $0x28] sm:$0xff] }
0x2249   :  { %v6481_v14 = vpop.eup %6480 }
0x224a   :  { %v6483_v19 = vpop.eup %6482  ;;  %v4465_v35 = vmul.f32 %v6481_v14, %v7630_v16  ;;  %v4499_v16 = vld [vmem:[#allocation16 + $0x48] sm:$0xff] }
0x224b   :  { %v4346_v26 = vadd.f32 1.0, %v6483_v19  ;;  %v7686_v6 = vpack.c.bf16 %v4501_v48, %v4499_v16  ;;  %v7720_v19 = vpack.c.bf16 %v4484_v13, %v4482_v12 }
0x224d   :  { %6484 = vrcp.f32 %v4346_v26  ;;  %6078 = vmatprep.subr.bf16.mxu1 %v7686_v6 }
0x224e   :  { %6080 = vmatpush1.bf16.msra.mxu1 %v7689_v39 }
0x224f   :  { %6082 = vmatprep.subr.bf16.mxu1 %v7692_v59 }
0x2252   :  { %6084 = vmatpush1.bf16.msra.mxu1 %v7696_v62 }
0x2253   :  { %6086 = vmatprep.subr.bf16.mxu1 %v7704_v9 }
0x2257   :  { %v6485_v34 = vpop.eup %6484 }
0x2258   :  { %v4353_v60 = vmul.f32 %v6485_v34, %v7635_v2  ;;  %v5542_v2 = vmul.f32 -1.442695, %v7663_v0 }
0x2290   :  { %v4468_v46 = vpop.permute.xlu1 %4467 }
0x2291   :  { %v4470_v25 = vmul.f32 %v6481_v14, %v4468_v46  ;;  %v4489_v14 = vld [vmem:[#allocation14 + $0x38] sm:$0xff] }
0x2293   :  { %4472 = vrot.lane.b32.xlu1 %v4470_v25, %s6756_s1 }
0x22ae   :  { %v4356_v24 = vpop.permute.xlu0 %4355 }
0x22af   :  { %v4358_v40 = vmul.f32 %v6485_v34, %v4356_v24  ;;  %v7722_v34 = vpack.c.bf16 %v4489_v14, %v4487_v11  ;;  %v4486_v24 = vld [vmem:[#allocation14 + $0x20] sm:$0xff] }
0x22b1   :  { %4360 = vrot.lane.b32.xlu0 %v4358_v40, %s6756_s1  ;;  %v4488_v40 = vld [vmem:[#allocation14 + $0x30] sm:$0xff] }
0x2305   :  { %v4473_v41 = vpop.permute.xlu1 %4472 }
0x2306   :  { %v7671_v42 = vadd.f32 %v4473_v41, %v4465_v35  ;;  %v7727_v35 = vpack.c.bf16 %v4488_v40, %v4486_v24 }
0x2308   :  { %6486 = vtanh.f32 %v7671_v42 }
0x2312   :  { %v6487_v63 = vpop.eup %6486 }
0x2313   :  { %4478 = vrot.lane.b32.xlu1 %v6487_v63, %s6756_s1 }
0x2323   :  { %v4361_v21 = vpop.permute.xlu0 %4360 }
0x2324   :  { %v7701_v23 = vadd.f32 %v4361_v21, %v4353_v60 }
0x2326   :  { %6488 = vtanh.f32 %v7701_v23 }
0x2327   :  { %6490 = vpow2.f32 %v5545_v29 }
0x2330   :  { %v6489_v18 = vpop.eup %6488 }
0x2331   :  { %4366 = vrot.lane.b32.xlu0 %v6489_v18, %s6756_s1  ;;  %v6491_v38 = vpop.eup %6490 }
0x2332   :  { %v4459_v10 = vadd.f32 1.0, %v6491_v38 }
0x2334   :  { %6492 = vrcp.f32 %v4459_v10 }
0x2335   :  { %6494 = vpow2.f32 %v5542_v2 }
0x233e   :  { %v6493_v5 = vpop.eup %6492 }
0x233f   :  { %v6495_v28 = vpop.eup %6494 }
0x2340   :  { %v4347_v0 = vadd.f32 1.0, %v6495_v28 }
0x2342   :  { %6496 = vrcp.f32 %v4347_v0 }
0x234c   :  { %v6497_v46 = vpop.eup %6496 }
0x2385   :  { %v4479_v55 = vpop.permute.xlu1 %4478 }
0x2386   :  { %v4481_v37 = vmul.f32 %v6493_v5, %v4479_v55 }
0x2388   :  { %5550 = vmatmul.mubr.msk.f32.vlgmr.msra.gmra.mrb[30].mxu0 %vm347_vm1, %v4481_v37 }
0x2389   :  { %6104 = vmatpush1.bf16.msra.mxu0 %v7676_v36  ;;  %4901 = vmatprep.mubr.f32.mxu0 %v6753_v1 }
0x238a   :  { %6106 = vmatprep.subr.bf16.mxu0 %v7678_v43 }
0x238d   :  { %6108 = vmatpush1.bf16.msra.mxu0 %v7683_v57 }
0x238e   :  { %6110 = vmatprep.subr.bf16.mxu0 %v7686_v6 }
0x2391   :  { %6112 = vmatpush1.bf16.msra.mxu0 %v7689_v39 }
0x2392   :  { %6114 = vmatprep.subr.bf16.mxu0 %v7692_v59 }
0x2395   :  { %6116 = vmatpush1.bf16.msra.mxu0 %v7696_v62 }
0x2396   :  { %6118 = vmatprep.subr.bf16.mxu0 %v7704_v9 }
0x23a3   :  { %v4367_v25 = vpop.permute.xlu0 %4366 }
0x23a4   :  { %v4369_v26 = vmul.f32 %v6497_v46, %v4367_v25 }
0x23a6   :  { %4370 = vst.msk [vmem:[#allocation3 + $0x4] sm:$0x1] %vm3057_vm2, %v4369_v26  ;;  %5546 = vmatmul.mubr.msk.f32.vlgmr.msra.gmra.mrb[26].mxu1 %vm201_vm0, %v4369_v26 }
0x23a7   :  { %6088 = vmatpush1.bf16.msra.mxu1 %v7720_v19  ;;  %4647 = vmatprep.mubr.f32.mxu1 %v6753_v1 }
0x23a8   :  { %6090 = vmatprep.subr.bf16.mxu1 %v7722_v34 }
0x23ab   :  { %6092 = vmatpush1.bf16.msra.mxu1 %v7727_v35 }
0x23ac   :  { %6126 = vmatprep.subr.bf16.mxu1 %v7617_v56  ;;  %v4654_v56 = vld [vmem:[%s7840_s12] sm:$0x3] }
0x23ae   :  { %5547 = vmatmul.mubr.msk.f32.vlgmr.msra.gmra.mrb[26].mxu1 %vm347_vm1, %v4481_v37 }
0x23af   :  { %6128 = vmatpush1.bf16.msra.mxu1 %v7619_v8  ;;  %5099 = vmatprep.mubr.f32.mxu1 %v6753_v1  ;;  %v4659_v8 = vrot.slane %v4654_v56, %v7008_v30 }
0x23b0   :  { %6130 = vmatprep.subr.bf16.mxu1 %v7621_v15  ;;  %v4663_v15 = vrot.slane %v4654_v56, %v7010_v31 }
0x23b3   :  { %6132 = vmatpush1.bf16.msra.mxu1 %v7626_v33 }
0x23b4   :  { %6134 = vmatprep.subr.bf16.mxu1 %v7674_v54 }
0x245b   :  { %v4773_v41 = vpop.f32.mrb[30].mxu0 }
0x245c   :  { %v4775_v44 = vpop.f32.mrb[31].mxu0  ;;  %v4778_v50 = vadd.f32 %v4773_v41, %v7415_v3 }
0x245d   :  { %v4779_v20 = vadd.f32 %v4775_v44, %v7407_v47 }
0x245e   :  { %v5551_v53 = vmul.f32 -1.442695, %v4778_v50 }
0x245f   :  { %6498 = vtanh.f32 %v4779_v20  ;;  %v5552_v55 = vmul.f32 -1.442695, %v4779_v20 }
0x2469   :  { %v6499_v22 = vpop.eup %6498 }
0x246a   :  { %4795 = vrot.lane.b32.xlu1 %v6499_v22, %s6756_s1 }
0x2481   :  { %v4649_v7 = vpop.f32.mrb[26].mxu1 }
0x2482   :  { %v4666_v33 = vadd.f32 %v4659_v8, %v4649_v7  ;;  %v4651_v4 = vpop.f32.mrb[27].mxu1 }
0x2483   :  { %v4667_v54 = vadd.f32 %v4663_v15, %v4651_v4 }
0x2484   :  { %v5548_v58 = vmul.f32 -1.442695, %v4666_v33 }
0x2485   :  { %6500 = vtanh.f32 %v4667_v54  ;;  %v5549_v13 = vmul.f32 -1.442695, %v4667_v54 }
0x2486   :  { %6502 = vpow2.f32 %v5551_v53 }
0x248f   :  { %v6501_v32 = vpop.eup %6500 }
0x2490   :  { %4683 = vrot.lane.b32.xlu0 %v6501_v32, %s6756_s1  ;;  %v6503_v16 = vpop.eup %6502 }
0x2491   :  { %v4786_v48 = vadd.f32 1.0, %v6503_v16 }
0x2493   :  { %6504 = vrcp.f32 %v4786_v48 }
0x2494   :  { %6506 = vpow2.f32 %v5548_v58 }
0x249d   :  { %v6505_v17 = vpop.eup %6504 }
0x249e   :  { %v6507_v61 = vpop.eup %6506  ;;  %v4793_v27 = vmul.f32 %v6505_v17, %v7671_v42 }
0x249f   :  { %v4674_v45 = vadd.f32 1.0, %v6507_v61 }
0x24a1   :  { %6508 = vrcp.f32 %v4674_v45 }
0x24ab   :  { %v6509_v63 = vpop.eup %6508 }
0x24ac   :  { %v4681_v38 = vmul.f32 %v6509_v63, %v7701_v23 }
0x24dc   :  { %v4796_v52 = vpop.permute.xlu1 %4795 }
0x24dd   :  { %v4798_v51 = vmul.f32 %v6505_v17, %v4796_v52 }
0x24df   :  { %4800 = vrot.lane.b32.xlu1 %v4798_v51, %s6756_s1 }
0x2502   :  { %v4684_v60 = vpop.permute.xlu0 %4683 }
0x2503   :  { %v4686_v21 = vmul.f32 %v6509_v63, %v4684_v60 }
0x2505   :  { %4688 = vrot.lane.b32.xlu0 %v4686_v21, %s6756_s1 }
0x2551   :  { %v4801_v49 = vpop.permute.xlu1 %4800 }
0x2552   :  { %v7751_v18 = vadd.f32 %v4801_v49, %v4793_v27 }
0x2554   :  { %6510 = vtanh.f32 %v7751_v18 }
0x255e   :  { %v6511_v29 = vpop.eup %6510 }
0x255f   :  { %4806 = vrot.lane.b32.xlu1 %v6511_v29, %s6756_s1 }
0x2577   :  { %v4689_v10 = vpop.permute.xlu0 %4688 }
0x2578   :  { %v7756_v2 = vadd.f32 %v4689_v10, %v4681_v38 }
0x257a   :  { %6512 = vtanh.f32 %v7756_v2 }
0x257b   :  { %6514 = vpow2.f32 %v5552_v55 }
0x2584   :  { %v6513_v5 = vpop.eup %6512 }
0x2585   :  { %4694 = vrot.lane.b32.xlu0 %v6513_v5, %s6756_s1  ;;  %v6515_v42 = vpop.eup %6514  ;;  %v5310_v5 = vld [vmem:[%s7840_s12] sm:$0x3] }
0x2586   :  { %v4787_v37 = vadd.f32 1.0, %v6515_v42  ;;  %v5315_v55 = vrot.slane %v5310_v5, %v7008_v30  ;;  %v5319_v42 = vrot.slane %v5310_v5, %v7010_v31 }
0x2588   :  { %6516 = vrcp.f32 %v4787_v37 }
0x2589   :  { %6518 = vpow2.f32 %v5549_v13 }
0x2592   :  { %v6517_v28 = vpop.eup %6516 }
0x2593   :  { %v6519_v23 = vpop.eup %6518 }
0x2594   :  { %v4675_v11 = vadd.f32 1.0, %v6519_v23 }
0x2596   :  { %6520 = vrcp.f32 %v4675_v11 }
0x25d1   :  { %v4807_v0 = vpop.permute.xlu1 %4806 }
0x25d2   :  { %v4809_v12 = vmul.f32 %v6517_v28, %v4807_v0 }
0x25d4   :  { %5557 = vmatmul.mubr.msk.f32.vlgmr.msra.gmra.mrb[28].mxu1 %vm347_vm1, %v4809_v12 }
0x25d5   :  { %6136 = vmatpush1.bf16.msra.mxu1 %v7676_v36  ;;  %5229 = vmatprep.mubr.f32.mxu1 %v6753_v1  ;;  %v6521_v36 = vpop.eup %6520 }
0x25d6   :  { %6138 = vmatprep.subr.bf16.mxu1 %v7678_v43 }
0x25d9   :  { %6140 = vmatpush1.bf16.msra.mxu1 %v7683_v57 }
0x25da   :  { %6142 = vmatprep.subr.bf16.mxu1 %v7686_v6 }
0x25dd   :  { %6144 = vmatpush1.bf16.msra.mxu1 %v7689_v39 }
0x25de   :  { %6146 = vmatprep.subr.bf16.mxu1 %v7692_v59  ;;  %v4982_v59 = vld [vmem:[%s7840_s12] sm:$0x3] }
0x25e1   :  { %6148 = vmatpush1.bf16.msra.mxu1 %v7696_v62  ;;  %v4987_v62 = vrot.slane %v4982_v59, %v7008_v30 }
0x25e2   :  { %6150 = vmatprep.subr.bf16.mxu1 %v7704_v9  ;;  %v4991_v9 = vrot.slane %v4982_v59, %v7010_v31 }
0x25f7   :  { %v4695_v14 = vpop.permute.xlu0 %4694 }
0x25f8   :  { %v4697_v46 = vmul.f32 %v6521_v36, %v4695_v14 }
0x25fa   :  { %4698 = vst.msk [vmem:[#allocation3 + $0x5] sm:$0x1] %vm3057_vm2, %v4697_v46  ;;  %5553 = vmatmul.mubr.msk.f32.vlgmr.msra.gmra.mrb[32].mxu0 %vm201_vm0, %v4697_v46 }
0x25fb   :  { %6120 = vmatpush1.bf16.msra.mxu0 %v7720_v19  ;;  %4975 = vmatprep.mubr.f32.mxu0 %v6753_v1 }
0x25fc   :  { %6122 = vmatprep.subr.bf16.mxu0 %v7722_v34 }
0x25ff   :  { %6124 = vmatpush1.bf16.msra.mxu0 %v7727_v35 }
0x2600   :  { %5568 = vmatprep.subr.mxu0 %v6753_v1 }
0x2602   :  { %5554 = vmatmul.mubr.msk.f32.vlgmr.msra.gmra.mrb[32].mxu0 %vm347_vm1, %v4809_v12 }
0x2603   :  { %5570 = vmatprep.mubr.msk.f32.mxu0 %vm6757_vm3, %v6753_v1 }
0x26a7   :  { %v5101_v43 = vpop.f32.mrb[28].mxu1 }
0x26a8   :  { %v5103_v57 = vpop.f32.mrb[29].mxu1 }
0x26a9   :  { %v5107_v6 = vadd.f32 %v5103_v57, %v7407_v47  ;;  %v5106_v47 = vadd.f32 %v5101_v43, %v7415_v3  ;;  %v5357_v57 = vld [vmem:[#allocation4] sm:$0x1] }
0x26ab   :  { %6522 = vtanh.f32 %v5107_v6  ;;  %v5558_v44 = vmul.f32 -1.442695, %v5106_v47  ;;  %v5559_v45 = vmul.f32 -1.442695, %v5107_v6 }
0x26b5   :  { %v6523_v39 = vpop.eup %6522 }
0x26b6   :  { %5123 = vrot.lane.b32.xlu1 %v6523_v39, %s6756_s1 }
0x26d5   :  { %v4977_v25 = vpop.f32.mrb[32].mxu0 }
0x26d6   :  { %v4994_v26 = vadd.f32 %v4987_v62, %v4977_v25  ;;  %v4979_v24 = vpop.f32.mrb[33].mxu0 }
0x26d7   :  { %v4995_v40 = vadd.f32 %v4991_v9, %v4979_v24 }
0x26d8   :  { %v5555_v7 = vmul.f32 -1.442695, %v4994_v26 }
0x26d9   :  { %6524 = vtanh.f32 %v4995_v40  ;;  %v5556_v61 = vmul.f32 -1.442695, %v4995_v40 }
0x26da   :  { %6526 = vpow2.f32 %v5558_v44 }
0x26e3   :  { %v6525_v41 = vpop.eup %6524 }
0x26e4   :  { %5011 = vrot.lane.b32.xlu0 %v6525_v41, %s6756_s1  ;;  %v6527_v20 = vpop.eup %6526 }
0x26e5   :  { %v5114_v22 = vadd.f32 1.0, %v6527_v20 }
0x26e7   :  { %6528 = vrcp.f32 %v5114_v22 }
0x26e8   :  { %6530 = vpow2.f32 %v5555_v7 }
0x26f1   :  { %v6529_v56 = vpop.eup %6528 }
0x26f2   :  { %v6531_v33 = vpop.eup %6530  ;;  %v5121_v3 = vmul.f32 %v6529_v56, %v7751_v18 }
0x26f3   :  { %v5002_v4 = vadd.f32 1.0, %v6531_v33 }
0x26f5   :  { %6532 = vrcp.f32 %v5002_v4 }
0x26ff   :  { %v6533_v54 = vpop.eup %6532 }
0x2700   :  { %v5009_v17 = vmul.f32 %v6533_v54, %v7756_v2 }
0x2728   :  { %v5124_v8 = vpop.permute.xlu1 %5123 }
0x2729   :  { %v5126_v15 = vmul.f32 %v6529_v56, %v5124_v8 }
0x272b   :  { %5128 = vrot.lane.b32.xlu1 %v5126_v15, %s6756_s1 }
0x2756   :  { %v5012_v32 = vpop.permute.xlu0 %5011 }
0x2757   :  { %v5014_v50 = vmul.f32 %v6533_v54, %v5012_v32 }
0x2759   :  { %5016 = vrot.lane.b32.xlu0 %v5014_v50, %s6756_s1 }
0x279d   :  { %v5129_v53 = vpop.permute.xlu1 %5128 }
0x279e   :  { %v5131_v16 = vadd.f32 %v5129_v53, %v5121_v3 }
0x27a0   :  { %6534 = vtanh.f32 %v5131_v16 }
0x27aa   :  { %v6535_v48 = vpop.eup %6534 }
0x27ab   :  { %5134 = vrot.lane.b32.xlu1 %v6535_v48, %s6756_s1 }
0x27cb   :  { %v5017_v52 = vpop.permute.xlu0 %5016 }
0x27cc   :  { %v5019_v51 = vadd.f32 %v5017_v52, %v5009_v17 }
0x27ce   :  { %6536 = vtanh.f32 %v5019_v51 }
0x27cf   :  { %6538 = vpow2.f32 %v5556_v61 }
0x27d0   :  { %6540 = vpow2.f32 %v5559_v45 }
0x27d8   :  { %v6537_v58 = vpop.eup %6536 }
0x27d9   :  { %5022 = vrot.lane.b32.xlu0 %v6537_v58, %s6756_s1  ;;  %v6539_v63 = vpop.eup %6538 }
0x27da   :  { %v5003_v60 = vadd.f32 1.0, %v6539_v63  ;;  %v6541_v21 = vpop.eup %6540 }
0x27db   :  { %v5115_v27 = vadd.f32 1.0, %v6541_v21 }
0x27dc   :  { %6542 = vrcp.f32 %v5003_v60 }
0x27dd   :  { %6544 = vrcp.f32 %v5115_v27 }
0x27e6   :  { %v6543_v49 = vpop.eup %6542 }
0x27e7   :  { %v6545_v10 = vpop.eup %6544 }
0x281d   :  { %v5135_v38 = vpop.permute.xlu1 %5134 }
0x281e   :  { %v5137_v2 = vmul.f32 %v6545_v10, %v5135_v38 }
0x284b   :  { %v5023_v18 = vpop.permute.xlu0 %5022 }
0x284c   :  { %v5025_v29 = vmul.f32 %v6543_v49, %v5023_v18 }
0x284e   :  { %5026 = vst.msk [vmem:[#allocation3 + $0x6] sm:$0x1] %vm3057_vm2, %v5025_v29  ;;  %5560 = vmatmul.mubr.msk.f32.vlgmr.msra.gmra.mrb[30].mxu1 %vm201_vm0, %v5025_v29 }
0x284f   :  { %6152 = vmatpush1.bf16.msra.mxu1 %v7720_v19  ;;  %5303 = vmatprep.mubr.f32.mxu1 %v6753_v1  ;;  %v5356_v1 = vld [vmem:[%s7841_s13] sm:$0x1] }
0x2850   :  { %6154 = vmatprep.subr.bf16.mxu1 %v7722_v34 }
0x2853   :  { %6156 = vmatpush1.bf16.msra.mxu1 %v7727_v35 }
0x2856   :  { %5561 = vmatmul.mubr.msk.f32.vlgmr.msra.gmra.mrb[30].mxu1 %vm347_vm1, %v5137_v2 }
0x2929   :  { %v5305_v19 = vpop.f32.mrb[30].mxu1 }
0x292a   :  { %v5322_v37 = vadd.f32 %v5315_v55, %v5305_v19  ;;  %v5307_v28 = vpop.f32.mrb[31].mxu1 }
0x292b   :  { %v5323_v0 = vadd.f32 %v5319_v42, %v5307_v28 }
0x292c   :  { %v5562_v35 = vmul.f32 -1.442695, %v5322_v37 }
0x292d   :  { %6546 = vtanh.f32 %v5323_v0  ;;  %v5563_v6 = vmul.f32 -1.442695, %v5323_v0 }
0x292e   :  { %6548 = vpow2.f32 %v5562_v35 }
0x2937   :  { %v6547_v34 = vpop.eup %6546 }
0x2938   :  { %5339 = vrot.lane.b32.xlu0 %v6547_v34, %s6756_s1  ;;  %v6549_v12 = vpop.eup %6548 }
0x2939   :  { %v5330_v13 = vadd.f32 1.0, %v6549_v12 }
0x293b   :  { %6550 = vrcp.f32 %v5330_v13 }
0x2945   :  { %v6551_v23 = vpop.eup %6550 }
0x2946   :  { %v5337_v14 = vmul.f32 %v6551_v23, %v5019_v51 }
0x29aa   :  { %v5340_v11 = vpop.permute.xlu0 %5339 }
0x29ab   :  { %v5342_v36 = vmul.f32 %v6551_v23, %v5340_v11 }
0x29ad   :  { %5344 = vrot.lane.b32.xlu1 %v5342_v36, %s6756_s1 }
0x29b1   :  { %5360 = vperm.xlu1 %6205, %v5357_v57  }
0x2a1f   :  { %v5345_v31 = vpop.permute.xlu1 %5344 }
0x2a20   :  { %v5347_v46 = vadd.f32 %v5345_v31, %v5337_v14 }
0x2a22   :  { %6552 = vtanh.f32 %v5347_v46 }
0x2a23   :  { %6554 = vpow2.f32 %v5563_v6 }
0x2a2c   :  { %v6553_v43 = vpop.eup %6552 }
0x2a2d   :  { %5350 = vrot.lane.b32.xlu0 %v6553_v43, %s6756_s1  ;;  %v6555_v39 = vpop.eup %6554 }
0x2a2e   :  { %v5331_v59 = vadd.f32 1.0, %v6555_v39 }
0x2a30   :  { %6556 = vrcp.f32 %v5331_v59  ;;  %v5361_v24 = vpop.permute.xlu1 %5360 }
0x2a31   :  { %v5366_v40 = vrot.slane %v5361_v24, %v7008_v30 }
0x2a3a   :  { %v6557_v62 = vpop.eup %6556 }
0x2a9f   :  { %v5351_v9 = vpop.permute.xlu0 %5350 }
0x2aa0   :  { %v5353_v25 = vmul.f32 %v6557_v62, %v5351_v9 }
0x2aa2   :  { %5354 = vst.msk [vmem:[#allocation3 + $0x7] sm:$0x1] %vm3057_vm2, %v5353_v25 }
0x2aa9   :  { %v5355_v26 = vld [vmem:[#allocation3] sm:$0xff] }
0x2aaa   :  { %5569 = vmatpush3.xpose.msk.msra.mxu0 %vm201_vm0, %v5355_v26 }
0x2aad   :  { %5571 = vmatmul.mubr.msk.f32.vlgmr.msra.gmra.mrb[34].mxu0 %vm201_vm0, %v5356_v1 }
0x2b80   :  { %v5439_v41 = vpop.f32.mrb[34].mxu0 }
0x2b81   :  { %v5440_v47 = vadd.f32 %v5439_v41, %v5366_v40  ;;  %v5572_v44 = vpop.f32.mrb[35].mxu0 }
0x2b83   :  { %5444 = vst.msk [vmem:[#allocation17] sm:$0x1] %vm5443_vm4, %v5440_v47 }
0x2b84   :  { %6723 = shalt.err (!%p6720_p4)
}
0x2b85   :  { %s6724_s30 = scalar_lea.hbm %s7843_s15, 16 }
0x2b86   :  { %p6725_p5 = scmp.ne.s32.totalorder %s7843_s15, %s6724_s30  ;;  %p6728_p6 = scmp.lt.u32.totalorder %s6724_s30, %s7843_s15 }
0x2b88   :  { %p6730_p7 = pnand %p6728_p6, %p6725_p5 }
0x2b8a   :  { %6733 = shalt.err (!%p6730_p7)
}
0x2b8b   :  { %5454 = dma.vmem_to_hbm [thread:$0]  %s5452_s16, 16, %s7843_s15, [#allocation7]  }
0x2b8c   :  { %6742 = dma.done.wait [#allocation7], 16  }
0x2b8d   :  { %6743 = vsyncadd [#allocation7], 4294967280 }
0x2b8e   :  { %5458 = vsyncpa [#allocation6], 1 }
0x2b8f   :  { %5459 = vsyncpa [#allocation9], 1 }
0x2b90   :  { %5460 = vsyncpa [#allocation12], 1 }
0x2b91   :  { %5461 = vsyncpa [#allocation15], 1 }
0x2b92   :  { %5462 = vsyncpa [#allocation7], 1 }

</bundles_post_ra>
